<compile_context>
chip_gen: v7x
topology: tpu7x:2x2x1
jax: 0.10.0
libtpu: 0.0.40
codegen_flags: <defaults>
</compile_context>

<pallas_src>
import functools
import math

import jax
import jax.numpy as jnp
from jax.experimental import pallas as pl
from jax.experimental.pallas import tpu as pltpu


# ---------------------------------------------------------------------------
# Hardware-aware sizing helpers
# ---------------------------------------------------------------------------

def _vmem_budget_bytes():
    """Usable VMEM budget: ~70% of physical capacity, 64MiB (v7x) fallback."""
    try:
        cap = int(pltpu.get_tpu_info().vmem_capacity_bytes)
    except Exception:
        cap = 64 * 1024 * 1024  # v7x-sized fallback; safe on every generation
    return max(16 * 1024 * 1024, int(cap * 0.7))


def _const_spec(shape, single_buffer):
    """Full-array BlockSpec for a grid-invariant operand (weights / bias / rep)."""
    idx = lambda n, s: (0,) * len(shape)
    if single_buffer:
        # Constant index_map -> never re-fetched; one VMEM buffer is enough.
        return pl.BlockSpec(shape, idx, pipeline_mode=pl.Buffered(1))
    return pl.BlockSpec(shape, idx)


# ---------------------------------------------------------------------------
# Kernels
# ---------------------------------------------------------------------------

def _concat_conv_kernel(xh_ref, xl_ref, wh_ref, wl_ref, b_ref, o_ref):
    # No-upsample path.  Spatial is flattened into lanes.
    # xh: (1, C_hi, ts) bf16 ; xl: (1, C_lo, ts) bf16
    # wh/wl: (Cout, C_*) bf16 (BN scale folded in) ; b: (Cout, 1) f32
    # o: (1, Cout, ts)  (lane-dense, matches MXU output layout)
    acc = jnp.dot(wh_ref[...], xh_ref[0], preferred_element_type=jnp.float32)
    acc = acc + jnp.dot(wl_ref[...], xl_ref[0], preferred_element_type=jnp.float32)
    o_ref[0] = jnp.maximum(acc + b_ref[...], 0.0).astype(o_ref.dtype)


def _upsample_concat_conv_kernel(x_ref, y_ref, wh_ref, wl_ref, rep_ref, b_ref,
                                 o_ref, *, rows, src_w):
    # Fused nearest-2x-upsample path.
    # x: (1, C_hi, rows*W)   bf16, half-res rows, row-major flattened
    # y: (1, C_lo, rows*4W)  bf16, full-res rows matching the output block
    # rep: (W, 2W) f32 0/1 column-duplication matrix (exact)
    # o: (1, Cout, rows*4W)
    wh = wh_ref[...]
    wl = wl_ref[...]
    rep = rep_ref[...]
    bias = b_ref[...]
    w = src_w
    for i in range(rows):                 # static unroll over source rows
        # High branch computed at HALF resolution (4x fewer MACs), then the
        # column duplication is a tiny exact f32 matmul on the MXU.
        h = jnp.dot(wh, x_ref[0, :, pl.ds(i * w, w)],
                    preferred_element_type=jnp.float32)            # (Cout, W)
        h2 = jnp.dot(h, rep, preferred_element_type=jnp.float32)   # (Cout, 2W)
        for d in range(2):                # the two row-duplicated output rows
            off = i * 4 * w + d * 2 * w
            low = jnp.dot(wl, y_ref[0, :, pl.ds(off, 2 * w)],
                          preferred_element_type=jnp.float32)      # (Cout, 2W)
            o_ref[0, :, pl.ds(off, 2 * w)] = jnp.maximum(
                h2 + low + bias, 0.0).astype(o_ref.dtype)


# ---------------------------------------------------------------------------
# pallas_call wrappers
# ---------------------------------------------------------------------------

def _fused_cat_flat(x_hi, x_lo, w_hi, w_lo, bias, *, out_dtype=jnp.float32):
    """Fused concat + 1x1 conv + folded BN + ReLU (both branches same spatial size)."""
    N, c_hi, S = x_hi.shape
    _, c_lo, _ = x_lo.shape
    c_out = w_hi.shape[0]
    in_b = x_hi.dtype.itemsize
    out_b = jnp.dtype(out_dtype).itemsize

    budget = _vmem_budget_bytes()
    per_lane = 2 * ((c_hi + c_lo) * in_b + c_out * out_b)   # double-buffered bytes/lane
    ts_cap = 8192 if budget >= 80 * 1024 * 1024 else 2048   # v5e/v6e vs v7x
    if S >= 128:
        ts = min(ts_cap, max(128, (budget // 2) // per_lane), S)
        ts = max(128, (ts // 128) * 128)
    else:
        # TODO(synk): pad S to 128 (or fold N into lanes) to avoid masked stores.
        ts = S
    n_s = pl.cdiv(S, ts)

    cost = pl.CostEstimate(
        flops=int(2 * N * S * (c_hi + c_lo) * c_out),
        transcendentals=0,
        bytes_accessed=int(x_hi.size * in_b + x_lo.size * in_b
                           + N * c_out * S * out_b
                           + (w_hi.size + w_lo.size) * in_b + bias.size * 4),
    )

    def build(single_buffer):
        return pl.pallas_call(
            _concat_conv_kernel,
            out_shape=jax.ShapeDtypeStruct((N, c_out, S), out_dtype),
            grid_spec=pltpu.PrefetchScalarGridSpec(
                num_scalar_prefetch=0,
                grid=(N, n_s),
                in_specs=[
                    pl.BlockSpec((1, c_hi, ts), lambda n, s: (n, 0, s)),
                    pl.BlockSpec((1, c_lo, ts), lambda n, s: (n, 0, s)),
                    _const_spec((c_out, c_hi), single_buffer),
                    _const_spec((c_out, c_lo), single_buffer),
                    _const_spec((c_out, 1), single_buffer),
                ],
                out_specs=pl.BlockSpec((1, c_out, ts), lambda n, s: (n, 0, s)),
            ),
            compiler_params=pltpu.CompilerParams(
                dimension_semantics=("parallel", "parallel"),
                vmem_limit_bytes=budget,
            ),
            cost_estimate=cost,
        )

    args = (x_hi, x_lo, w_hi, w_lo, bias)
    try:
        return build(True)(*args)
    except Exception:   # pl.Buffered(1) unsupported -> default double buffering
        return build(False)(*args)


def _fused_cat_upsample(x_hi, x_lo, w_hi, w_lo, bias, H, W, *, out_dtype=jnp.float32):
    """Fused nearest-2x-upsample(x) + concat + 1x1 conv + folded BN + ReLU.

    x_hi: (N, C_hi, H*W) bf16 (half resolution, row-major flattened)
    x_lo: (N, C_lo, 4*H*W) bf16 (full resolution). Returns (N, Cout, 4*H*W).
    """
    N, c_hi, s_src = x_hi.shape
    _, c_lo, s_out = x_lo.shape
    c_out = w_hi.shape[0]
    assert s_src == H * W and s_out == 4 * H * W
    in_b = x_hi.dtype.itemsize
    out_b = jnp.dtype(out_dtype).itemsize

    budget = _vmem_budget_bytes()
    # HBM bytes touched per source row (x row + 2 y rows + 2 output rows).
    per_row = c_hi * W * in_b + (c_lo * in_b + c_out * out_b) * 4 * W
    soft = max(per_row, min(budget // 8, 4 * 1024 * 1024))
    rows = int(min(soft // per_row, max(1, (budget // 3) // per_row), 32, H))
    if rows >= H:
        rows = H                            # full-extent block ('equal full dim' rule)
    else:
        unit = 128 // math.gcd(W, 128)      # keep rows*W a multiple of 128 (lane tiling)
        rows = (rows // unit) * unit
        if rows == 0:
            # TODO(synk): very odd widths may force a larger-than-ideal row block here.
            rows = min(H, unit)
    n_r = pl.cdiv(H, rows)
    ts_src = rows * W
    ts_out = rows * 4 * W

    # Exact 0/1 column-duplication matrix: (h @ rep)[:, 2j] = (h @ rep)[:, 2j+1] = h[:, j]
    rep = jnp.repeat(jnp.eye(W, dtype=jnp.float32), 2, axis=1)      # (W, 2W)

    cost = pl.CostEstimate(
        flops=int(2 * N * H * W * c_hi * c_out          # high branch at half res
                  + 2 * N * H * W * c_out * 2 * W       # column-duplication matmul
                  + 2 * N * 4 * H * W * c_lo * c_out),  # low branch at full res
        transcendentals=0,
        bytes_accessed=int(x_hi.size * in_b + x_lo.size * in_b
                           + N * c_out * s_out * out_b
                           + (w_hi.size + w_lo.size) * in_b
                           + rep.size * 4 + bias.size * 4),
    )

    kernel = functools.partial(_upsample_concat_conv_kernel, rows=rows, src_w=W)

    def build(single_buffer):
        return pl.pallas_call(
            kernel,
            out_shape=jax.ShapeDtypeStruct((N, c_out, s_out), out_dtype),
            grid_spec=pltpu.PrefetchScalarGridSpec(
                num_scalar_prefetch=0,
                grid=(N, n_r),
                in_specs=[
                    pl.BlockSpec((1, c_hi, ts_src), lambda n, r: (n, 0, r)),
                    pl.BlockSpec((1, c_lo, ts_out), lambda n, r: (n, 0, r)),
                    _const_spec((c_out, c_hi), single_buffer),
                    _const_spec((c_out, c_lo), single_buffer),
                    _const_spec((W, 2 * W), single_buffer),
                    _const_spec((c_out, 1), single_buffer),
                ],
                out_specs=pl.BlockSpec((1, c_out, ts_out), lambda n, r: (n, 0, r)),
            ),
            compiler_params=pltpu.CompilerParams(
                dimension_semantics=("parallel", "parallel"),
                vmem_limit_bytes=budget,
            ),
            cost_estimate=cost,
        )

    args = (x_hi, x_lo, w_hi, w_lo, rep, bias)
    try:
        return build(True)(*args)
    except Exception:   # pl.Buffered(1) unsupported -> default double buffering
        return build(False)(*args)


# ---------------------------------------------------------------------------
# Module
# ---------------------------------------------------------------------------

class CatPallas:
    """JAX/Pallas port of mmseg cd_head.cat:
    (optional nearest 2x upsample) -> channel concat -> 1x1 Conv -> BatchNorm(eval) -> ReLU."""

    def __init__(self, in_chn_high, in_chn_low, out_chn, upsample=False, key=None):
        self.do_upsample = upsample
        self.c_high = in_chn_high
        self.c_low = in_chn_low
        self.cin = in_chn_high + in_chn_low
        self.cout = out_chn
        self.act_dtype = jnp.bfloat16   # activation/weight storage (accumulation is f32)
        self.out_dtype = jnp.float32    # keep f32 output to match the torch module

        if key is None:
            key = jax.random.PRNGKey(0)
        k_w, k_b, k_g, k_beta, k_m, k_v = jax.random.split(key, 6)

        # Deterministic synthetic parameters (shapes match the torch module).
        self.conv_w = jax.random.normal(k_w, (out_chn, self.cin), jnp.float32) * 0.1
        self.conv_b = jax.random.normal(k_b, (out_chn,), jnp.float32) * 0.1
        self.bn_gamma = 1.0 + 0.1 * jax.random.normal(k_g, (out_chn,), jnp.float32)
        self.bn_beta = 0.1 * jax.random.normal(k_beta, (out_chn,), jnp.float32)
        self.bn_mean = 0.1 * jax.random.normal(k_m, (out_chn,), jnp.float32)
        self.bn_var = jnp.abs(1.0 + 0.1 * jax.random.normal(k_v, (out_chn,), jnp.float32))
        self.bn_eps = 1e-5

    def folded_params(self):
        """BN(eval) folded into the conv:  relu((s*W) @ x + (s*cb + beta - s*mean))."""
        s = self.bn_gamma / jnp.sqrt(self.bn_var + self.bn_eps)
        bias = (self.conv_b * s + self.bn_beta - self.bn_mean * s).reshape(self.cout, 1)
        w = (self.conv_w * s[:, None]).astype(self.act_dtype)      # scale folded, bf16
        return w[:, :self.c_high], w[:, self.c_high:], bias.astype(jnp.float32)

    def __call__(self, x, y):
        """x: (N, C_high, Hx, Wx), y: (N, C_low, Hy, Wy), NCHW (PyTorch convention)."""
        N, c_hi, Hx, Wx = x.shape
        Ny, c_lo, Hy, Wy = y.shape
        assert N == Ny and c_hi == self.c_high and c_lo == self.c_low
        w_hi, w_lo, bias = self.folded_params()

        if self.do_upsample:
            assert (2 * Hx, 2 * Wx) == (Hy, Wy)
            # x stays at HALF resolution in HBM; the 2x nearest upsample is fused
            # into the kernel (rows via block sizing, columns via a 0/1 matmul).
            x3 = x.reshape(N, c_hi, Hx * Wx).astype(self.act_dtype)
            y3 = y.reshape(N, c_lo, Hy * Wy).astype(self.act_dtype)
            out3 = _fused_cat_upsample(x3, y3, w_hi, w_lo, bias, Hx, Wx,
                                       out_dtype=self.out_dtype)
        else:
            assert (Hx, Wx) == (Hy, Wy)
            S = Hx * Wx
            x3 = x.reshape(N, c_hi, S).astype(self.act_dtype)
            y3 = y.reshape(N, c_lo, S).astype(self.act_dtype)
            out3 = _fused_cat_flat(x3, y3, w_hi, w_lo, bias, out_dtype=self.out_dtype)
        return out3.reshape(N, self.cout, Hy, Wy)


# ---------------------------------------------------------------------------
# References (pure JAX) and self-test
# ---------------------------------------------------------------------------

def _reference_quantized(module, x, y):
    """Reference sharing the kernel's bf16 input/weight quantization (tight check)."""
    w_hi, w_lo, bias = module.folded_params()
    whf, wlf = w_hi.astype(jnp.float32), w_lo.astype(jnp.float32)
    xq = x.astype(module.act_dtype).astype(jnp.float32)
    yq = y.astype(module.act_dtype).astype(jnp.float32)
    if module.do_upsample:
        xq = jnp.repeat(jnp.repeat(xq, 2, axis=2), 2, axis=3)
    hp = jax.lax.Precision.HIGHEST
    z = (jnp.einsum("nchw,oc->nohw", xq, whf, precision=hp)
         + jnp.einsum("nchw,oc->nohw", yq, wlf, precision=hp)
         + bias.reshape(1, -1, 1, 1))
    return jnp.maximum(z, 0.0)


def _reference_raw(module, x, y):
    """Full-precision reference following the torch module exactly (loose check)."""
    if module.do_upsample:
        x = jnp.repeat(jnp.repeat(x, 2, axis=2), 2, axis=3)
    xc = jnp.concatenate([x, y], axis=1)
    hp = jax.lax.Precision.HIGHEST
    z = jnp.einsum("nchw,oc->nohw", xc, module.conv_w, precision=hp) \
        + module.conv_b[None, :, None, None]
    s = module.bn_gamma / jnp.sqrt(module.bn_var + module.bn_eps)
    z = (z - module.bn_mean[None, :, None, None]) * s[None, :, None, None] \
        + module.bn_beta[None, :, None, None]
    return jnp.maximum(z, 0.0)


if __name__ == "__main__":
    key = jax.random.PRNGKey(0)
    k_x, k_y, k_p, k_x2, k_y2 = jax.random.split(key, 5)

    # --- upsample=True path: x at half resolution, y at full resolution ---
    N, C_high, C_low, C_out = 2, 4, 4, 8
    H, W = 8, 8
    x = jax.random.normal(k_x, (N, C_high, H, W), jnp.float32)
    y = jax.random.normal(k_y, (N, C_low, 2 * H, 2 * W), jnp.float32)
    mod = CatPallas(C_high, C_low, C_out, upsample=True, key=k_p)
    out = jax.block_until_ready(mod(x, y))
    assert out.shape == (N, C_out, 2 * H, 2 * W), out.shape
    ref_q = _reference_quantized(mod, x, y)
    ref_r = _reference_raw(mod, x, y)
    assert jnp.allclose(out, ref_q, atol=2e-3, rtol=2e-3), \
        float(jnp.max(jnp.abs(out - ref_q)))
    assert jnp.allclose(out, ref_r, atol=5e-2, rtol=5e-2), \
        float(jnp.max(jnp.abs(out - ref_r)))

    # --- upsample=False path: both branches at the same resolution ---
    x2 = jax.random.normal(k_x2, (N, C_high, 16, 16), jnp.float32)
    y2 = jax.random.normal(k_y2, (N, C_low, 16, 16), jnp.float32)
    mod2 = CatPallas(C_high, C_low, C_out, upsample=False, key=k_p)
    out2 = jax.block_until_ready(mod2(x2, y2))
    assert out2.shape == (N, C_out, 16, 16), out2.shape
    ref2_q = _reference_quantized(mod2, x2, y2)
    assert jnp.allclose(out2, ref2_q, atol=2e-3, rtol=2e-3), \
        float(jnp.max(jnp.abs(out2 - ref2_q)))

    print("KERNEL_OK")
</pallas_src>

<mosaic_0001>
module attributes {stable_mosaic.version = 11 : i64} {
  func.func @_upsample_concat_conv_kernel(%arg0: i32, %arg1: i32, %arg2: memref<1x4x64xbf16, #tpu.memory_space<vmem>>, %arg3: memref<1x4x256xbf16, #tpu.memory_space<vmem>>, %arg4: memref<8x4xbf16, #tpu.memory_space<vmem>>, %arg5: memref<8x4xbf16, #tpu.memory_space<vmem>>, %arg6: memref<8x16xf32, #tpu.memory_space<vmem>>, %arg7: memref<8x1xf32, #tpu.memory_space<vmem>>, %arg8: memref<1x8x256xf32, #tpu.memory_space<vmem>>) attributes {dimension_semantics = [#tpu.dimension_semantics<parallel>, #tpu.dimension_semantics<parallel>], iteration_bounds = array<i64: 2, 1>, scalar_prefetch = 0 : i64, scratch_operands = 0 : i64, tpu.core_type = #tpu.core_type<tc>, window_params = [{transform_indices = @transform_0, window_bounds = array<i64: 1, 4, 64>}, {transform_indices = @transform_1, window_bounds = array<i64: 1, 4, 256>}, {pipeline_mode = #tpu.pipeline_mode<synchronous>, transform_indices = @transform_2, window_bounds = array<i64: 8, 4>}, {pipeline_mode = #tpu.pipeline_mode<synchronous>, transform_indices = @transform_3, window_bounds = array<i64: 8, 4>}, {pipeline_mode = #tpu.pipeline_mode<synchronous>, transform_indices = @transform_4, window_bounds = array<i64: 8, 16>}, {pipeline_mode = #tpu.pipeline_mode<synchronous>, transform_indices = @transform_5, window_bounds = array<i64: 8, 1>}, {transform_indices = @transform_6, window_bounds = array<i64: 1, 8, 256>}]} {
    %c0 = arith.constant 0 : index
    %c0_0 = arith.constant 0 : index
    %0 = vector.load %arg4[%c0, %c0_0] : memref<8x4xbf16, #tpu.memory_space<vmem>>, vector<8x4xbf16>
    %c0_1 = arith.constant 0 : index
    %c0_2 = arith.constant 0 : index
    %1 = vector.load %arg5[%c0_1, %c0_2] : memref<8x4xbf16, #tpu.memory_space<vmem>>, vector<8x4xbf16>
    %c0_3 = arith.constant 0 : index
    %c0_4 = arith.constant 0 : index
    %2 = vector.load %arg6[%c0_3, %c0_4] : memref<8x16xf32, #tpu.memory_space<vmem>>, vector<8x16xf32>
    %c0_5 = arith.constant 0 : index
    %c0_6 = arith.constant 0 : index
    %3 = vector.load %arg7[%c0_5, %c0_6] : memref<8x1xf32, #tpu.memory_space<vmem>>, vector<8x1xf32>
    %c0_7 = arith.constant 0 : index
    %c0_8 = arith.constant 0 : index
    %c0_9 = arith.constant 0 : index
    %4 = vector.load %arg2[%c0_7, %c0_8, %c0_9] : memref<1x4x64xbf16, #tpu.memory_space<vmem>>, vector<1x4x8xbf16>
    %5 = vector.shape_cast %4 : vector<1x4x8xbf16> to vector<4x8xbf16>
    %cst = arith.constant dense<0.000000e+00> : vector<8x8xf32>
    %6 = tpu.matmul %0, %5, %cst {dimension_numbers = #tpu.dot_dimension_numbers<[1], [0], [0], [1], [0, 0, 1, 1], [], []>} : vector<8x4xbf16>, vector<4x8xbf16>, vector<8x8xf32> -> vector<8x8xf32>
    %cst_10 = arith.constant dense<0.000000e+00> : vector<8x16xf32>
    %7 = tpu.matmul %6, %2, %cst_10 {dimension_numbers = #tpu.dot_dimension_numbers<[1], [0], [0], [1], [0, 0, 1, 1], [], []>} : vector<8x8xf32>, vector<8x16xf32>, vector<8x16xf32> -> vector<8x16xf32>
    %c0_11 = arith.constant 0 : index
    %c0_12 = arith.constant 0 : index
    %c0_13 = arith.constant 0 : index
    %8 = vector.load %arg3[%c0_11, %c0_12, %c0_13] : memref<1x4x256xbf16, #tpu.memory_space<vmem>>, vector<1x4x16xbf16>
    %9 = vector.shape_cast %8 : vector<1x4x16xbf16> to vector<4x16xbf16>
    %cst_14 = arith.constant dense<0.000000e+00> : vector<8x16xf32>
    %10 = tpu.matmul %1, %9, %cst_14 {dimension_numbers = #tpu.dot_dimension_numbers<[1], [0], [0], [1], [0, 0, 1, 1], [], []>} : vector<8x4xbf16>, vector<4x16xbf16>, vector<8x16xf32> -> vector<8x16xf32>
    %11 = arith.addf %7, %10 : vector<8x16xf32>
    %12 = vector.broadcast %3 : vector<8x1xf32> to vector<8x16xf32>
    %13 = arith.addf %11, %12 : vector<8x16xf32>
    %cst_15 = arith.constant 0.000000e+00 : f32
    %14 = vector.broadcast %cst_15 : f32 to vector<8x16xf32>
    %15 = arith.maximumf %13, %14 : vector<8x16xf32>
    %c0_16 = arith.constant 0 : index
    %c0_17 = arith.constant 0 : index
    %c0_18 = arith.constant 0 : index
    %16 = vector.load %arg8[%c0_16, %c0_17, %c0_18] : memref<1x8x256xf32, #tpu.memory_space<vmem>>, vector<1x8x16xf32>
    %17 = vector.shape_cast %16 : vector<1x8x16xf32> to vector<8x16xf32>
    %18 = vector.shape_cast %15 : vector<8x16xf32> to vector<1x8x16xf32>
    tpu.vector_store %arg8[%c0_16, %c0_17, %c0_18], %18 {strides = array<i32>} : memref<1x8x256xf32, #tpu.memory_space<vmem>>, vector<1x8x16xf32>,
    %c0_19 = arith.constant 0 : index
    %c0_20 = arith.constant 0 : index
    %c16 = arith.constant 16 : index
    %19 = vector.load %arg3[%c0_19, %c0_20, %c16] : memref<1x4x256xbf16, #tpu.memory_space<vmem>>, vector<1x4x16xbf16>
    %20 = vector.shape_cast %19 : vector<1x4x16xbf16> to vector<4x16xbf16>
    %cst_21 = arith.constant dense<0.000000e+00> : vector<8x16xf32>
    %21 = tpu.matmul %1, %20, %cst_21 {dimension_numbers = #tpu.dot_dimension_numbers<[1], [0], [0], [1], [0, 0, 1, 1], [], []>} : vector<8x4xbf16>, vector<4x16xbf16>, vector<8x16xf32> -> vector<8x16xf32>
    %22 = arith.addf %7, %21 : vector<8x16xf32>
    %23 = vector.broadcast %3 : vector<8x1xf32> to vector<8x16xf32>
    %24 = arith.addf %22, %23 : vector<8x16xf32>
    %cst_22 = arith.constant 0.000000e+00 : f32
    %25 = vector.broadcast %cst_22 : f32 to vector<8x16xf32>
    %26 = arith.maximumf %24, %25 : vector<8x16xf32>
    %c0_23 = arith.constant 0 : index
    %c0_24 = arith.constant 0 : index
    %c16_25 = arith.constant 16 : index
    %27 = vector.load %arg8[%c0_23, %c0_24, %c16_25] : memref<1x8x256xf32, #tpu.memory_space<vmem>>, vector<1x8x16xf32>
    %28 = vector.shape_cast %27 : vector<1x8x16xf32> to vector<8x16xf32>
    %29 = vector.shape_cast %26 : vector<8x16xf32> to vector<1x8x16xf32>
    tpu.vector_store %arg8[%c0_23, %c0_24, %c16_25], %29 {strides = array<i32>} : memref<1x8x256xf32, #tpu.memory_space<vmem>>, vector<1x8x16xf32>,
    %c0_26 = arith.constant 0 : index
    %c0_27 = arith.constant 0 : index
    %c8 = arith.constant 8 : index
    %30 = vector.load %arg2[%c0_26, %c0_27, %c8] : memref<1x4x64xbf16, #tpu.memory_space<vmem>>, vector<1x4x8xbf16>
    %31 = vector.shape_cast %30 : vector<1x4x8xbf16> to vector<4x8xbf16>
    %cst_28 = arith.constant dense<0.000000e+00> : vector<8x8xf32>
    %32 = tpu.matmul %0, %31, %cst_28 {dimension_numbers = #tpu.dot_dimension_numbers<[1], [0], [0], [1], [0, 0, 1, 1], [], []>} : vector<8x4xbf16>, vector<4x8xbf16>, vector<8x8xf32> -> vector<8x8xf32>
    %cst_29 = arith.constant dense<0.000000e+00> : vector<8x16xf32>
    %33 = tpu.matmul %32, %2, %cst_29 {dimension_numbers = #tpu.dot_dimension_numbers<[1], [0], [0], [1], [0, 0, 1, 1], [], []>} : vector<8x8xf32>, vector<8x16xf32>, vector<8x16xf32> -> vector<8x16xf32>
    %c0_30 = arith.constant 0 : index
    %c0_31 = arith.constant 0 : index
    %c32 = arith.constant 32 : index
    %34 = vector.load %arg3[%c0_30, %c0_31, %c32] : memref<1x4x256xbf16, #tpu.memory_space<vmem>>, vector<1x4x16xbf16>
    %35 = vector.shape_cast %34 : vector<1x4x16xbf16> to vector<4x16xbf16>
    %cst_32 = arith.constant dense<0.000000e+00> : vector<8x16xf32>
    %36 = tpu.matmul %1, %35, %cst_32 {dimension_numbers = #tpu.dot_dimension_numbers<[1], [0], [0], [1], [0, 0, 1, 1], [], []>} : vector<8x4xbf16>, vector<4x16xbf16>, vector<8x16xf32> -> vector<8x16xf32>
    %37 = arith.addf %33, %36 : vector<8x16xf32>
    %38 = vector.broadcast %3 : vector<8x1xf32> to vector<8x16xf32>
    %39 = arith.addf %37, %38 : vector<8x16xf32>
    %cst_33 = arith.constant 0.000000e+00 : f32
    %40 = vector.broadcast %cst_33 : f32 to vector<8x16xf32>
    %41 = arith.maximumf %39, %40 : vector<8x16xf32>
    %c0_34 = arith.constant 0 : index
    %c0_35 = arith.constant 0 : index
    %c32_36 = arith.constant 32 : index
    %42 = vector.load %arg8[%c0_34, %c0_35, %c32_36] : memref<1x8x256xf32, #tpu.memory_space<vmem>>, vector<1x8x16xf32>
    %43 = vector.shape_cast %42 : vector<1x8x16xf32> to vector<8x16xf32>
    %44 = vector.shape_cast %41 : vector<8x16xf32> to vector<1x8x16xf32>
    tpu.vector_store %arg8[%c0_34, %c0_35, %c32_36], %44 {strides = array<i32>} : memref<1x8x256xf32, #tpu.memory_space<vmem>>, vector<1x8x16xf32>,
    %c0_37 = arith.constant 0 : index
    %c0_38 = arith.constant 0 : index
    %c48 = arith.constant 48 : index
    %45 = vector.load %arg3[%c0_37, %c0_38, %c48] : memref<1x4x256xbf16, #tpu.memory_space<vmem>>, vector<1x4x16xbf16>
    %46 = vector.shape_cast %45 : vector<1x4x16xbf16> to vector<4x16xbf16>
    %cst_39 = arith.constant dense<0.000000e+00> : vector<8x16xf32>
    %47 = tpu.matmul %1, %46, %cst_39 {dimension_numbers = #tpu.dot_dimension_numbers<[1], [0], [0], [1], [0, 0, 1, 1], [], []>} : vector<8x4xbf16>, vector<4x16xbf16>, vector<8x16xf32> -> vector<8x16xf32>
    %48 = arith.addf %33, %47 : vector<8x16xf32>
    %49 = vector.broadcast %3 : vector<8x1xf32> to vector<8x16xf32>
    %50 = arith.addf %48, %49 : vector<8x16xf32>
    %cst_40 = arith.constant 0.000000e+00 : f32
    %51 = vector.broadcast %cst_40 : f32 to vector<8x16xf32>
    %52 = arith.maximumf %50, %51 : vector<8x16xf32>
    %c0_41 = arith.constant 0 : index
    %c0_42 = arith.constant 0 : index
    %c48_43 = arith.constant 48 : index
    %53 = vector.load %arg8[%c0_41, %c0_42, %c48_43] : memref<1x8x256xf32, #tpu.memory_space<vmem>>, vector<1x8x16xf32>
    %54 = vector.shape_cast %53 : vector<1x8x16xf32> to vector<8x16xf32>
    %55 = vector.shape_cast %52 : vector<8x16xf32> to vector<1x8x16xf32>
    tpu.vector_store %arg8[%c0_41, %c0_42, %c48_43], %55 {strides = array<i32>} : memref<1x8x256xf32, #tpu.memory_space<vmem>>, vector<1x8x16xf32>,
    %c0_44 = arith.constant 0 : index
    %c0_45 = arith.constant 0 : index
    %c16_46 = arith.constant 16 : index
    %56 = vector.load %arg2[%c0_44, %c0_45, %c16_46] : memref<1x4x64xbf16, #tpu.memory_space<vmem>>, vector<1x4x8xbf16>
    %57 = vector.shape_cast %56 : vector<1x4x8xbf16> to vector<4x8xbf16>
    %cst_47 = arith.constant dense<0.000000e+00> : vector<8x8xf32>
    %58 = tpu.matmul %0, %57, %cst_47 {dimension_numbers = #tpu.dot_dimension_numbers<[1], [0], [0], [1], [0, 0, 1, 1], [], []>} : vector<8x4xbf16>, vector<4x8xbf16>, vector<8x8xf32> -> vector<8x8xf32>
    %cst_48 = arith.constant dense<0.000000e+00> : vector<8x16xf32>
    %59 = tpu.matmul %58, %2, %cst_48 {dimension_numbers = #tpu.dot_dimension_numbers<[1], [0], [0], [1], [0, 0, 1, 1], [], []>} : vector<8x8xf32>, vector<8x16xf32>, vector<8x16xf32> -> vector<8x16xf32>
    %c0_49 = arith.constant 0 : index
    %c0_50 = arith.constant 0 : index
    %c64 = arith.constant 64 : index
    %60 = vector.load %arg3[%c0_49, %c0_50, %c64] : memref<1x4x256xbf16, #tpu.memory_space<vmem>>, vector<1x4x16xbf16>
    %61 = vector.shape_cast %60 : vector<1x4x16xbf16> to vector<4x16xbf16>
    %cst_51 = arith.constant dense<0.000000e+00> : vector<8x16xf32>
    %62 = tpu.matmul %1, %61, %cst_51 {dimension_numbers = #tpu.dot_dimension_numbers<[1], [0], [0], [1], [0, 0, 1, 1], [], []>} : vector<8x4xbf16>, vector<4x16xbf16>, vector<8x16xf32> -> vector<8x16xf32>
    %63 = arith.addf %59, %62 : vector<8x16xf32>
    %64 = vector.broadcast %3 : vector<8x1xf32> to vector<8x16xf32>
    %65 = arith.addf %63, %64 : vector<8x16xf32>
    %cst_52 = arith.constant 0.000000e+00 : f32
    %66 = vector.broadcast %cst_52 : f32 to vector<8x16xf32>
    %67 = arith.maximumf %65, %66 : vector<8x16xf32>
    %c0_53 = arith.constant 0 : index
    %c0_54 = arith.constant 0 : index
    %c64_55 = arith.constant 64 : index
    %68 = vector.load %arg8[%c0_53, %c0_54, %c64_55] : memref<1x8x256xf32, #tpu.memory_space<vmem>>, vector<1x8x16xf32>
    %69 = vector.shape_cast %68 : vector<1x8x16xf32> to vector<8x16xf32>
    %70 = vector.shape_cast %67 : vector<8x16xf32> to vector<1x8x16xf32>
    tpu.vector_store %arg8[%c0_53, %c0_54, %c64_55], %70 {strides = array<i32>} : memref<1x8x256xf32, #tpu.memory_space<vmem>>, vector<1x8x16xf32>,
    %c0_56 = arith.constant 0 : index
    %c0_57 = arith.constant 0 : index
    %c80 = arith.constant 80 : index
    %71 = vector.load %arg3[%c0_56, %c0_57, %c80] : memref<1x4x256xbf16, #tpu.memory_space<vmem>>, vector<1x4x16xbf16>
    %72 = vector.shape_cast %71 : vector<1x4x16xbf16> to vector<4x16xbf16>
    %cst_58 = arith.constant dense<0.000000e+00> : vector<8x16xf32>
    %73 = tpu.matmul %1, %72, %cst_58 {dimension_numbers = #tpu.dot_dimension_numbers<[1], [0], [0], [1], [0, 0, 1, 1], [], []>} : vector<8x4xbf16>, vector<4x16xbf16>, vector<8x16xf32> -> vector<8x16xf32>
    %74 = arith.addf %59, %73 : vector<8x16xf32>
    %75 = vector.broadcast %3 : vector<8x1xf32> to vector<8x16xf32>
    %76 = arith.addf %74, %75 : vector<8x16xf32>
    %cst_59 = arith.constant 0.000000e+00 : f32
    %77 = vector.broadcast %cst_59 : f32 to vector<8x16xf32>
    %78 = arith.maximumf %76, %77 : vector<8x16xf32>
    %c0_60 = arith.constant 0 : index
    %c0_61 = arith.constant 0 : index
    %c80_62 = arith.constant 80 : index
    %79 = vector.load %arg8[%c0_60, %c0_61, %c80_62] : memref<1x8x256xf32, #tpu.memory_space<vmem>>, vector<1x8x16xf32>
    %80 = vector.shape_cast %79 : vector<1x8x16xf32> to vector<8x16xf32>
    %81 = vector.shape_cast %78 : vector<8x16xf32> to vector<1x8x16xf32>
    tpu.vector_store %arg8[%c0_60, %c0_61, %c80_62], %81 {strides = array<i32>} : memref<1x8x256xf32, #tpu.memory_space<vmem>>, vector<1x8x16xf32>,
    %c0_63 = arith.constant 0 : index
    %c0_64 = arith.constant 0 : index
    %c24 = arith.constant 24 : index
    %82 = vector.load %arg2[%c0_63, %c0_64, %c24] : memref<1x4x64xbf16, #tpu.memory_space<vmem>>, vector<1x4x8xbf16>
    %83 = vector.shape_cast %82 : vector<1x4x8xbf16> to vector<4x8xbf16>
    %cst_65 = arith.constant dense<0.000000e+00> : vector<8x8xf32>
    %84 = tpu.matmul %0, %83, %cst_65 {dimension_numbers = #tpu.dot_dimension_numbers<[1], [0], [0], [1], [0, 0, 1, 1], [], []>} : vector<8x4xbf16>, vector<4x8xbf16>, vector<8x8xf32> -> vector<8x8xf32>
    %cst_66 = arith.constant dense<0.000000e+00> : vector<8x16xf32>
    %85 = tpu.matmul %84, %2, %cst_66 {dimension_numbers = #tpu.dot_dimension_numbers<[1], [0], [0], [1], [0, 0, 1, 1], [], []>} : vector<8x8xf32>, vector<8x16xf32>, vector<8x16xf32> -> vector<8x16xf32>
    %c0_67 = arith.constant 0 : index
    %c0_68 = arith.constant 0 : index
    %c96 = arith.constant 96 : index
    %86 = vector.load %arg3[%c0_67, %c0_68, %c96] : memref<1x4x256xbf16, #tpu.memory_space<vmem>>, vector<1x4x16xbf16>
    %87 = vector.shape_cast %86 : vector<1x4x16xbf16> to vector<4x16xbf16>
    %cst_69 = arith.constant dense<0.000000e+00> : vector<8x16xf32>
    %88 = tpu.matmul %1, %87, %cst_69 {dimension_numbers = #tpu.dot_dimension_numbers<[1], [0], [0], [1], [0, 0, 1, 1], [], []>} : vector<8x4xbf16>, vector<4x16xbf16>, vector<8x16xf32> -> vector<8x16xf32>
    %89 = arith.addf %85, %88 : vector<8x16xf32>
    %90 = vector.broadcast %3 : vector<8x1xf32> to vector<8x16xf32>
    %91 = arith.addf %89, %90 : vector<8x16xf32>
    %cst_70 = arith.constant 0.000000e+00 : f32
    %92 = vector.broadcast %cst_70 : f32 to vector<8x16xf32>
    %93 = arith.maximumf %91, %92 : vector<8x16xf32>
    %c0_71 = arith.constant 0 : index
    %c0_72 = arith.constant 0 : index
    %c96_73 = arith.constant 96 : index
    %94 = vector.load %arg8[%c0_71, %c0_72, %c96_73] : memref<1x8x256xf32, #tpu.memory_space<vmem>>, vector<1x8x16xf32>
    %95 = vector.shape_cast %94 : vector<1x8x16xf32> to vector<8x16xf32>
    %96 = vector.shape_cast %93 : vector<8x16xf32> to vector<1x8x16xf32>
    tpu.vector_store %arg8[%c0_71, %c0_72, %c96_73], %96 {strides = array<i32>} : memref<1x8x256xf32, #tpu.memory_space<vmem>>, vector<1x8x16xf32>,
    %c0_74 = arith.constant 0 : index
    %c0_75 = arith.constant 0 : index
    %c112 = arith.constant 112 : index
    %97 = vector.load %arg3[%c0_74, %c0_75, %c112] : memref<1x4x256xbf16, #tpu.memory_space<vmem>>, vector<1x4x16xbf16>
    %98 = vector.shape_cast %97 : vector<1x4x16xbf16> to vector<4x16xbf16>
    %cst_76 = arith.constant dense<0.000000e+00> : vector<8x16xf32>
    %99 = tpu.matmul %1, %98, %cst_76 {dimension_numbers = #tpu.dot_dimension_numbers<[1], [0], [0], [1], [0, 0, 1, 1], [], []>} : vector<8x4xbf16>, vector<4x16xbf16>, vector<8x16xf32> -> vector<8x16xf32>
    %100 = arith.addf %85, %99 : vector<8x16xf32>
    %101 = vector.broadcast %3 : vector<8x1xf32> to vector<8x16xf32>
    %102 = arith.addf %100, %101 : vector<8x16xf32>
    %cst_77 = arith.constant 0.000000e+00 : f32
    %103 = vector.broadcast %cst_77 : f32 to vector<8x16xf32>
    %104 = arith.maximumf %102, %103 : vector<8x16xf32>
    %c0_78 = arith.constant 0 : index
    %c0_79 = arith.constant 0 : index
    %c112_80 = arith.constant 112 : index
    %105 = vector.load %arg8[%c0_78, %c0_79, %c112_80] : memref<1x8x256xf32, #tpu.memory_space<vmem>>, vector<1x8x16xf32>
    %106 = vector.shape_cast %105 : vector<1x8x16xf32> to vector<8x16xf32>
    %107 = vector.shape_cast %104 : vector<8x16xf32> to vector<1x8x16xf32>
    tpu.vector_store %arg8[%c0_78, %c0_79, %c112_80], %107 {strides = array<i32>} : memref<1x8x256xf32, #tpu.memory_space<vmem>>, vector<1x8x16xf32>,
    %c0_81 = arith.constant 0 : index
    %c0_82 = arith.constant 0 : index
    %c32_83 = arith.constant 32 : index
    %108 = vector.load %arg2[%c0_81, %c0_82, %c32_83] : memref<1x4x64xbf16, #tpu.memory_space<vmem>>, vector<1x4x8xbf16>
    %109 = vector.shape_cast %108 : vector<1x4x8xbf16> to vector<4x8xbf16>
    %cst_84 = arith.constant dense<0.000000e+00> : vector<8x8xf32>
    %110 = tpu.matmul %0, %109, %cst_84 {dimension_numbers = #tpu.dot_dimension_numbers<[1], [0], [0], [1], [0, 0, 1, 1], [], []>} : vector<8x4xbf16>, vector<4x8xbf16>, vector<8x8xf32> -> vector<8x8xf32>
    %cst_85 = arith.constant dense<0.000000e+00> : vector<8x16xf32>
    %111 = tpu.matmul %110, %2, %cst_85 {dimension_numbers = #tpu.dot_dimension_numbers<[1], [0], [0], [1], [0, 0, 1, 1], [], []>} : vector<8x8xf32>, vector<8x16xf32>, vector<8x16xf32> -> vector<8x16xf32>
    %c0_86 = arith.constant 0 : index
    %c0_87 = arith.constant 0 : index
    %c128 = arith.constant 128 : index
    %112 = vector.load %arg3[%c0_86, %c0_87, %c128] : memref<1x4x256xbf16, #tpu.memory_space<vmem>>, vector<1x4x16xbf16>
    %113 = vector.shape_cast %112 : vector<1x4x16xbf16> to vector<4x16xbf16>
    %cst_88 = arith.constant dense<0.000000e+00> : vector<8x16xf32>
    %114 = tpu.matmul %1, %113, %cst_88 {dimension_numbers = #tpu.dot_dimension_numbers<[1], [0], [0], [1], [0, 0, 1, 1], [], []>} : vector<8x4xbf16>, vector<4x16xbf16>, vector<8x16xf32> -> vector<8x16xf32>
    %115 = arith.addf %111, %114 : vector<8x16xf32>
    %116 = vector.broadcast %3 : vector<8x1xf32> to vector<8x16xf32>
    %117 = arith.addf %115, %116 : vector<8x16xf32>
    %cst_89 = arith.constant 0.000000e+00 : f32
    %118 = vector.broadcast %cst_89 : f32 to vector<8x16xf32>
    %119 = arith.maximumf %117, %118 : vector<8x16xf32>
    %c0_90 = arith.constant 0 : index
    %c0_91 = arith.constant 0 : index
    %c128_92 = arith.constant 128 : index
    %120 = vector.load %arg8[%c0_90, %c0_91, %c128_92] : memref<1x8x256xf32, #tpu.memory_space<vmem>>, vector<1x8x16xf32>
    %121 = vector.shape_cast %120 : vector<1x8x16xf32> to vector<8x16xf32>
    %122 = vector.shape_cast %119 : vector<8x16xf32> to vector<1x8x16xf32>
    tpu.vector_store %arg8[%c0_90, %c0_91, %c128_92], %122 {strides = array<i32>} : memref<1x8x256xf32, #tpu.memory_space<vmem>>, vector<1x8x16xf32>,
    %c0_93 = arith.constant 0 : index
    %c0_94 = arith.constant 0 : index
    %c144 = arith.constant 144 : index
    %123 = vector.load %arg3[%c0_93, %c0_94, %c144] : memref<1x4x256xbf16, #tpu.memory_space<vmem>>, vector<1x4x16xbf16>
    %124 = vector.shape_cast %123 : vector<1x4x16xbf16> to vector<4x16xbf16>
    %cst_95 = arith.constant dense<0.000000e+00> : vector<8x16xf32>
    %125 = tpu.matmul %1, %124, %cst_95 {dimension_numbers = #tpu.dot_dimension_numbers<[1], [0], [0], [1], [0, 0, 1, 1], [], []>} : vector<8x4xbf16>, vector<4x16xbf16>, vector<8x16xf32> -> vector<8x16xf32>
    %126 = arith.addf %111, %125 : vector<8x16xf32>
    %127 = vector.broadcast %3 : vector<8x1xf32> to vector<8x16xf32>
    %128 = arith.addf %126, %127 : vector<8x16xf32>
    %cst_96 = arith.constant 0.000000e+00 : f32
    %129 = vector.broadcast %cst_96 : f32 to vector<8x16xf32>
    %130 = arith.maximumf %128, %129 : vector<8x16xf32>
    %c0_97 = arith.constant 0 : index
    %c0_98 = arith.constant 0 : index
    %c144_99 = arith.constant 144 : index
    %131 = vector.load %arg8[%c0_97, %c0_98, %c144_99] : memref<1x8x256xf32, #tpu.memory_space<vmem>>, vector<1x8x16xf32>
    %132 = vector.shape_cast %131 : vector<1x8x16xf32> to vector<8x16xf32>
    %133 = vector.shape_cast %130 : vector<8x16xf32> to vector<1x8x16xf32>
    tpu.vector_store %arg8[%c0_97, %c0_98, %c144_99], %133 {strides = array<i32>} : memref<1x8x256xf32, #tpu.memory_space<vmem>>, vector<1x8x16xf32>,
    %c0_100 = arith.constant 0 : index
    %c0_101 = arith.constant 0 : index
    %c40 = arith.constant 40 : index
    %134 = vector.load %arg2[%c0_100, %c0_101, %c40] : memref<1x4x64xbf16, #tpu.memory_space<vmem>>, vector<1x4x8xbf16>
    %135 = vector.shape_cast %134 : vector<1x4x8xbf16> to vector<4x8xbf16>
    %cst_102 = arith.constant dense<0.000000e+00> : vector<8x8xf32>
    %136 = tpu.matmul %0, %135, %cst_102 {dimension_numbers = #tpu.dot_dimension_numbers<[1], [0], [0], [1], [0, 0, 1, 1], [], []>} : vector<8x4xbf16>, vector<4x8xbf16>, vector<8x8xf32> -> vector<8x8xf32>
    %cst_103 = arith.constant dense<0.000000e+00> : vector<8x16xf32>
    %137 = tpu.matmul %136, %2, %cst_103 {dimension_numbers = #tpu.dot_dimension_numbers<[1], [0], [0], [1], [0, 0, 1, 1], [], []>} : vector<8x8xf32>, vector<8x16xf32>, vector<8x16xf32> -> vector<8x16xf32>
    %c0_104 = arith.constant 0 : index
    %c0_105 = arith.constant 0 : index
    %c160 = arith.constant 160 : index
    %138 = vector.load %arg3[%c0_104, %c0_105, %c160] : memref<1x4x256xbf16, #tpu.memory_space<vmem>>, vector<1x4x16xbf16>
    %139 = vector.shape_cast %138 : vector<1x4x16xbf16> to vector<4x16xbf16>
    %cst_106 = arith.constant dense<0.000000e+00> : vector<8x16xf32>
    %140 = tpu.matmul %1, %139, %cst_106 {dimension_numbers = #tpu.dot_dimension_numbers<[1], [0], [0], [1], [0, 0, 1, 1], [], []>} : vector<8x4xbf16>, vector<4x16xbf16>, vector<8x16xf32> -> vector<8x16xf32>
    %141 = arith.addf %137, %140 : vector<8x16xf32>
    %142 = vector.broadcast %3 : vector<8x1xf32> to vector<8x16xf32>
    %143 = arith.addf %141, %142 : vector<8x16xf32>
    %cst_107 = arith.constant 0.000000e+00 : f32
    %144 = vector.broadcast %cst_107 : f32 to vector<8x16xf32>
    %145 = arith.maximumf %143, %144 : vector<8x16xf32>
    %c0_108 = arith.constant 0 : index
    %c0_109 = arith.constant 0 : index
    %c160_110 = arith.constant 160 : index
    %146 = vector.load %arg8[%c0_108, %c0_109, %c160_110] : memref<1x8x256xf32, #tpu.memory_space<vmem>>, vector<1x8x16xf32>
    %147 = vector.shape_cast %146 : vector<1x8x16xf32> to vector<8x16xf32>
    %148 = vector.shape_cast %145 : vector<8x16xf32> to vector<1x8x16xf32>
    tpu.vector_store %arg8[%c0_108, %c0_109, %c160_110], %148 {strides = array<i32>} : memref<1x8x256xf32, #tpu.memory_space<vmem>>, vector<1x8x16xf32>,
    %c0_111 = arith.constant 0 : index
    %c0_112 = arith.constant 0 : index
    %c176 = arith.constant 176 : index
    %149 = vector.load %arg3[%c0_111, %c0_112, %c176] : memref<1x4x256xbf16, #tpu.memory_space<vmem>>, vector<1x4x16xbf16>
    %150 = vector.shape_cast %149 : vector<1x4x16xbf16> to vector<4x16xbf16>
    %cst_113 = arith.constant dense<0.000000e+00> : vector<8x16xf32>
    %151 = tpu.matmul %1, %150, %cst_113 {dimension_numbers = #tpu.dot_dimension_numbers<[1], [0], [0], [1], [0, 0, 1, 1], [], []>} : vector<8x4xbf16>, vector<4x16xbf16>, vector<8x16xf32> -> vector<8x16xf32>
    %152 = arith.addf %137, %151 : vector<8x16xf32>
    %153 = vector.broadcast %3 : vector<8x1xf32> to vector<8x16xf32>
    %154 = arith.addf %152, %153 : vector<8x16xf32>
    %cst_114 = arith.constant 0.000000e+00 : f32
    %155 = vector.broadcast %cst_114 : f32 to vector<8x16xf32>
    %156 = arith.maximumf %154, %155 : vector<8x16xf32>
    %c0_115 = arith.constant 0 : index
    %c0_116 = arith.constant 0 : index
    %c176_117 = arith.constant 176 : index
    %157 = vector.load %arg8[%c0_115, %c0_116, %c176_117] : memref<1x8x256xf32, #tpu.memory_space<vmem>>, vector<1x8x16xf32>
    %158 = vector.shape_cast %157 : vector<1x8x16xf32> to vector<8x16xf32>
    %159 = vector.shape_cast %156 : vector<8x16xf32> to vector<1x8x16xf32>
    tpu.vector_store %arg8[%c0_115, %c0_116, %c176_117], %159 {strides = array<i32>} : memref<1x8x256xf32, #tpu.memory_space<vmem>>, vector<1x8x16xf32>,
    %c0_118 = arith.constant 0 : index
    %c0_119 = arith.constant 0 : index
    %c48_120 = arith.constant 48 : index
    %160 = vector.load %arg2[%c0_118, %c0_119, %c48_120] : memref<1x4x64xbf16, #tpu.memory_space<vmem>>, vector<1x4x8xbf16>
    %161 = vector.shape_cast %160 : vector<1x4x8xbf16> to vector<4x8xbf16>
    %cst_121 = arith.constant dense<0.000000e+00> : vector<8x8xf32>
    %162 = tpu.matmul %0, %161, %cst_121 {dimension_numbers = #tpu.dot_dimension_numbers<[1], [0], [0], [1], [0, 0, 1, 1], [], []>} : vector<8x4xbf16>, vector<4x8xbf16>, vector<8x8xf32> -> vector<8x8xf32>
    %cst_122 = arith.constant dense<0.000000e+00> : vector<8x16xf32>
    %163 = tpu.matmul %162, %2, %cst_122 {dimension_numbers = #tpu.dot_dimension_numbers<[1], [0], [0], [1], [0, 0, 1, 1], [], []>} : vector<8x8xf32>, vector<8x16xf32>, vector<8x16xf32> -> vector<8x16xf32>
    %c0_123 = arith.constant 0 : index
    %c0_124 = arith.constant 0 : index
    %c192 = arith.constant 192 : index
    %164 = vector.load %arg3[%c0_123, %c0_124, %c192] : memref<1x4x256xbf16, #tpu.memory_space<vmem>>, vector<1x4x16xbf16>
    %165 = vector.shape_cast %164 : vector<1x4x16xbf16> to vector<4x16xbf16>
    %cst_125 = arith.constant dense<0.000000e+00> : vector<8x16xf32>
    %166 = tpu.matmul %1, %165, %cst_125 {dimension_numbers = #tpu.dot_dimension_numbers<[1], [0], [0], [1], [0, 0, 1, 1], [], []>} : vector<8x4xbf16>, vector<4x16xbf16>, vector<8x16xf32> -> vector<8x16xf32>
    %167 = arith.addf %163, %166 : vector<8x16xf32>
    %168 = vector.broadcast %3 : vector<8x1xf32> to vector<8x16xf32>
    %169 = arith.addf %167, %168 : vector<8x16xf32>
    %cst_126 = arith.constant 0.000000e+00 : f32
    %170 = vector.broadcast %cst_126 : f32 to vector<8x16xf32>
    %171 = arith.maximumf %169, %170 : vector<8x16xf32>
    %c0_127 = arith.constant 0 : index
    %c0_128 = arith.constant 0 : index
    %c192_129 = arith.constant 192 : index
    %172 = vector.load %arg8[%c0_127, %c0_128, %c192_129] : memref<1x8x256xf32, #tpu.memory_space<vmem>>, vector<1x8x16xf32>
    %173 = vector.shape_cast %172 : vector<1x8x16xf32> to vector<8x16xf32>
    %174 = vector.shape_cast %171 : vector<8x16xf32> to vector<1x8x16xf32>
    tpu.vector_store %arg8[%c0_127, %c0_128, %c192_129], %174 {strides = array<i32>} : memref<1x8x256xf32, #tpu.memory_space<vmem>>, vector<1x8x16xf32>,
    %c0_130 = arith.constant 0 : index
    %c0_131 = arith.constant 0 : index
    %c208 = arith.constant 208 : index
    %175 = vector.load %arg3[%c0_130, %c0_131, %c208] : memref<1x4x256xbf16, #tpu.memory_space<vmem>>, vector<1x4x16xbf16>
    %176 = vector.shape_cast %175 : vector<1x4x16xbf16> to vector<4x16xbf16>
    %cst_132 = arith.constant dense<0.000000e+00> : vector<8x16xf32>
    %177 = tpu.matmul %1, %176, %cst_132 {dimension_numbers = #tpu.dot_dimension_numbers<[1], [0], [0], [1], [0, 0, 1, 1], [], []>} : vector<8x4xbf16>, vector<4x16xbf16>, vector<8x16xf32> -> vector<8x16xf32>
    %178 = arith.addf %163, %177 : vector<8x16xf32>
    %179 = vector.broadcast %3 : vector<8x1xf32> to vector<8x16xf32>
    %180 = arith.addf %178, %179 : vector<8x16xf32>
    %cst_133 = arith.constant 0.000000e+00 : f32
    %181 = vector.broadcast %cst_133 : f32 to vector<8x16xf32>
    %182 = arith.maximumf %180, %181 : vector<8x16xf32>
    %c0_134 = arith.constant 0 : index
    %c0_135 = arith.constant 0 : index
    %c208_136 = arith.constant 208 : index
    %183 = vector.load %arg8[%c0_134, %c0_135, %c208_136] : memref<1x8x256xf32, #tpu.memory_space<vmem>>, vector<1x8x16xf32>
    %184 = vector.shape_cast %183 : vector<1x8x16xf32> to vector<8x16xf32>
    %185 = vector.shape_cast %182 : vector<8x16xf32> to vector<1x8x16xf32>
    tpu.vector_store %arg8[%c0_134, %c0_135, %c208_136], %185 {strides = array<i32>} : memref<1x8x256xf32, #tpu.memory_space<vmem>>, vector<1x8x16xf32>,
    %c0_137 = arith.constant 0 : index
    %c0_138 = arith.constant 0 : index
    %c56 = arith.constant 56 : index
    %186 = vector.load %arg2[%c0_137, %c0_138, %c56] : memref<1x4x64xbf16, #tpu.memory_space<vmem>>, vector<1x4x8xbf16>
    %187 = vector.shape_cast %186 : vector<1x4x8xbf16> to vector<4x8xbf16>
    %cst_139 = arith.constant dense<0.000000e+00> : vector<8x8xf32>
    %188 = tpu.matmul %0, %187, %cst_139 {dimension_numbers = #tpu.dot_dimension_numbers<[1], [0], [0], [1], [0, 0, 1, 1], [], []>} : vector<8x4xbf16>, vector<4x8xbf16>, vector<8x8xf32> -> vector<8x8xf32>
    %cst_140 = arith.constant dense<0.000000e+00> : vector<8x16xf32>
    %189 = tpu.matmul %188, %2, %cst_140 {dimension_numbers = #tpu.dot_dimension_numbers<[1], [0], [0], [1], [0, 0, 1, 1], [], []>} : vector<8x8xf32>, vector<8x16xf32>, vector<8x16xf32> -> vector<8x16xf32>
    %c0_141 = arith.constant 0 : index
    %c0_142 = arith.constant 0 : index
    %c224 = arith.constant 224 : index
    %190 = vector.load %arg3[%c0_141, %c0_142, %c224] : memref<1x4x256xbf16, #tpu.memory_space<vmem>>, vector<1x4x16xbf16>
    %191 = vector.shape_cast %190 : vector<1x4x16xbf16> to vector<4x16xbf16>
    %cst_143 = arith.constant dense<0.000000e+00> : vector<8x16xf32>
    %192 = tpu.matmul %1, %191, %cst_143 {dimension_numbers = #tpu.dot_dimension_numbers<[1], [0], [0], [1], [0, 0, 1, 1], [], []>} : vector<8x4xbf16>, vector<4x16xbf16>, vector<8x16xf32> -> vector<8x16xf32>
    %193 = arith.addf %189, %192 : vector<8x16xf32>
    %194 = vector.broadcast %3 : vector<8x1xf32> to vector<8x16xf32>
    %195 = arith.addf %193, %194 : vector<8x16xf32>
    %cst_144 = arith.constant 0.000000e+00 : f32
    %196 = vector.broadcast %cst_144 : f32 to vector<8x16xf32>
    %197 = arith.maximumf %195, %196 : vector<8x16xf32>
    %c0_145 = arith.constant 0 : index
    %c0_146 = arith.constant 0 : index
    %c224_147 = arith.constant 224 : index
    %198 = vector.load %arg8[%c0_145, %c0_146, %c224_147] : memref<1x8x256xf32, #tpu.memory_space<vmem>>, vector<1x8x16xf32>
    %199 = vector.shape_cast %198 : vector<1x8x16xf32> to vector<8x16xf32>
    %200 = vector.shape_cast %197 : vector<8x16xf32> to vector<1x8x16xf32>
    tpu.vector_store %arg8[%c0_145, %c0_146, %c224_147], %200 {strides = array<i32>} : memref<1x8x256xf32, #tpu.memory_space<vmem>>, vector<1x8x16xf32>,
    %c0_148 = arith.constant 0 : index
    %c0_149 = arith.constant 0 : index
    %c240 = arith.constant 240 : index
    %201 = vector.load %arg3[%c0_148, %c0_149, %c240] : memref<1x4x256xbf16, #tpu.memory_space<vmem>>, vector<1x4x16xbf16>
    %202 = vector.shape_cast %201 : vector<1x4x16xbf16> to vector<4x16xbf16>
    %cst_150 = arith.constant dense<0.000000e+00> : vector<8x16xf32>
    %203 = tpu.matmul %1, %202, %cst_150 {dimension_numbers = #tpu.dot_dimension_numbers<[1], [0], [0], [1], [0, 0, 1, 1], [], []>} : vector<8x4xbf16>, vector<4x16xbf16>, vector<8x16xf32> -> vector<8x16xf32>
    %204 = arith.addf %189, %203 : vector<8x16xf32>
    %205 = vector.broadcast %3 : vector<8x1xf32> to vector<8x16xf32>
    %206 = arith.addf %204, %205 : vector<8x16xf32>
    %cst_151 = arith.constant 0.000000e+00 : f32
    %207 = vector.broadcast %cst_151 : f32 to vector<8x16xf32>
    %208 = arith.maximumf %206, %207 : vector<8x16xf32>
    %c0_152 = arith.constant 0 : index
    %c0_153 = arith.constant 0 : index
    %c240_154 = arith.constant 240 : index
    %209 = vector.load %arg8[%c0_152, %c0_153, %c240_154] : memref<1x8x256xf32, #tpu.memory_space<vmem>>, vector<1x8x16xf32>
    %210 = vector.shape_cast %209 : vector<1x8x16xf32> to vector<8x16xf32>
    %211 = vector.shape_cast %208 : vector<8x16xf32> to vector<1x8x16xf32>
    tpu.vector_store %arg8[%c0_152, %c0_153, %c240_154], %211 {strides = array<i32>} : memref<1x8x256xf32, #tpu.memory_space<vmem>>, vector<1x8x16xf32>,
    return
  }
  func.func @transform_0(%arg0: i32, %arg1: i32) -> (i32, i32, i32) {
    %c0_i32 = arith.constant 0 : i32
    %c0_i32_0 = arith.constant 0 : i32
    return %arg0, %c0_i32, %arg1 : i32, i32, i32
  }
  func.func @transform_1(%arg0: i32, %arg1: i32) -> (i32, i32, i32) {
    %c0_i32 = arith.constant 0 : i32
    %c0_i32_0 = arith.constant 0 : i32
    return %arg0, %c0_i32, %arg1 : i32, i32, i32
  }
  func.func @transform_2(%arg0: i32, %arg1: i32) -> (i32, i32) {
    %c0_i32 = arith.constant 0 : i32
    %c0_i32_0 = arith.constant 0 : i32
    %c0_i32_1 = arith.constant 0 : i32
    return %c0_i32, %c0_i32_0 : i32, i32
  }
  func.func @transform_3(%arg0: i32, %arg1: i32) -> (i32, i32) {
    %c0_i32 = arith.constant 0 : i32
    %c0_i32_0 = arith.constant 0 : i32
    %c0_i32_1 = arith.constant 0 : i32
    return %c0_i32, %c0_i32_0 : i32, i32
  }
  func.func @transform_4(%arg0: i32, %arg1: i32) -> (i32, i32) {
    %c0_i32 = arith.constant 0 : i32
    %c0_i32_0 = arith.constant 0 : i32
    %c0_i32_1 = arith.constant 0 : i32
    return %c0_i32, %c0_i32_0 : i32, i32
  }
  func.func @transform_5(%arg0: i32, %arg1: i32) -> (i32, i32) {
    %c0_i32 = arith.constant 0 : i32
    %c0_i32_0 = arith.constant 0 : i32
    %c0_i32_1 = arith.constant 0 : i32
    return %c0_i32, %c0_i32_0 : i32, i32
  }
  func.func @transform_6(%arg0: i32, %arg1: i32) -> (i32, i32, i32) {
    %c0_i32 = arith.constant 0 : i32
    %c0_i32_0 = arith.constant 0 : i32
    return %arg0, %c0_i32, %arg1 : i32, i32, i32
  }
}

module attributes {stable_mosaic.version = 11 : i64} {
  func.func @_upsample_concat_conv_kernel(%arg0: i32, %arg1: i32, %arg2: memref<1x4x64xbf16, #tpu.memory_space<vmem>>, %arg3: memref<1x4x256xbf16, #tpu.memory_space<vmem>>, %arg4: memref<8x4xbf16, #tpu.memory_space<vmem>>, %arg5: memref<8x4xbf16, #tpu.memory_space<vmem>>, %arg6: memref<8x16xf32, #tpu.memory_space<vmem>>, %arg7: memref<8x1xf32, #tpu.memory_space<vmem>>, %arg8: memref<1x8x256xf32, #tpu.memory_space<vmem>>) attributes {dimension_semantics = [#tpu.dimension_semantics<parallel>, #tpu.dimension_semantics<parallel>], iteration_bounds = array<i64: 2, 1>, scalar_prefetch = 0 : i64, scratch_operands = 0 : i64, tpu.core_type = #tpu.core_type<tc>, window_params = [{transform_indices = @transform_0, window_bounds = array<i64: 1, 4, 64>}, {transform_indices = @transform_1, window_bounds = array<i64: 1, 4, 256>}, {pipeline_mode = #tpu.pipeline_mode<synchronous>, transform_indices = @transform_2, window_bounds = array<i64: 8, 4>}, {pipeline_mode = #tpu.pipeline_mode<synchronous>, transform_indices = @transform_3, window_bounds = array<i64: 8, 4>}, {pipeline_mode = #tpu.pipeline_mode<synchronous>, transform_indices = @transform_4, window_bounds = array<i64: 8, 16>}, {pipeline_mode = #tpu.pipeline_mode<synchronous>, transform_indices = @transform_5, window_bounds = array<i64: 8, 1>}, {transform_indices = @transform_6, window_bounds = array<i64: 1, 8, 256>}]} {
    %c0 = arith.constant 0 : index
    %c0_0 = arith.constant 0 : index
    %0 = vector.load %arg4[%c0, %c0_0] : memref<8x4xbf16, #tpu.memory_space<vmem>>, vector<8x4xbf16>
    %c0_1 = arith.constant 0 : index
    %c0_2 = arith.constant 0 : index
    %1 = vector.load %arg5[%c0_1, %c0_2] : memref<8x4xbf16, #tpu.memory_space<vmem>>, vector<8x4xbf16>
    %c0_3 = arith.constant 0 : index
    %c0_4 = arith.constant 0 : index
    %2 = vector.load %arg6[%c0_3, %c0_4] : memref<8x16xf32, #tpu.memory_space<vmem>>, vector<8x16xf32>
    %c0_5 = arith.constant 0 : index
    %c0_6 = arith.constant 0 : index
    %3 = vector.load %arg7[%c0_5, %c0_6] : memref<8x1xf32, #tpu.memory_space<vmem>>, vector<8x1xf32>
    %c0_7 = arith.constant 0 : index
    %c0_8 = arith.constant 0 : index
    %c0_9 = arith.constant 0 : index
    %4 = vector.load %arg2[%c0_7, %c0_8, %c0_9] : memref<1x4x64xbf16, #tpu.memory_space<vmem>>, vector<1x4x8xbf16>
    %5 = vector.shape_cast %4 : vector<1x4x8xbf16> to vector<4x8xbf16>
    %cst = arith.constant dense<0.000000e+00> : vector<8x8xf32>
    %6 = tpu.matmul %0, %5, %cst {dimension_numbers = #tpu.dot_dimension_numbers<[1], [0], [0], [1], [0, 0, 1, 1], [], []>} : vector<8x4xbf16>, vector<4x8xbf16>, vector<8x8xf32> -> vector<8x8xf32>
    %cst_10 = arith.constant dense<0.000000e+00> : vector<8x16xf32>
    %7 = tpu.matmul %6, %2, %cst_10 {dimension_numbers = #tpu.dot_dimension_numbers<[1], [0], [0], [1], [0, 0, 1, 1], [], []>} : vector<8x8xf32>, vector<8x16xf32>, vector<8x16xf32> -> vector<8x16xf32>
    %c0_11 = arith.constant 0 : index
    %c0_12 = arith.constant 0 : index
    %c0_13 = arith.constant 0 : index
    %8 = vector.load %arg3[%c0_11, %c0_12, %c0_13] : memref<1x4x256xbf16, #tpu.memory_space<vmem>>, vector<1x4x16xbf16>
    %9 = vector.shape_cast %8 : vector<1x4x16xbf16> to vector<4x16xbf16>
    %cst_14 = arith.constant dense<0.000000e+00> : vector<8x16xf32>
    %10 = tpu.matmul %1, %9, %cst_14 {dimension_numbers = #tpu.dot_dimension_numbers<[1], [0], [0], [1], [0, 0, 1, 1], [], []>} : vector<8x4xbf16>, vector<4x16xbf16>, vector<8x16xf32> -> vector<8x16xf32>
    %11 = arith.addf %7, %10 : vector<8x16xf32>
    %12 = vector.broadcast %3 : vector<8x1xf32> to vector<8x16xf32>
    %13 = arith.addf %11, %12 : vector<8x16xf32>
    %cst_15 = arith.constant 0.000000e+00 : f32
    %14 = vector.broadcast %cst_15 : f32 to vector<8x16xf32>
    %15 = arith.maximumf %13, %14 : vector<8x16xf32>
    %c0_16 = arith.constant 0 : index
    %c0_17 = arith.constant 0 : index
    %c0_18 = arith.constant 0 : index
    %16 = vector.load %arg8[%c0_16, %c0_17, %c0_18] : memref<1x8x256xf32, #tpu.memory_space<vmem>>, vector<1x8x16xf32>
    %17 = vector.shape_cast %16 : vector<1x8x16xf32> to vector<8x16xf32>
    %18 = vector.shape_cast %15 : vector<8x16xf32> to vector<1x8x16xf32>
    tpu.vector_store %arg8[%c0_16, %c0_17, %c0_18], %18 {strides = array<i32>} : memref<1x8x256xf32, #tpu.memory_space<vmem>>, vector<1x8x16xf32>,
    %c0_19 = arith.constant 0 : index
    %c0_20 = arith.constant 0 : index
    %c16 = arith.constant 16 : index
    %19 = vector.load %arg3[%c0_19, %c0_20, %c16] : memref<1x4x256xbf16, #tpu.memory_space<vmem>>, vector<1x4x16xbf16>
    %20 = vector.shape_cast %19 : vector<1x4x16xbf16> to vector<4x16xbf16>
    %cst_21 = arith.constant dense<0.000000e+00> : vector<8x16xf32>
    %21 = tpu.matmul %1, %20, %cst_21 {dimension_numbers = #tpu.dot_dimension_numbers<[1], [0], [0], [1], [0, 0, 1, 1], [], []>} : vector<8x4xbf16>, vector<4x16xbf16>, vector<8x16xf32> -> vector<8x16xf32>
    %22 = arith.addf %7, %21 : vector<8x16xf32>
    %23 = vector.broadcast %3 : vector<8x1xf32> to vector<8x16xf32>
    %24 = arith.addf %22, %23 : vector<8x16xf32>
    %cst_22 = arith.constant 0.000000e+00 : f32
    %25 = vector.broadcast %cst_22 : f32 to vector<8x16xf32>
    %26 = arith.maximumf %24, %25 : vector<8x16xf32>
    %c0_23 = arith.constant 0 : index
    %c0_24 = arith.constant 0 : index
    %c16_25 = arith.constant 16 : index
    %27 = vector.load %arg8[%c0_23, %c0_24, %c16_25] : memref<1x8x256xf32, #tpu.memory_space<vmem>>, vector<1x8x16xf32>
    %28 = vector.shape_cast %27 : vector<1x8x16xf32> to vector<8x16xf32>
    %29 = vector.shape_cast %26 : vector<8x16xf32> to vector<1x8x16xf32>
    tpu.vector_store %arg8[%c0_23, %c0_24, %c16_25], %29 {strides = array<i32>} : memref<1x8x256xf32, #tpu.memory_space<vmem>>, vector<1x8x16xf32>,
    %c0_26 = arith.constant 0 : index
    %c0_27 = arith.constant 0 : index
    %c8 = arith.constant 8 : index
    %30 = vector.load %arg2[%c0_26, %c0_27, %c8] : memref<1x4x64xbf16, #tpu.memory_space<vmem>>, vector<1x4x8xbf16>
    %31 = vector.shape_cast %30 : vector<1x4x8xbf16> to vector<4x8xbf16>
    %cst_28 = arith.constant dense<0.000000e+00> : vector<8x8xf32>
    %32 = tpu.matmul %0, %31, %cst_28 {dimension_numbers = #tpu.dot_dimension_numbers<[1], [0], [0], [1], [0, 0, 1, 1], [], []>} : vector<8x4xbf16>, vector<4x8xbf16>, vector<8x8xf32> -> vector<8x8xf32>
    %cst_29 = arith.constant dense<0.000000e+00> : vector<8x16xf32>
    %33 = tpu.matmul %32, %2, %cst_29 {dimension_numbers = #tpu.dot_dimension_numbers<[1], [0], [0], [1], [0, 0, 1, 1], [], []>} : vector<8x8xf32>, vector<8x16xf32>, vector<8x16xf32> -> vector<8x16xf32>
    %c0_30 = arith.constant 0 : index
    %c0_31 = arith.constant 0 : index
    %c32 = arith.constant 32 : index
    %34 = vector.load %arg3[%c0_30, %c0_31, %c32] : memref<1x4x256xbf16, #tpu.memory_space<vmem>>, vector<1x4x16xbf16>
    %35 = vector.shape_cast %34 : vector<1x4x16xbf16> to vector<4x16xbf16>
    %cst_32 = arith.constant dense<0.000000e+00> : vector<8x16xf32>
    %36 = tpu.matmul %1, %35, %cst_32 {dimension_numbers = #tpu.dot_dimension_numbers<[1], [0], [0], [1], [0, 0, 1, 1], [], []>} : vector<8x4xbf16>, vector<4x16xbf16>, vector<8x16xf32> -> vector<8x16xf32>
    %37 = arith.addf %33, %36 : vector<8x16xf32>
    %38 = vector.broadcast %3 : vector<8x1xf32> to vector<8x16xf32>
    %39 = arith.addf %37, %38 : vector<8x16xf32>
    %cst_33 = arith.constant 0.000000e+00 : f32
    %40 = vector.broadcast %cst_33 : f32 to vector<8x16xf32>
    %41 = arith.maximumf %39, %40 : vector<8x16xf32>
    %c0_34 = arith.constant 0 : index
    %c0_35 = arith.constant 0 : index
    %c32_36 = arith.constant 32 : index
    %42 = vector.load %arg8[%c0_34, %c0_35, %c32_36] : memref<1x8x256xf32, #tpu.memory_space<vmem>>, vector<1x8x16xf32>
    %43 = vector.shape_cast %42 : vector<1x8x16xf32> to vector<8x16xf32>
    %44 = vector.shape_cast %41 : vector<8x16xf32> to vector<1x8x16xf32>
    tpu.vector_store %arg8[%c0_34, %c0_35, %c32_36], %44 {strides = array<i32>} : memref<1x8x256xf32, #tpu.memory_space<vmem>>, vector<1x8x16xf32>,
    %c0_37 = arith.constant 0 : index
    %c0_38 = arith.constant 0 : index
    %c48 = arith.constant 48 : index
    %45 = vector.load %arg3[%c0_37, %c0_38, %c48] : memref<1x4x256xbf16, #tpu.memory_space<vmem>>, vector<1x4x16xbf16>
    %46 = vector.shape_cast %45 : vector<1x4x16xbf16> to vector<4x16xbf16>
    %cst_39 = arith.constant dense<0.000000e+00> : vector<8x16xf32>
    %47 = tpu.matmul %1, %46, %cst_39 {dimension_numbers = #tpu.dot_dimension_numbers<[1], [0], [0], [1], [0, 0, 1, 1], [], []>} : vector<8x4xbf16>, vector<4x16xbf16>, vector<8x16xf32> -> vector<8x16xf32>
    %48 = arith.addf %33, %47 : vector<8x16xf32>
    %49 = vector.broadcast %3 : vector<8x1xf32> to vector<8x16xf32>
    %50 = arith.addf %48, %49 : vector<8x16xf32>
    %cst_40 = arith.constant 0.000000e+00 : f32
    %51 = vector.broadcast %cst_40 : f32 to vector<8x16xf32>
    %52 = arith.maximumf %50, %51 : vector<8x16xf32>
    %c0_41 = arith.constant 0 : index
    %c0_42 = arith.constant 0 : index
    %c48_43 = arith.constant 48 : index
    %53 = vector.load %arg8[%c0_41, %c0_42, %c48_43] : memref<1x8x256xf32, #tpu.memory_space<vmem>>, vector<1x8x16xf32>
    %54 = vector.shape_cast %53 : vector<1x8x16xf32> to vector<8x16xf32>
    %55 = vector.shape_cast %52 : vector<8x16xf32> to vector<1x8x16xf32>
    tpu.vector_store %arg8[%c0_41, %c0_42, %c48_43], %55 {strides = array<i32>} : memref<1x8x256xf32, #tpu.memory_space<vmem>>, vector<1x8x16xf32>,
    %c0_44 = arith.constant 0 : index
    %c0_45 = arith.constant 0 : index
    %c16_46 = arith.constant 16 : index
    %56 = vector.load %arg2[%c0_44, %c0_45, %c16_46] : memref<1x4x64xbf16, #tpu.memory_space<vmem>>, vector<1x4x8xbf16>
    %57 = vector.shape_cast %56 : vector<1x4x8xbf16> to vector<4x8xbf16>
    %cst_47 = arith.constant dense<0.000000e+00> : vector<8x8xf32>
    %58 = tpu.matmul %0, %57, %cst_47 {dimension_numbers = #tpu.dot_dimension_numbers<[1], [0], [0], [1], [0, 0, 1, 1], [], []>} : vector<8x4xbf16>, vector<4x8xbf16>, vector<8x8xf32> -> vector<8x8xf32>
    %cst_48 = arith.constant dense<0.000000e+00> : vector<8x16xf32>
    %59 = tpu.matmul %58, %2, %cst_48 {dimension_numbers = #tpu.dot_dimension_numbers<[1], [0], [0], [1], [0, 0, 1, 1], [], []>} : vector<8x8xf32>, vector<8x16xf32>, vector<8x16xf32> -> vector<8x16xf32>
    %c0_49 = arith.constant 0 : index
    %c0_50 = arith.constant 0 : index
    %c64 = arith.constant 64 : index
    %60 = vector.load %arg3[%c0_49, %c0_50, %c64] : memref<1x4x256xbf16, #tpu.memory_space<vmem>>, vector<1x4x16xbf16>
    %61 = vector.shape_cast %60 : vector<1x4x16xbf16> to vector<4x16xbf16>
    %cst_51 = arith.constant dense<0.000000e+00> : vector<8x16xf32>
    %62 = tpu.matmul %1, %61, %cst_51 {dimension_numbers = #tpu.dot_dimension_numbers<[1], [0], [0], [1], [0, 0, 1, 1], [], []>} : vector<8x4xbf16>, vector<4x16xbf16>, vector<8x16xf32> -> vector<8x16xf32>
    %63 = arith.addf %59, %62 : vector<8x16xf32>
    %64 = vector.broadcast %3 : vector<8x1xf32> to vector<8x16xf32>
    %65 = arith.addf %63, %64 : vector<8x16xf32>
    %cst_52 = arith.constant 0.000000e+00 : f32
    %66 = vector.broadcast %cst_52 : f32 to vector<8x16xf32>
    %67 = arith.maximumf %65, %66 : vector<8x16xf32>
    %c0_53 = arith.constant 0 : index
    %c0_54 = arith.constant 0 : index
    %c64_55 = arith.constant 64 : index
    %68 = vector.load %arg8[%c0_53, %c0_54, %c64_55] : memref<1x8x256xf32, #tpu.memory_space<vmem>>, vector<1x8x16xf32>
    %69 = vector.shape_cast %68 : vector<1x8x16xf32> to vector<8x16xf32>
    %70 = vector.shape_cast %67 : vector<8x16xf32> to vector<1x8x16xf32>
    tpu.vector_store %arg8[%c0_53, %c0_54, %c64_55], %70 {strides = array<i32>} : memref<1x8x256xf32, #tpu.memory_space<vmem>>, vector<1x8x16xf32>,
    %c0_56 = arith.constant 0 : index
    %c0_57 = arith.constant 0 : index
    %c80 = arith.constant 80 : index
    %71 = vector.load %arg3[%c0_56, %c0_57, %c80] : memref<1x4x256xbf16, #tpu.memory_space<vmem>>, vector<1x4x16xbf16>
    %72 = vector.shape_cast %71 : vector<1x4x16xbf16> to vector<4x16xbf16>
    %cst_58 = arith.constant dense<0.000000e+00> : vector<8x16xf32>
    %73 = tpu.matmul %1, %72, %cst_58 {dimension_numbers = #tpu.dot_dimension_numbers<[1], [0], [0], [1], [0, 0, 1, 1], [], []>} : vector<8x4xbf16>, vector<4x16xbf16>, vector<8x16xf32> -> vector<8x16xf32>
    %74 = arith.addf %59, %73 : vector<8x16xf32>
    %75 = vector.broadcast %3 : vector<8x1xf32> to vector<8x16xf32>
    %76 = arith.addf %74, %75 : vector<8x16xf32>
    %cst_59 = arith.constant 0.000000e+00 : f32
    %77 = vector.broadcast %cst_59 : f32 to vector<8x16xf32>
    %78 = arith.maximumf %76, %77 : vector<8x16xf32>
    %c0_60 = arith.constant 0 : index
    %c0_61 = arith.constant 0 : index
    %c80_62 = arith.constant 80 : index
    %79 = vector.load %arg8[%c0_60, %c0_61, %c80_62] : memref<1x8x256xf32, #tpu.memory_space<vmem>>, vector<1x8x16xf32>
    %80 = vector.shape_cast %79 : vector<1x8x16xf32> to vector<8x16xf32>
    %81 = vector.shape_cast %78 : vector<8x16xf32> to vector<1x8x16xf32>
    tpu.vector_store %arg8[%c0_60, %c0_61, %c80_62], %81 {strides = array<i32>} : memref<1x8x256xf32, #tpu.memory_space<vmem>>, vector<1x8x16xf32>,
    %c0_63 = arith.constant 0 : index
    %c0_64 = arith.constant 0 : index
    %c24 = arith.constant 24 : index
    %82 = vector.load %arg2[%c0_63, %c0_64, %c24] : memref<1x4x64xbf16, #tpu.memory_space<vmem>>, vector<1x4x8xbf16>
    %83 = vector.shape_cast %82 : vector<1x4x8xbf16> to vector<4x8xbf16>
    %cst_65 = arith.constant dense<0.000000e+00> : vector<8x8xf32>
    %84 = tpu.matmul %0, %83, %cst_65 {dimension_numbers = #tpu.dot_dimension_numbers<[1], [0], [0], [1], [0, 0, 1, 1], [], []>} : vector<8x4xbf16>, vector<4x8xbf16>, vector<8x8xf32> -> vector<8x8xf32>
    %cst_66 = arith.constant dense<0.000000e+00> : vector<8x16xf32>
    %85 = tpu.matmul %84, %2, %cst_66 {dimension_numbers = #tpu.dot_dimension_numbers<[1], [0], [0], [1], [0, 0, 1, 1], [], []>} : vector<8x8xf32>, vector<8x16xf32>, vector<8x16xf32> -> vector<8x16xf32>
    %c0_67 = arith.constant 0 : index
    %c0_68 = arith.constant 0 : index
    %c96 = arith.constant 96 : index
    %86 = vector.load %arg3[%c0_67, %c0_68, %c96] : memref<1x4x256xbf16, #tpu.memory_space<vmem>>, vector<1x4x16xbf16>
    %87 = vector.shape_cast %86 : vector<1x4x16xbf16> to vector<4x16xbf16>
    %cst_69 = arith.constant dense<0.000000e+00> : vector<8x16xf32>
    %88 = tpu.matmul %1, %87, %cst_69 {dimension_numbers = #tpu.dot_dimension_numbers<[1], [0], [0], [1], [0, 0, 1, 1], [], []>} : vector<8x4xbf16>, vector<4x16xbf16>, vector<8x16xf32> -> vector<8x16xf32>
    %89 = arith.addf %85, %88 : vector<8x16xf32>
    %90 = vector.broadcast %3 : vector<8x1xf32> to vector<8x16xf32>
    %91 = arith.addf %89, %90 : vector<8x16xf32>
    %cst_70 = arith.constant 0.000000e+00 : f32
    %92 = vector.broadcast %cst_70 : f32 to vector<8x16xf32>
    %93 = arith.maximumf %91, %92 : vector<8x16xf32>
    %c0_71 = arith.constant 0 : index
    %c0_72 = arith.constant 0 : index
    %c96_73 = arith.constant 96 : index
    %94 = vector.load %arg8[%c0_71, %c0_72, %c96_73] : memref<1x8x256xf32, #tpu.memory_space<vmem>>, vector<1x8x16xf32>
    %95 = vector.shape_cast %94 : vector<1x8x16xf32> to vector<8x16xf32>
    %96 = vector.shape_cast %93 : vector<8x16xf32> to vector<1x8x16xf32>
    tpu.vector_store %arg8[%c0_71, %c0_72, %c96_73], %96 {strides = array<i32>} : memref<1x8x256xf32, #tpu.memory_space<vmem>>, vector<1x8x16xf32>,
    %c0_74 = arith.constant 0 : index
    %c0_75 = arith.constant 0 : index
    %c112 = arith.constant 112 : index
    %97 = vector.load %arg3[%c0_74, %c0_75, %c112] : memref<1x4x256xbf16, #tpu.memory_space<vmem>>, vector<1x4x16xbf16>
    %98 = vector.shape_cast %97 : vector<1x4x16xbf16> to vector<4x16xbf16>
    %cst_76 = arith.constant dense<0.000000e+00> : vector<8x16xf32>
    %99 = tpu.matmul %1, %98, %cst_76 {dimension_numbers = #tpu.dot_dimension_numbers<[1], [0], [0], [1], [0, 0, 1, 1], [], []>} : vector<8x4xbf16>, vector<4x16xbf16>, vector<8x16xf32> -> vector<8x16xf32>
    %100 = arith.addf %85, %99 : vector<8x16xf32>
    %101 = vector.broadcast %3 : vector<8x1xf32> to vector<8x16xf32>
    %102 = arith.addf %100, %101 : vector<8x16xf32>
    %cst_77 = arith.constant 0.000000e+00 : f32
    %103 = vector.broadcast %cst_77 : f32 to vector<8x16xf32>
    %104 = arith.maximumf %102, %103 : vector<8x16xf32>
    %c0_78 = arith.constant 0 : index
    %c0_79 = arith.constant 0 : index
    %c112_80 = arith.constant 112 : index
    %105 = vector.load %arg8[%c0_78, %c0_79, %c112_80] : memref<1x8x256xf32, #tpu.memory_space<vmem>>, vector<1x8x16xf32>
    %106 = vector.shape_cast %105 : vector<1x8x16xf32> to vector<8x16xf32>
    %107 = vector.shape_cast %104 : vector<8x16xf32> to vector<1x8x16xf32>
    tpu.vector_store %arg8[%c0_78, %c0_79, %c112_80], %107 {strides = array<i32>} : memref<1x8x256xf32, #tpu.memory_space<vmem>>, vector<1x8x16xf32>,
    %c0_81 = arith.constant 0 : index
    %c0_82 = arith.constant 0 : index
    %c32_83 = arith.constant 32 : index
    %108 = vector.load %arg2[%c0_81, %c0_82, %c32_83] : memref<1x4x64xbf16, #tpu.memory_space<vmem>>, vector<1x4x8xbf16>
    %109 = vector.shape_cast %108 : vector<1x4x8xbf16> to vector<4x8xbf16>
    %cst_84 = arith.constant dense<0.000000e+00> : vector<8x8xf32>
    %110 = tpu.matmul %0, %109, %cst_84 {dimension_numbers = #tpu.dot_dimension_numbers<[1], [0], [0], [1], [0, 0, 1, 1], [], []>} : vector<8x4xbf16>, vector<4x8xbf16>, vector<8x8xf32> -> vector<8x8xf32>
    %cst_85 = arith.constant dense<0.000000e+00> : vector<8x16xf32>
    %111 = tpu.matmul %110, %2, %cst_85 {dimension_numbers = #tpu.dot_dimension_numbers<[1], [0], [0], [1], [0, 0, 1, 1], [], []>} : vector<8x8xf32>, vector<8x16xf32>, vector<8x16xf32> -> vector<8x16xf32>
    %c0_86 = arith.constant 0 : index
    %c0_87 = arith.constant 0 : index
    %c128 = arith.constant 128 : index
    %112 = vector.load %arg3[%c0_86, %c0_87, %c128] : memref<1x4x256xbf16, #tpu.memory_space<vmem>>, vector<1x4x16xbf16>
    %113 = vector.shape_cast %112 : vector<1x4x16xbf16> to vector<4x16xbf16>
    %cst_88 = arith.constant dense<0.000000e+00> : vector<8x16xf32>
    %114 = tpu.matmul %1, %113, %cst_88 {dimension_numbers = #tpu.dot_dimension_numbers<[1], [0], [0], [1], [0, 0, 1, 1], [], []>} : vector<8x4xbf16>, vector<4x16xbf16>, vector<8x16xf32> -> vector<8x16xf32>
    %115 = arith.addf %111, %114 : vector<8x16xf32>
    %116 = vector.broadcast %3 : vector<8x1xf32> to vector<8x16xf32>
    %117 = arith.addf %115, %116 : vector<8x16xf32>
    %cst_89 = arith.constant 0.000000e+00 : f32
    %118 = vector.broadcast %cst_89 : f32 to vector<8x16xf32>
    %119 = arith.maximumf %117, %118 : vector<8x16xf32>
    %c0_90 = arith.constant 0 : index
    %c0_91 = arith.constant 0 : index
    %c128_92 = arith.constant 128 : index
    %120 = vector.load %arg8[%c0_90, %c0_91, %c128_92] : memref<1x8x256xf32, #tpu.memory_space<vmem>>, vector<1x8x16xf32>
    %121 = vector.shape_cast %120 : vector<1x8x16xf32> to vector<8x16xf32>
    %122 = vector.shape_cast %119 : vector<8x16xf32> to vector<1x8x16xf32>
    tpu.vector_store %arg8[%c0_90, %c0_91, %c128_92], %122 {strides = array<i32>} : memref<1x8x256xf32, #tpu.memory_space<vmem>>, vector<1x8x16xf32>,
    %c0_93 = arith.constant 0 : index
    %c0_94 = arith.constant 0 : index
    %c144 = arith.constant 144 : index
    %123 = vector.load %arg3[%c0_93, %c0_94, %c144] : memref<1x4x256xbf16, #tpu.memory_space<vmem>>, vector<1x4x16xbf16>
    %124 = vector.shape_cast %123 : vector<1x4x16xbf16> to vector<4x16xbf16>
    %cst_95 = arith.constant dense<0.000000e+00> : vector<8x16xf32>
    %125 = tpu.matmul %1, %124, %cst_95 {dimension_numbers = #tpu.dot_dimension_numbers<[1], [0], [0], [1], [0, 0, 1, 1], [], []>} : vector<8x4xbf16>, vector<4x16xbf16>, vector<8x16xf32> -> vector<8x16xf32>
    %126 = arith.addf %111, %125 : vector<8x16xf32>
    %127 = vector.broadcast %3 : vector<8x1xf32> to vector<8x16xf32>
    %128 = arith.addf %126, %127 : vector<8x16xf32>
    %cst_96 = arith.constant 0.000000e+00 : f32
    %129 = vector.broadcast %cst_96 : f32 to vector<8x16xf32>
    %130 = arith.maximumf %128, %129 : vector<8x16xf32>
    %c0_97 = arith.constant 0 : index
    %c0_98 = arith.constant 0 : index
    %c144_99 = arith.constant 144 : index
    %131 = vector.load %arg8[%c0_97, %c0_98, %c144_99] : memref<1x8x256xf32, #tpu.memory_space<vmem>>, vector<1x8x16xf32>
    %132 = vector.shape_cast %131 : vector<1x8x16xf32> to vector<8x16xf32>
    %133 = vector.shape_cast %130 : vector<8x16xf32> to vector<1x8x16xf32>
    tpu.vector_store %arg8[%c0_97, %c0_98, %c144_99], %133 {strides = array<i32>} : memref<1x8x256xf32, #tpu.memory_space<vmem>>, vector<1x8x16xf32>,
    %c0_100 = arith.constant 0 : index
    %c0_101 = arith.constant 0 : index
    %c40 = arith.constant 40 : index
    %134 = vector.load %arg2[%c0_100, %c0_101, %c40] : memref<1x4x64xbf16, #tpu.memory_space<vmem>>, vector<1x4x8xbf16>
    %135 = vector.shape_cast %134 : vector<1x4x8xbf16> to vector<4x8xbf16>
    %cst_102 = arith.constant dense<0.000000e+00> : vector<8x8xf32>
    %136 = tpu.matmul %0, %135, %cst_102 {dimension_numbers = #tpu.dot_dimension_numbers<[1], [0], [0], [1], [0, 0, 1, 1], [], []>} : vector<8x4xbf16>, vector<4x8xbf16>, vector<8x8xf32> -> vector<8x8xf32>
    %cst_103 = arith.constant dense<0.000000e+00> : vector<8x16xf32>
    %137 = tpu.matmul %136, %2, %cst_103 {dimension_numbers = #tpu.dot_dimension_numbers<[1], [0], [0], [1], [0, 0, 1, 1], [], []>} : vector<8x8xf32>, vector<8x16xf32>, vector<8x16xf32> -> vector<8x16xf32>
    %c0_104 = arith.constant 0 : index
    %c0_105 = arith.constant 0 : index
    %c160 = arith.constant 160 : index
    %138 = vector.load %arg3[%c0_104, %c0_105, %c160] : memref<1x4x256xbf16, #tpu.memory_space<vmem>>, vector<1x4x16xbf16>
    %139 = vector.shape_cast %138 : vector<1x4x16xbf16> to vector<4x16xbf16>
    %cst_106 = arith.constant dense<0.000000e+00> : vector<8x16xf32>
    %140 = tpu.matmul %1, %139, %cst_106 {dimension_numbers = #tpu.dot_dimension_numbers<[1], [0], [0], [1], [0, 0, 1, 1], [], []>} : vector<8x4xbf16>, vector<4x16xbf16>, vector<8x16xf32> -> vector<8x16xf32>
    %141 = arith.addf %137, %140 : vector<8x16xf32>
    %142 = vector.broadcast %3 : vector<8x1xf32> to vector<8x16xf32>
    %143 = arith.addf %141, %142 : vector<8x16xf32>
    %cst_107 = arith.constant 0.000000e+00 : f32
    %144 = vector.broadcast %cst_107 : f32 to vector<8x16xf32>
    %145 = arith.maximumf %143, %144 : vector<8x16xf32>
    %c0_108 = arith.constant 0 : index
    %c0_109 = arith.constant 0 : index
    %c160_110 = arith.constant 160 : index
    %146 = vector.load %arg8[%c0_108, %c0_109, %c160_110] : memref<1x8x256xf32, #tpu.memory_space<vmem>>, vector<1x8x16xf32>
    %147 = vector.shape_cast %146 : vector<1x8x16xf32> to vector<8x16xf32>
    %148 = vector.shape_cast %145 : vector<8x16xf32> to vector<1x8x16xf32>
    tpu.vector_store %arg8[%c0_108, %c0_109, %c160_110], %148 {strides = array<i32>} : memref<1x8x256xf32, #tpu.memory_space<vmem>>, vector<1x8x16xf32>,
    %c0_111 = arith.constant 0 : index
    %c0_112 = arith.constant 0 : index
    %c176 = arith.constant 176 : index
    %149 = vector.load %arg3[%c0_111, %c0_112, %c176] : memref<1x4x256xbf16, #tpu.memory_space<vmem>>, vector<1x4x16xbf16>
    %150 = vector.shape_cast %149 : vector<1x4x16xbf16> to vector<4x16xbf16>
    %cst_113 = arith.constant dense<0.000000e+00> : vector<8x16xf32>
    %151 = tpu.matmul %1, %150, %cst_113 {dimension_numbers = #tpu.dot_dimension_numbers<[1], [0], [0], [1], [0, 0, 1, 1], [], []>} : vector<8x4xbf16>, vector<4x16xbf16>, vector<8x16xf32> -> vector<8x16xf32>
    %152 = arith.addf %137, %151 : vector<8x16xf32>
    %153 = vector.broadcast %3 : vector<8x1xf32> to vector<8x16xf32>
    %154 = arith.addf %152, %153 : vector<8x16xf32>
    %cst_114 = arith.constant 0.000000e+00 : f32
    %155 = vector.broadcast %cst_114 : f32 to vector<8x16xf32>
    %156 = arith.maximumf %154, %155 : vector<8x16xf32>
    %c0_115 = arith.constant 0 : index
    %c0_116 = arith.constant 0 : index
    %c176_117 = arith.constant 176 : index
    %157 = vector.load %arg8[%c0_115, %c0_116, %c176_117] : memref<1x8x256xf32, #tpu.memory_space<vmem>>, vector<1x8x16xf32>
    %158 = vector.shape_cast %157 : vector<1x8x16xf32> to vector<8x16xf32>
    %159 = vector.shape_cast %156 : vector<8x16xf32> to vector<1x8x16xf32>
    tpu.vector_store %arg8[%c0_115, %c0_116, %c176_117], %159 {strides = array<i32>} : memref<1x8x256xf32, #tpu.memory_space<vmem>>, vector<1x8x16xf32>,
    %c0_118 = arith.constant 0 : index
    %c0_119 = arith.constant 0 : index
    %c48_120 = arith.constant 48 : index
    %160 = vector.load %arg2[%c0_118, %c0_119, %c48_120] : memref<1x4x64xbf16, #tpu.memory_space<vmem>>, vector<1x4x8xbf16>
    %161 = vector.shape_cast %160 : vector<1x4x8xbf16> to vector<4x8xbf16>
    %cst_121 = arith.constant dense<0.000000e+00> : vector<8x8xf32>
    %162 = tpu.matmul %0, %161, %cst_121 {dimension_numbers = #tpu.dot_dimension_numbers<[1], [0], [0], [1], [0, 0, 1, 1], [], []>} : vector<8x4xbf16>, vector<4x8xbf16>, vector<8x8xf32> -> vector<8x8xf32>
    %cst_122 = arith.constant dense<0.000000e+00> : vector<8x16xf32>
    %163 = tpu.matmul %162, %2, %cst_122 {dimension_numbers = #tpu.dot_dimension_numbers<[1], [0], [0], [1], [0, 0, 1, 1], [], []>} : vector<8x8xf32>, vector<8x16xf32>, vector<8x16xf32> -> vector<8x16xf32>
    %c0_123 = arith.constant 0 : index
    %c0_124 = arith.constant 0 : index
    %c192 = arith.constant 192 : index
    %164 = vector.load %arg3[%c0_123, %c0_124, %c192] : memref<1x4x256xbf16, #tpu.memory_space<vmem>>, vector<1x4x16xbf16>
    %165 = vector.shape_cast %164 : vector<1x4x16xbf16> to vector<4x16xbf16>
    %cst_125 = arith.constant dense<0.000000e+00> : vector<8x16xf32>
    %166 = tpu.matmul %1, %165, %cst_125 {dimension_numbers = #tpu.dot_dimension_numbers<[1], [0], [0], [1], [0, 0, 1, 1], [], []>} : vector<8x4xbf16>, vector<4x16xbf16>, vector<8x16xf32> -> vector<8x16xf32>
    %167 = arith.addf %163, %166 : vector<8x16xf32>
    %168 = vector.broadcast %3 : vector<8x1xf32> to vector<8x16xf32>
    %169 = arith.addf %167, %168 : vector<8x16xf32>
    %cst_126 = arith.constant 0.000000e+00 : f32
    %170 = vector.broadcast %cst_126 : f32 to vector<8x16xf32>
    %171 = arith.maximumf %169, %170 : vector<8x16xf32>
    %c0_127 = arith.constant 0 : index
    %c0_128 = arith.constant 0 : index
    %c192_129 = arith.constant 192 : index
    %172 = vector.load %arg8[%c0_127, %c0_128, %c192_129] : memref<1x8x256xf32, #tpu.memory_space<vmem>>, vector<1x8x16xf32>
    %173 = vector.shape_cast %172 : vector<1x8x16xf32> to vector<8x16xf32>
    %174 = vector.shape_cast %171 : vector<8x16xf32> to vector<1x8x16xf32>
    tpu.vector_store %arg8[%c0_127, %c0_128, %c192_129], %174 {strides = array<i32>} : memref<1x8x256xf32, #tpu.memory_space<vmem>>, vector<1x8x16xf32>,
    %c0_130 = arith.constant 0 : index
    %c0_131 = arith.constant 0 : index
    %c208 = arith.constant 208 : index
    %175 = vector.load %arg3[%c0_130, %c0_131, %c208] : memref<1x4x256xbf16, #tpu.memory_space<vmem>>, vector<1x4x16xbf16>
    %176 = vector.shape_cast %175 : vector<1x4x16xbf16> to vector<4x16xbf16>
    %cst_132 = arith.constant dense<0.000000e+00> : vector<8x16xf32>
    %177 = tpu.matmul %1, %176, %cst_132 {dimension_numbers = #tpu.dot_dimension_numbers<[1], [0], [0], [1], [0, 0, 1, 1], [], []>} : vector<8x4xbf16>, vector<4x16xbf16>, vector<8x16xf32> -> vector<8x16xf32>
    %178 = arith.addf %163, %177 : vector<8x16xf32>
    %179 = vector.broadcast %3 : vector<8x1xf32> to vector<8x16xf32>
    %180 = arith.addf %178, %179 : vector<8x16xf32>
    %cst_133 = arith.constant 0.000000e+00 : f32
    %181 = vector.broadcast %cst_133 : f32 to vector<8x16xf32>
    %182 = arith.maximumf %180, %181 : vector<8x16xf32>
    %c0_134 = arith.constant 0 : index
    %c0_135 = arith.constant 0 : index
    %c208_136 = arith.constant 208 : index
    %183 = vector.load %arg8[%c0_134, %c0_135, %c208_136] : memref<1x8x256xf32, #tpu.memory_space<vmem>>, vector<1x8x16xf32>
    %184 = vector.shape_cast %183 : vector<1x8x16xf32> to vector<8x16xf32>
    %185 = vector.shape_cast %182 : vector<8x16xf32> to vector<1x8x16xf32>
    tpu.vector_store %arg8[%c0_134, %c0_135, %c208_136], %185 {strides = array<i32>} : memref<1x8x256xf32, #tpu.memory_space<vmem>>, vector<1x8x16xf32>,
    %c0_137 = arith.constant 0 : index
    %c0_138 = arith.constant 0 : index
    %c56 = arith.constant 56 : index
    %186 = vector.load %arg2[%c0_137, %c0_138, %c56] : memref<1x4x64xbf16, #tpu.memory_space<vmem>>, vector<1x4x8xbf16>
    %187 = vector.shape_cast %186 : vector<1x4x8xbf16> to vector<4x8xbf16>
    %cst_139 = arith.constant dense<0.000000e+00> : vector<8x8xf32>
    %188 = tpu.matmul %0, %187, %cst_139 {dimension_numbers = #tpu.dot_dimension_numbers<[1], [0], [0], [1], [0, 0, 1, 1], [], []>} : vector<8x4xbf16>, vector<4x8xbf16>, vector<8x8xf32> -> vector<8x8xf32>
    %cst_140 = arith.constant dense<0.000000e+00> : vector<8x16xf32>
    %189 = tpu.matmul %188, %2, %cst_140 {dimension_numbers = #tpu.dot_dimension_numbers<[1], [0], [0], [1], [0, 0, 1, 1], [], []>} : vector<8x8xf32>, vector<8x16xf32>, vector<8x16xf32> -> vector<8x16xf32>
    %c0_141 = arith.constant 0 : index
    %c0_142 = arith.constant 0 : index
    %c224 = arith.constant 224 : index
    %190 = vector.load %arg3[%c0_141, %c0_142, %c224] : memref<1x4x256xbf16, #tpu.memory_space<vmem>>, vector<1x4x16xbf16>
    %191 = vector.shape_cast %190 : vector<1x4x16xbf16> to vector<4x16xbf16>
    %cst_143 = arith.constant dense<0.000000e+00> : vector<8x16xf32>
    %192 = tpu.matmul %1, %191, %cst_143 {dimension_numbers = #tpu.dot_dimension_numbers<[1], [0], [0], [1], [0, 0, 1, 1], [], []>} : vector<8x4xbf16>, vector<4x16xbf16>, vector<8x16xf32> -> vector<8x16xf32>
    %193 = arith.addf %189, %192 : vector<8x16xf32>
    %194 = vector.broadcast %3 : vector<8x1xf32> to vector<8x16xf32>
    %195 = arith.addf %193, %194 : vector<8x16xf32>
    %cst_144 = arith.constant 0.000000e+00 : f32
    %196 = vector.broadcast %cst_144 : f32 to vector<8x16xf32>
    %197 = arith.maximumf %195, %196 : vector<8x16xf32>
    %c0_145 = arith.constant 0 : index
    %c0_146 = arith.constant 0 : index
    %c224_147 = arith.constant 224 : index
    %198 = vector.load %arg8[%c0_145, %c0_146, %c224_147] : memref<1x8x256xf32, #tpu.memory_space<vmem>>, vector<1x8x16xf32>
    %199 = vector.shape_cast %198 : vector<1x8x16xf32> to vector<8x16xf32>
    %200 = vector.shape_cast %197 : vector<8x16xf32> to vector<1x8x16xf32>
    tpu.vector_store %arg8[%c0_145, %c0_146, %c224_147], %200 {strides = array<i32>} : memref<1x8x256xf32, #tpu.memory_space<vmem>>, vector<1x8x16xf32>,
    %c0_148 = arith.constant 0 : index
    %c0_149 = arith.constant 0 : index
    %c240 = arith.constant 240 : index
    %201 = vector.load %arg3[%c0_148, %c0_149, %c240] : memref<1x4x256xbf16, #tpu.memory_space<vmem>>, vector<1x4x16xbf16>
    %202 = vector.shape_cast %201 : vector<1x4x16xbf16> to vector<4x16xbf16>
    %cst_150 = arith.constant dense<0.000000e+00> : vector<8x16xf32>
    %203 = tpu.matmul %1, %202, %cst_150 {dimension_numbers = #tpu.dot_dimension_numbers<[1], [0], [0], [1], [0, 0, 1, 1], [], []>} : vector<8x4xbf16>, vector<4x16xbf16>, vector<8x16xf32> -> vector<8x16xf32>
    %204 = arith.addf %189, %203 : vector<8x16xf32>
    %205 = vector.broadcast %3 : vector<8x1xf32> to vector<8x16xf32>
    %206 = arith.addf %204, %205 : vector<8x16xf32>
    %cst_151 = arith.constant 0.000000e+00 : f32
    %207 = vector.broadcast %cst_151 : f32 to vector<8x16xf32>
    %208 = arith.maximumf %206, %207 : vector<8x16xf32>
    %c0_152 = arith.constant 0 : index
    %c0_153 = arith.constant 0 : index
    %c240_154 = arith.constant 240 : index
    %209 = vector.load %arg8[%c0_152, %c0_153, %c240_154] : memref<1x8x256xf32, #tpu.memory_space<vmem>>, vector<1x8x16xf32>
    %210 = vector.shape_cast %209 : vector<1x8x16xf32> to vector<8x16xf32>
    %211 = vector.shape_cast %208 : vector<8x16xf32> to vector<1x8x16xf32>
    tpu.vector_store %arg8[%c0_152, %c0_153, %c240_154], %211 {strides = array<i32>} : memref<1x8x256xf32, #tpu.memory_space<vmem>>, vector<1x8x16xf32>,
    return
  }
  func.func @transform_0(%arg0: i32, %arg1: i32) -> (i32, i32, i32) {
    %c0_i32 = arith.constant 0 : i32
    %c0_i32_0 = arith.constant 0 : i32
    return %arg0, %c0_i32, %arg1 : i32, i32, i32
  }
  func.func @transform_1(%arg0: i32, %arg1: i32) -> (i32, i32, i32) {
    %c0_i32 = arith.constant 0 : i32
    %c0_i32_0 = arith.constant 0 : i32
    return %arg0, %c0_i32, %arg1 : i32, i32, i32
  }
  func.func @transform_2(%arg0: i32, %arg1: i32) -> (i32, i32) {
    %c0_i32 = arith.constant 0 : i32
    %c0_i32_0 = arith.constant 0 : i32
    %c0_i32_1 = arith.constant 0 : i32
    return %c0_i32, %c0_i32_0 : i32, i32
  }
  func.func @transform_3(%arg0: i32, %arg1: i32) -> (i32, i32) {
    %c0_i32 = arith.constant 0 : i32
    %c0_i32_0 = arith.constant 0 : i32
    %c0_i32_1 = arith.constant 0 : i32
    return %c0_i32, %c0_i32_0 : i32, i32
  }
  func.func @transform_4(%arg0: i32, %arg1: i32) -> (i32, i32) {
    %c0_i32 = arith.constant 0 : i32
    %c0_i32_0 = arith.constant 0 : i32
    %c0_i32_1 = arith.constant 0 : i32
    return %c0_i32, %c0_i32_0 : i32, i32
  }
  func.func @transform_5(%arg0: i32, %arg1: i32) -> (i32, i32) {
    %c0_i32 = arith.constant 0 : i32
    %c0_i32_0 = arith.constant 0 : i32
    %c0_i32_1 = arith.constant 0 : i32
    return %c0_i32, %c0_i32_0 : i32, i32
  }
  func.func @transform_6(%arg0: i32, %arg1: i32) -> (i32, i32, i32) {
    %c0_i32 = arith.constant 0 : i32
    %c0_i32_0 = arith.constant 0 : i32
    return %arg0, %c0_i32, %arg1 : i32, i32, i32
  }
}

</mosaic_0001>

<bundles_post_ra>
// kernel: tpu_custom_call.1
= control target key start
LH: loop header
LB: loop body
LE: loop exit
PB: predicated region body
PF: predicated region fallthrough
CT: control target
= control target key end

     0   :  { %11 = vsyncpa [#allocation3], 0  ;;  %s3376_s0 = inlined_call_operand.vmem [shape: bf16[2,4,64], index: 0, kind: input, shape index: {}]   ;;  %s3377_s1 = inlined_call_operand.vmem [shape: bf16[2,4,256], index: 1, kind: input, shape index: {}]   ;;  %s3378_s2 = inlined_call_operand.vmem [shape: bf16[8,4], index: 2, kind: input, shape index: {}]   ;;  %s3379_s3 = inlined_call_operand.vmem [shape: bf16[8,4], index: 3, kind: input, shape index: {}]   ;;  %s3380_s4 = inlined_call_operand.vmem [shape: f32[8,16], index: 4, kind: input, shape index: {}]   ;;  %s3381_s5 = inlined_call_operand.vmem [shape: f32[8,1], index: 5, kind: input, shape index: {}]   ;;  %s3382_s6 = inlined_call_operand.hbm [shape: f32[2,8,256], index: 6, kind: output, shape index: {}]  }
   0x1   :  { %13 = vsyncpa [#allocation3 + $0x1], 0  ;;  %s2932_s21 = smov 0   ;;  %s2934_s22 = smov 0  }
   0x2   :  { %s2936_s23 = smov 0   ;;  %s2938_s24 = smov 0  }
   0x3   :  { %s2940_s25 = smov 0   ;;  %s2942_s26 = smov 0  }
   0x4 LB: > { %s2414_s27 = sadd.s32 4294967295, %s2880_s26   ;;  %s2415_s28 = sadd.s32 4294967294, %s2880_s26   ;;  %s2880_s26 = sphi %s2942_s26, %s19_s26   ;;  %s2876_s25 = sphi %s2940_s25, %s3389_s25   ;;  %s2872_s24 = sphi %s2938_s24, %s3388_s24   ;;  %s2868_s23 = sphi %s2936_s23, %s3387_s23   ;;  %s2864_s22 = sphi %s2934_s22, %s3386_s22   ;;  %s2860_s21 = sphi %s2932_s21, %s3385_s21  }
   0x5   : > { %s31_s29 = sadd.s32 1, %s2876_s25  ;;  %s180_s30 = sadd.s32 1, %s2868_s23 }
   0x6   : > { %p33_p0 = scmp.ge.s32.totalorder %s31_s29, 2  ;;  %p190_p1 = scmp.ne.s32.totalorder %s2868_s23, %s2864_s22 }
   0x7   : > { %p191_p2 = scmp.eq.s32.totalorder %s2414_s27, 1  ;;  %p196_p3 = scmp.ne.s32.totalorder %s2864_s22, %s2860_s21 }
   0x8   : > { %s3391_s29 = smov (%p33_p0, %s31_s29), 0  ;;  %p197_p5 = scmp.eq.s32.totalorder %s2415_s28, 1 }
   0x9   : > { %p2972_p4 = por %p191_p2, %p190_p1  ;;  %s175_s8 = ssub.s32 %s2876_s25, %s3391_s29 }
   0xa   : > { %p2418_p6 = scmp.ge.s32.totalorder %s2880_s26, 1  ;;  %p178_p7 = scmp.eq.s32.totalorder %s175_s8, 0 }
   0xb   : > { %p2979_p8 = por %p197_p5, %p196_p3  ;;  %p250_p9 = scmp.lt.s32.totalorder %s2880_s26, 3 }
   0xc   : > { %s2985_s10 = scalar_select %p178_p7, %s2868_s23, %s180_s30  }
   0xd   : > { %p251_p10 = pnand %p2418_p6, %p250_p9 }
   0xe   : > { %p291_p11 = scmp.lt.s32.totalorder (!%p251_p10), %s2872_s24, 1  ;;  %v2882_v0 = vmov (!%p251_p10), 0.0   ;;  %vm2883_vm0 = vmmov (!%p251_p10), 0   ;;  %v2994_v1 = vld [vmem:[%s3380_s4] sm:$0xff] (!%p251_p10)  ;;  %vm319_vm1 = vcmask (!%p251_p10), 1041408   ;;  %s2884_s8 = smov (!%p251_p10), 112  }
   0xf   : > { %254 = sbr.rel (%p251_p10) target bundleno = 1959 (0x7a7), region = 44  ;;  %2547 = vmatprep.subr.bf16.mxu0 (!%p251_p10), %v2882_v0  ;;  %2549 = vmatprep.mubr.msk.bf16.mxu0 (!%p251_p10), %vm2883_vm0, %v2882_v0  ;;  %v3014_v5 = vld [vmem:[%s3378_s2] sm:$0xf] (!%p251_p10)  ;;  %s2885_s11 = smov (!%p251_p10), 120   ;;  %vm315_vm2 = vcmask (!%p251_p10), 31744   ;;  %v2888_v9 = vmov (!%p251_p10), 0  }
  0x10   : > { %2553 = vmatprep.subr.mxu1 (!%p251_p10), %v2882_v0  ;;  %2555 = vmatprep.mubr.msk.f32.mxu1 (!%p251_p10), %vm2883_vm0, %v2882_v0  ;;  %s2886_s12 = smov (!%p251_p10), 96   ;;  %v3033_v11 = vld [vmem:[%s3379_s3] sm:$0xf] (!%p251_p10)  ;;  %s2890_s17 = smov (!%p251_p10), 48   ;;  %vm363_vm3 = vcmask (!%p251_p10), 64512   ;;  %vm492_vm4 = vcmask (!%p251_p10), 130048  }
  0x11   : > { %2554 = vmatpush3.msra.mxu1 (!%p251_p10), %v2994_v1  ;;  %2800 = vset.pattern.permute.xlu1 (!%p251_p10), %v2888_v9  ;;  %s2892_s19 = smov (!%p251_p10), 32   ;;  %s2893_s20 = smov (!%p251_p10), 88   ;;  %v313_v13 = vld [vmem:[%s3381_s5] sm:$0xff] (!%p251_p10)  ;;  %vm555_vm5 = vcmask (!%p251_p10), 261248   ;;  %vm745_vm6 = vcmask (!%p251_p10), 392448   ;;  %vm808_vm7 = vcmask (!%p251_p10), 523648  }
  0x12   : > { %2558 = vmatprep.subr.bf16.mxu1 (!%p251_p10), %v2882_v0  ;;  %2801 = vset.pattern.permute.xlu0 (!%p251_p10), %v2888_v9  ;;  %s2894_s28 = smov (!%p251_p10), 16   ;;  %s2895_s30 = smov (!%p251_p10), 72   ;;  %vm998_vm8 = vcmask (!%p251_p10), 654848   ;;  %vm1061_vm9 = vcmask (!%p251_p10), 786048   ;;  %vm1251_vm10 = vcmask (!%p251_p10), 917248   ;;  %vm1314_vm11 = vcmask (!%p251_p10), 1048448  }
  0x13   : > { %s288_s16 = sand.u32 (!%p251_p10), 1, %s2864_s22  }
  0x16   : > { %s292_s13 = scalar_select %p291_p11, %s2872_s24, 1 }
  0x18   : > { %s2420_s14 = sshll.u32 %s292_s13, 1  ;;  %s2481_s15 = sshll.u32 %s292_s13, 2 }
  0x19   : > { %s297_s18 = scalar_lea.vmem %s3376_s0, %s2420_s14  ;;  %s3008_s27 = scalar_lea.vmem %s3377_s1, %s2481_s15 }
  0x1a   : > { %v314_v2 = vld [vmem:[%s297_s18] sm:$0x3]  ;;  %s2887_s13 = smov 64   ;;  %s2889_s14 = smov 80  }
  0x1b   : > { %v2435_v3 = vld.sshfl [vmem:[%s297_s18] sm:$0x3 pattern:$0x76325410]  ;;  %v321_v4 = vsel %vm319_vm1, %v314_v2, 0  ;;  %s2891_s18 = smov 104  }
  0x1c   : > { %819 = vrot.lane.b32.xlu1 %v2435_v3, %s2884_s8  ;;  %566 = vrot.lane.b32.xlu0 %v2435_v3, %s2885_s11  ;;  %v2426_v6 = vld.sshfl [vmem:[%s3008_s27] sm:$0x3 pattern:$0x76325410] }
  0x1d   : > { %2548 = vmatpush3.bf16.msra.mxu0 %v321_v4  ;;  %v2458_v12 = vld.sshfl [vmem:[%s3008_s27 + $0x2] sm:$0x3 pattern:$0x76325410]  ;;  %v437_v14 = vld [vmem:[%s3008_s27] sm:$0x3] }
  0x1e   : > { %2564 = vmatprep.subr.bf16.mxu0 %v2882_v0  ;;  %v442_v15 = vsel %vm319_vm1, %v437_v14, 0 }
  0x20   : > { %2550 = vmatmul.mubr.msk.bf16.vlgmr.msra.gmra.mrb[0].mxu0 %vm315_vm2, %v3014_v5  ;;  %503 = vrot.lane.b32.xlu1 %v2426_v6, %s2884_s8 }
  0x21   : > { %693 = vrot.lane.b32.xlu0 %v2426_v6, %s2886_s12  ;;  %2566 = vmatprep.mubr.msk.bf16.mxu0 %vm2883_vm0, %v2882_v0 }
  0x24   : > { %946 = vrot.lane.b32.xlu1 %v2426_v6, %s2887_s13 }
  0x25   : > { %756 = vrot.lane.b32.xlu0 %v2426_v6, %s2889_s14 }
  0x28   : > { %1009 = vrot.lane.b32.xlu1 %v2426_v6, %s2890_s17 }
  0x29   : > { %1072 = vrot.lane.b32.xlu0 %v2435_v3, %s2891_s18  ;;  %s2419_s18 = sshll.u32 %s288_s16, 4 }
  0x2c   : > { %1325 = vrot.lane.b32.xlu1 %v2435_v3, %s2886_s12 }
  0x2d   : > { %1199 = vrot.lane.b32.xlu0 %v2426_v6, %s2892_s19 }
  0x30   : > { %1562 = vrot.lane.b32.xlu1 %v2435_v3, %s2893_s20  ;;  %s3116_s20 = scalar_lea.vmem [#allocation2], %s2419_s18 }
  0x31   : > { %1262 = vrot.lane.b32.xlu0 %v2426_v6, %s2894_s28 }
  0x34   : > { %1689 = vrot.lane.b32.xlu1 %v2458_v12, %s2886_s12 }
  0x35   : > { %1500 = vrot.lane.b32.xlu0 %v2458_v12, %s2884_s8 }
  0x38   : > { %1751 = vrot.lane.b32.xlu1 %v2458_v12, %s2889_s14 }
  0x39   : > { %1813 = vrot.lane.b32.xlu0 %v2435_v3, %s2889_s14 }
  0x3c   : > { %2064 = vrot.lane.b32.xlu1 %v2435_v3, %s2895_s30 }
  0x3d   : > { %1940 = vrot.lane.b32.xlu0 %v2458_v12, %s2887_s13 }
  0x40   : > { %2191 = vrot.lane.b32.xlu1 %v2458_v12, %s2892_s19 }
  0x41   : > { %2002 = vrot.lane.b32.xlu0 %v2458_v12, %s2890_s17 }
  0x44   : > { %487 = vperm.xlu1 %2800, %v313_v13  }
  0x45   : > { %2253 = vrot.lane.b32.xlu0 %v2458_v12, %s2894_s28 }
  0x8e   : > { %v3025_v7 = vpop.permute.xlu1 %819  ;;  %v567_v17 = vpop.permute.xlu0 %566 }
  0x8f   : > { %v569_v20 = vsel %vm319_vm1, %v567_v17, 0  ;;  %v822_v24 = vsel %vm319_vm1, %v3025_v7, 0 }
  0x92   : > { %v504_v8 = vpop.permute.xlu1 %503 }
  0x93   : > { %v506_v10 = vsel %vm319_vm1, %v504_v8, 0  ;;  %v694_v22 = vpop.permute.xlu0 %693 }
  0x94   : > { %2565 = vmatpush3.bf16.msra.mxu0 %v506_v10  ;;  %v696_v23 = vsel %vm319_vm1, %v694_v22, 0 }
  0x95   : > { %2576 = vmatprep.subr.mxu0 %v2882_v0 }
  0x96   : > { %v947_v25 = vpop.permute.xlu1 %946 }
  0x97   : > { %2567 = vmatmul.mubr.msk.bf16.vlgmr.msra.gmra.mrb[4].mxu0 %vm315_vm2, %v3033_v11  ;;  %v757_v50 = vpop.permute.xlu0 %756  ;;  %v949_v61 = vsel %vm319_vm1, %v947_v25, 0 }
  0x98   : > { %2577 = vmatpush3.msra.mxu0 %v2994_v1  ;;  %2578 = vmatprep.mubr.msk.f32.mxu0 %vm2883_vm0, %v2882_v0  ;;  %v759_v52 = vsel %vm319_vm1, %v757_v50, 0 }
  0x99   : > { %2587 = vmatprep.subr.bf16.mxu0 %v2882_v0 }
  0x9a   : > { %v1010_v26 = vpop.permute.xlu1 %1009 }
  0x9b   : > { %v1012_v27 = vsel %vm319_vm1, %v1010_v26, 0  ;;  %v1073_v63 = vpop.permute.xlu0 %1072 }
  0x9c   : > { %v1075_v4 = vsel %vm319_vm1, %v1073_v63, 0 }
  0x9e   : > { %v3095_v32 = vpop.permute.xlu1 %1325 }
  0x9f   : > { %v1200_v7 = vpop.permute.xlu0 %1199 }
  0xa2   : > { %v3097_v33 = vpop.permute.xlu1 %1562 }
  0xa3   : > { %v1263_v8 = vpop.permute.xlu0 %1262 }
  0xa4   : > { %v1265_v9 = vsel %vm319_vm1, %v1263_v8, 0 }
  0xa6   : > { %v3099_v34 = vpop.permute.xlu1 %1689 }
  0xa7   : > { %v1501_v10 = vpop.permute.xlu0 %1500 }
  0xaa   : > { %v3101_v35 = vpop.permute.xlu1 %1751 }
  0xab   : > { %v3153_v12 = vpop.permute.xlu0 %1813 }
  0xae   : > { %v3103_v36 = vpop.permute.xlu1 %2064 }
  0xaf   : > { %v3155_v13 = vpop.permute.xlu0 %1940 }
  0xb2   : > { %v3105_v37 = vpop.permute.xlu1 %2191 }
  0xb3   : > { %v3157_v14 = vpop.permute.xlu0 %2002 }
  0xc3   : > { %v3107_v39 = vpop.permute.xlu1 %487 }
  0xf3   : > { %v357_v16 = vpop.f32.mrb[0].mxu0 }
  0xf4   : > { %v2551_v18 = vpop.f32.mrb[1].mxu0  ;;  %2556 = vmatmul.mubr.msk.f32.vlgmr.msra.gmra.mrb[0].mxu1 %vm363_vm3, %v357_v16 }
  0xf5   : > { %2559 = vmatpush3.bf16.msra.mxu1 %v442_v15  ;;  %v360_v19 = vpop.f32.mrb[2].mxu0  ;;  %2560 = vmatprep.mubr.msk.bf16.mxu1 %vm2883_vm0, %v2882_v0  ;;  %v3159_v18 = vpop.permute.xlu0 %2253 }
  0xf6   : > { %v2552_v21 = vpop.f32.mrb[3].mxu0  ;;  %2570 = vmatprep.subr.bf16.mxu1 %v2882_v0 }
  0xf8   : > { %2561 = vmatmul.mubr.msk.bf16.vlgmr.msra.gmra.mrb[4].mxu1 %vm315_vm2, %v3033_v11 }
  0xf9   : > { %2571 = vmatpush3.bf16.msra.mxu1 %v569_v20  ;;  %2572 = vmatprep.mubr.msk.bf16.mxu1 %vm2883_vm0, %v2882_v0 }
  0xfa   : > { %2581 = vmatprep.subr.bf16.mxu1 %v2882_v0 }
 0x100   : > { %2573 = vmatmul.mubr.msk.bf16.vlgmr.msra.gmra.mrb[8].mxu1 %vm315_vm2, %v3014_v5 }
 0x101   : > { %2582 = vmatpush3.bf16.msra.mxu1 %v696_v23  ;;  %2583 = vmatprep.mubr.msk.bf16.mxu1 %vm2883_vm0, %v2882_v0 }
 0x102   : > { %2593 = vmatprep.subr.bf16.mxu1 %v2882_v0 }
 0x108   : > { %2584 = vmatmul.mubr.msk.bf16.vlgmr.msra.gmra.mrb[12].mxu1 %vm315_vm2, %v3033_v11 }
 0x109   : > { %2594 = vmatpush3.bf16.msra.mxu1 %v822_v24  ;;  %2595 = vmatprep.mubr.msk.bf16.mxu1 %vm2883_vm0, %v2882_v0 }
 0x10a   : > { %2610 = vmatprep.subr.bf16.mxu1 %v2882_v0 }
 0x110   : > { %2596 = vmatmul.mubr.msk.bf16.vlgmr.msra.gmra.mrb[16].mxu1 %vm315_vm2, %v3014_v5 }
 0x111   : > { %2611 = vmatpush3.bf16.msra.mxu1 %v1012_v27  ;;  %2612 = vmatprep.mubr.msk.bf16.mxu1 %vm2883_vm0, %v2882_v0 }
 0x112   : > { %2622 = vmatprep.subr.mxu1 %v2882_v0 }
 0x118   : > { %2613 = vmatmul.mubr.msk.bf16.vlgmr.msra.gmra.mrb[20].mxu1 %vm315_vm2, %v3033_v11 }
 0x119   : > { %2623 = vmatpush3.msra.mxu1 %v2994_v1  ;;  %2624 = vmatprep.mubr.msk.f32.mxu1 %vm2883_vm0, %v2882_v0 }
 0x11a   : > { %2627 = vmatprep.subr.bf16.mxu1 %v2882_v0 }
 0x16a   : > { %v542_v28 = vpop.f32.mrb[4].mxu0 }
 0x16b   : > { %v2568_v29 = vpop.f32.mrb[5].mxu0 }
 0x16c   : > { %v545_v30 = vpop.f32.mrb[6].mxu0 }
 0x16d   : > { %v2569_v31 = vpop.f32.mrb[7].mxu0 }
 0x1c7   : > { %v433_v38 = vpop.f32.mrb[0].mxu1 }
 0x1c8   : > { %v548_v40 = vadd.f32 %v542_v28, %v433_v38  ;;  %v2557_v41 = vpop.f32.mrb[1].mxu1 }
 0x1ca   : > { %v549_v42 = vadd.f32 %v548_v40, %v3107_v39 }
 0x1cb   : > { %v478_v43 = vpop.f32.mrb[4].mxu1 }
 0x1cc   : > { %v484_v44 = vadd.f32 %v478_v43, %v433_v38  ;;  %v2562_v45 = vpop.f32.mrb[5].mxu1  ;;  %v550_v46 = vmax.f32 %v549_v42, 0.0 }
 0x1cd   : > { %v481_v47 = vpop.f32.mrb[6].mxu1 }
 0x1ce   : > { %v490_v48 = vadd.f32 %v3107_v39, %v484_v44  ;;  %v2563_v49 = vpop.f32.mrb[7].mxu1  ;;  %552 = vrot.lane.b32.xlu0 %v550_v46, %s2894_s28 }
 0x1d0   : > { %v491_v51 = vmax.f32 %v490_v48, 0.0 }
 0x1d2   : > { %493 = vst.msk [vmem:[%s3116_s20] sm:$0xff] %vm492_vm4, %v491_v51 }
 0x1d3   : > { %v605_v53 = vpop.f32.mrb[8].mxu1 }
 0x1d4   : > { %v2574_v54 = vpop.f32.mrb[9].mxu1  ;;  %2579 = vmatmul.mubr.msk.f32.vlgmr.msra.gmra.mrb[8].mxu0 %vm363_vm3, %v605_v53 }
 0x1d5   : > { %v608_v55 = vpop.f32.mrb[10].mxu1  ;;  %2588 = vmatpush3.bf16.msra.mxu0 %v759_v52  ;;  %2589 = vmatprep.mubr.msk.bf16.mxu0 %vm2883_vm0, %v2882_v0  ;;  %v1202_v52 = vsel %vm319_vm1, %v1200_v7, 0 }
 0x1d6   : > { %v2575_v56 = vpop.f32.mrb[11].mxu1  ;;  %2599 = vmatprep.subr.mxu0 %v2882_v0 }
 0x1d7   : > { %v1328_v56 = vsel %vm319_vm1, %v3095_v32, 0 }
 0x1d8   : > { %2590 = vmatmul.mubr.msk.bf16.vlgmr.msra.gmra.mrb[12].mxu0 %vm315_vm2, %v3033_v11 }
 0x1d9   : > { %2600 = vmatpush3.msra.mxu0 %v2994_v1  ;;  %2601 = vmatprep.mubr.msk.f32.mxu0 %vm2883_vm0, %v2882_v0 }
 0x1da   : > { %2604 = vmatprep.subr.bf16.mxu0 %v2882_v0 }
 0x1db   : > { %v732_v57 = vpop.f32.mrb[12].mxu1 }
 0x1dc   : > { %v2585_v58 = vpop.f32.mrb[13].mxu1 }
 0x1dd   : > { %v735_v59 = vpop.f32.mrb[14].mxu1  ;;  %v1503_v58 = vsel %vm319_vm1, %v1501_v10, 0 }
 0x1de   : > { %v2586_v60 = vpop.f32.mrb[15].mxu1 }
 0x1e3   : > { %v858_v62 = vpop.f32.mrb[16].mxu1 }
 0x1e4   : > { %v2597_v2 = vpop.f32.mrb[17].mxu1  ;;  %2602 = vmatmul.mubr.msk.f32.vlgmr.msra.gmra.mrb[10].mxu0 %vm363_vm3, %v858_v62 }
 0x1e5   : > { %2605 = vmatpush3.bf16.msra.mxu0 %v949_v61  ;;  %v861_v3 = vpop.f32.mrb[18].mxu1  ;;  %2606 = vmatprep.mubr.msk.bf16.mxu0 %vm2883_vm0, %v2882_v0 }
 0x1e6   : > { %v2598_v6 = vpop.f32.mrb[19].mxu1  ;;  %2616 = vmatprep.subr.bf16.mxu0 %v2882_v0 }
 0x1e8   : > { %2607 = vmatmul.mubr.msk.bf16.vlgmr.msra.gmra.mrb[16].mxu0 %vm315_vm2, %v3033_v11 }
 0x1e9   : > { %2617 = vmatpush3.bf16.msra.mxu0 %v1075_v4  ;;  %2618 = vmatprep.mubr.msk.bf16.mxu0 %vm2883_vm0, %v2882_v0 }
 0x1ea   : > { %2633 = vmatprep.subr.bf16.mxu0 %v2882_v0 }
 0x1eb   : > { %v1048_v15 = vpop.f32.mrb[20].mxu1 }
 0x1ec   : > { %v2614_v16 = vpop.f32.mrb[21].mxu1 }
 0x1ed   : > { %v1051_v17 = vpop.f32.mrb[22].mxu1 }
 0x1ee   : > { %v2615_v19 = vpop.f32.mrb[23].mxu1 }
 0x1ef   : > { %v1443_v19 = vld [vmem:[%s3008_s27 + $0x2] sm:$0x3]  ;;  %s2482_s27 = sshll.u32 %s2872_s24, 8  ;;  %s2896_s24 = smov [#allocation2]  }
 0x1f0   : > { %2619 = vmatmul.mubr.msk.bf16.vlgmr.msra.gmra.mrb[20].mxu0 %vm315_vm2, %v3014_v5 }
 0x1f1   : > { %2634 = vmatpush3.bf16.msra.mxu0 %v1265_v9  ;;  %2635 = vmatprep.mubr.msk.bf16.mxu0 %vm2883_vm0, %v2882_v0 }
 0x1f2   : > { %2645 = vmatprep.subr.mxu0 %v2882_v0 }
 0x1f8   : > { %2636 = vmatmul.mubr.msk.bf16.vlgmr.msra.gmra.mrb[24].mxu0 %vm315_vm2, %v3033_v11 }
 0x1f9   : > { %2646 = vmatpush3.msra.mxu0 %v2994_v1  ;;  %2647 = vmatprep.mubr.msk.f32.mxu0 %vm2883_vm0, %v2882_v0 }
 0x1fa   : > { %2650 = vmatprep.subr.bf16.mxu0 %v2882_v0 }
 0x240   : > { %v553_v20 = vpop.permute.xlu0 %552 }
 0x241   : > { %556 = vst.msk [vmem:[%s3116_s20] sm:$0xff] %vm555_vm5, %v553_v20 }
 0x2a7   : > { %v680_v21 = vpop.f32.mrb[8].mxu0 }
 0x2a8   : > { %v738_v22 = vadd.f32 %v732_v57, %v680_v21  ;;  %v2580_v23 = vpop.f32.mrb[9].mxu0 }
 0x2aa   : > { %v739_v24 = vadd.f32 %v738_v22, %v3107_v39  ;;  %v1445_v22 = vsel %vm319_vm1, %v1443_v19, 0 }
 0x2ab   : > { %v795_v25 = vpop.f32.mrb[12].mxu0 }
 0x2ac   : > { %v801_v26 = vadd.f32 %v795_v25, %v680_v21  ;;  %v2591_v27 = vpop.f32.mrb[13].mxu0  ;;  %v740_v28 = vmax.f32 %v739_v24, 0.0 }
 0x2ad   : > { %v798_v29 = vpop.f32.mrb[14].mxu0  ;;  %v1565_v27 = vsel %vm319_vm1, %v3097_v33, 0 }
 0x2ae   : > { %v802_v30 = vadd.f32 %v801_v26, %v3107_v39  ;;  %742 = vrot.lane.b32.xlu0 %v740_v28, %s2892_s19  ;;  %v2592_v31 = vpop.f32.mrb[15].mxu0  ;;  %v1754_v29 = vsel %vm319_vm1, %v3101_v35, 0 }
 0x2b0   : > { %v803_v38 = vmax.f32 %v802_v30, 0.0 }
 0x2b2   : > { %805 = vrot.lane.b32.xlu0 %v803_v38, %s2890_s17 }
 0x2b7   : > { %v933_v40 = vpop.f32.mrb[10].mxu0 }
 0x2b8   : > { %v1054_v41 = vadd.f32 %v1048_v15, %v933_v40  ;;  %v2603_v42 = vpop.f32.mrb[11].mxu0 }
 0x2ba   : > { %v1055_v43 = vadd.f32 %v1054_v41, %v3107_v39 }
 0x2bb   : > { %v985_v44 = vpop.f32.mrb[16].mxu0 }
 0x2bc   : > { %v1056_v45 = vmax.f32 %v1055_v43, 0.0  ;;  %v991_v46 = vadd.f32 %v985_v44, %v933_v40  ;;  %v2608_v47 = vpop.f32.mrb[17].mxu0 }
 0x2bd   : > { %v988_v48 = vpop.f32.mrb[18].mxu0 }
 0x2be   : > { %v992_v49 = vadd.f32 %v991_v46, %v3107_v39  ;;  %1058 = vrot.lane.b32.xlu0 %v1056_v45, %s2889_s14  ;;  %v2609_v50 = vpop.f32.mrb[19].mxu0 }
 0x2c0   : > { %v993_v51 = vmax.f32 %v992_v49, 0.0 }
 0x2c2   : > { %995 = vrot.lane.b32.xlu0 %v993_v51, %s2887_s13 }
 0x2c3   : > { %v1111_v53 = vpop.f32.mrb[20].mxu0 }
 0x2c4   : > { %v2620_v54 = vpop.f32.mrb[21].mxu0  ;;  %2625 = vmatmul.mubr.msk.f32.vlgmr.msra.gmra.mrb[2].mxu1 %vm363_vm3, %v1111_v53  ;;  %v1692_v53 = vsel %vm319_vm1, %v3099_v34, 0  ;;  %v2005_v34 = vsel %vm319_vm1, %v3157_v14, 0 }
 0x2c5   : > { %2628 = vmatpush3.bf16.msra.mxu1 %v1202_v52  ;;  %v1114_v55 = vpop.f32.mrb[22].mxu0  ;;  %2629 = vmatprep.mubr.msk.bf16.mxu1 %vm2883_vm0, %v2882_v0 }
 0x2c6   : > { %v2621_v57 = vpop.f32.mrb[23].mxu0  ;;  %2639 = vmatprep.subr.bf16.mxu1 %v2882_v0 }
 0x2c7   : > { %v1816_v57 = vsel %vm319_vm1, %v3153_v12, 0 }
 0x2c8   : > { %2630 = vmatmul.mubr.msk.bf16.vlgmr.msra.gmra.mrb[24].mxu1 %vm315_vm2, %v3033_v11 }
 0x2c9   : > { %2640 = vmatpush3.bf16.msra.mxu1 %v1328_v56  ;;  %2641 = vmatprep.mubr.msk.bf16.mxu1 %vm2883_vm0, %v2882_v0 }
 0x2ca   : > { %2656 = vmatprep.subr.bf16.mxu1 %v2882_v0 }
 0x2cb   : > { %v1301_v32 = vpop.f32.mrb[24].mxu0 }
 0x2cc   : > { %v2637_v59 = vpop.f32.mrb[25].mxu0 }
 0x2cd   : > { %v1304_v60 = vpop.f32.mrb[26].mxu0 }
 0x2ce   : > { %v2638_v61 = vpop.f32.mrb[27].mxu0 }
 0x2d0   : > { %2642 = vmatmul.mubr.msk.bf16.vlgmr.msra.gmra.mrb[28].mxu1 %vm315_vm2, %v3014_v5 }
 0x2d1   : > { %2657 = vmatpush3.bf16.msra.mxu1 %v1503_v58  ;;  %2658 = vmatprep.mubr.msk.bf16.mxu1 %vm2883_vm0, %v2882_v0 }
 0x2d2   : > { %2668 = vmatprep.subr.mxu1 %v2882_v0 }
 0x2d8   : > { %2659 = vmatmul.mubr.msk.bf16.vlgmr.msra.gmra.mrb[32].mxu1 %vm315_vm2, %v3033_v11 }
 0x2d9   : > { %2669 = vmatpush3.msra.mxu1 %v2994_v1  ;;  %2670 = vmatprep.mubr.msk.f32.mxu1 %vm2883_vm0, %v2882_v0 }
 0x2da   : > { %2673 = vmatprep.subr.bf16.mxu1 %v2882_v0 }
 0x320   : > { %v743_v62 = vpop.permute.xlu0 %742 }
 0x321   : > { %746 = vst.msk [vmem:[%s3116_s20] sm:$0xff] %vm745_vm6, %v743_v62 }
 0x324   : > { %v806_v63 = vpop.permute.xlu0 %805 }
 0x325   : > { %809 = vst.msk [vmem:[%s3116_s20] sm:$0xff] %vm808_vm7, %v806_v63 }
 0x330   : > { %v1059_v2 = vpop.permute.xlu0 %1058 }
 0x334   : > { %v996_v3 = vpop.permute.xlu0 %995 }
 0x335   : > { %999 = vst.msk [vmem:[%s3116_s20] sm:$0xff] %vm998_vm8, %v996_v3 }
 0x336   : > { %1062 = vst.msk [vmem:[%s3116_s20] sm:$0xff] %vm1061_vm9, %v1059_v2 }
 0x397   : > { %v1186_v4 = vpop.f32.mrb[2].mxu1 }
 0x398   : > { %v1307_v6 = vadd.f32 %v1301_v32, %v1186_v4  ;;  %v2626_v7 = vpop.f32.mrb[3].mxu1 }
 0x39a   : > { %v1308_v20 = vadd.f32 %v1307_v6, %v3107_v39 }
 0x39b   : > { %v1238_v8 = vpop.f32.mrb[24].mxu1 }
 0x39c   : > { %v1244_v9 = vadd.f32 %v1238_v8, %v1186_v4  ;;  %v2631_v10 = vpop.f32.mrb[25].mxu1  ;;  %v1309_v24 = vmax.f32 %v1308_v20, 0.0  ;;  %v2067_v20 = vsel %vm319_vm1, %v3103_v36, 0 }
 0x39d   : > { %v1241_v15 = vpop.f32.mrb[26].mxu1 }
 0x39e   : > { %v1245_v16 = vadd.f32 %v1244_v9, %v3107_v39  ;;  %v2632_v17 = vpop.f32.mrb[27].mxu1  ;;  %v1943_v15 = vsel %vm319_vm1, %v3155_v13, 0  ;;  %v2256_v13 = vsel %vm319_vm1, %v3159_v18, 0 }
 0x3a0   : > { %v1246_v21 = vmax.f32 %v1245_v16, 0.0 }
 0x3a2   : > { %1248 = vrot.lane.b32.xlu0 %v1246_v21, %s2886_s12 }
 0x3a3   : > { %v1364_v23 = vpop.f32.mrb[28].mxu1 }
 0x3a4   : > { %v2643_v25 = vpop.f32.mrb[29].mxu1  ;;  %2648 = vmatmul.mubr.msk.f32.vlgmr.msra.gmra.mrb[28].mxu0 %vm363_vm3, %v1364_v23 }
 0x3a5   : > { %2651 = vmatpush3.bf16.msra.mxu0 %v1445_v22  ;;  %v1367_v26 = vpop.f32.mrb[30].mxu1  ;;  %2652 = vmatprep.mubr.msk.bf16.mxu0 %vm2883_vm0, %v2882_v0 }
 0x3a6   : > { %v2644_v28 = vpop.f32.mrb[31].mxu1  ;;  %1311 = vrot.lane.b32.xlu0 %v1309_v24, %s2884_s8  ;;  %2662 = vmatprep.subr.bf16.mxu0 %v2882_v0 }
 0x3a8   : > { %2653 = vmatmul.mubr.msk.bf16.vlgmr.msra.gmra.mrb[32].mxu0 %vm315_vm2, %v3033_v11 }
 0x3a9   : > { %2663 = vmatpush3.bf16.msra.mxu0 %v1565_v27  ;;  %2664 = vmatprep.mubr.msk.bf16.mxu0 %vm2883_vm0, %v2882_v0 }
 0x3aa   : > { %2679 = vmatprep.subr.bf16.mxu0 %v2882_v0 }
 0x3ab   : > { %v1539_v33 = vpop.f32.mrb[32].mxu1 }
 0x3ac   : > { %v2660_v35 = vpop.f32.mrb[33].mxu1 }
 0x3ad   : > { %v1542_v30 = vpop.f32.mrb[34].mxu1 }
 0x3ae   : > { %v2661_v31 = vpop.f32.mrb[35].mxu1 }
 0x3b0   : > { %2665 = vmatmul.mubr.msk.bf16.vlgmr.msra.gmra.mrb[36].mxu0 %vm315_vm2, %v3014_v5 }
 0x3b1   : > { %2680 = vmatpush3.bf16.msra.mxu0 %v1754_v29  ;;  %2681 = vmatprep.mubr.msk.bf16.mxu0 %vm2883_vm0, %v2882_v0 }
 0x3b2   : > { %2691 = vmatprep.subr.mxu0 %v2882_v0 }
 0x3b8   : > { %2682 = vmatmul.mubr.msk.bf16.vlgmr.msra.gmra.mrb[40].mxu0 %vm315_vm2, %v3033_v11 }
 0x3b9   : > { %2692 = vmatpush3.msra.mxu0 %v2994_v1  ;;  %2693 = vmatprep.mubr.msk.f32.mxu0 %vm2883_vm0, %v2882_v0 }
 0x3ba   : > { %2696 = vmatprep.subr.bf16.mxu0 %v2882_v0 }
 0x414   : > { %v1249_v38 = vpop.permute.xlu0 %1248 }
 0x415   : > { %1252 = vst.msk [vmem:[%s3116_s20] sm:$0xff] %vm1251_vm10, %v1249_v38 }
 0x418   : > { %v1312_v40 = vpop.permute.xlu0 %1311 }
 0x419   : > { %1315 = vst.msk [vmem:[%s3116_s20] sm:$0xff] %vm1314_vm11, %v1312_v40 }
 0x477   : > { %v1439_v41 = vpop.f32.mrb[28].mxu0 }
 0x478   : > { %v1545_v42 = vadd.f32 %v1539_v33, %v1439_v41  ;;  %v2649_v43 = vpop.f32.mrb[29].mxu0 }
 0x47a   : > { %v1546_v44 = vadd.f32 %v1545_v42, %v3107_v39  ;;  %v2194_v42 = vsel %vm319_vm1, %v3105_v37, 0 }
 0x47b   : > { %v1481_v45 = vpop.f32.mrb[32].mxu0 }
 0x47c   : > { %v1547_v46 = vmax.f32 %v1546_v44, 0.0  ;;  %v1487_v47 = vadd.f32 %v1481_v45, %v1439_v41  ;;  %v2654_v48 = vpop.f32.mrb[33].mxu0 }
 0x47d   : > { %v1484_v49 = vpop.f32.mrb[34].mxu0 }
 0x47e   : > { %v1488_v50 = vadd.f32 %v1487_v47, %v3107_v39  ;;  %1549 = vrot.lane.b32.xlu1 %v1547_v46, %s2894_s28  ;;  %v2655_v51 = vpop.f32.mrb[35].mxu0  ;;  %s2806_s28 = sshll.u32 %s2896_s24, 4  ;;  %s2807_s28 = int_to_ptr.vmem [resolvable:$false] %s2806_s28 }
 0x47f   : > { %s2808_s30 = scalar_lea.vmem %s2807_s28, 512 }
 0x480   : > { %v1489_v52 = vmax.f32 %v1488_v50, 0.0 }
 0x482   : > { %1490 = vst.msk [vmem:[%s3116_s20 + $0x8] sm:$0xff] %vm492_vm4, %v1489_v52 }
 0x483   : > { %v1601_v54 = vpop.f32.mrb[36].mxu0 }
 0x484   : > { %v2666_v55 = vpop.f32.mrb[37].mxu0  ;;  %2671 = vmatmul.mubr.msk.f32.vlgmr.msra.gmra.mrb[36].mxu1 %vm363_vm3, %v1601_v54 }
 0x485   : > { %2674 = vmatpush3.bf16.msra.mxu1 %v1692_v53  ;;  %v1604_v56 = vpop.f32.mrb[38].mxu0  ;;  %2675 = vmatprep.mubr.msk.bf16.mxu1 %vm2883_vm0, %v2882_v0 }
 0x486   : > { %v2667_v58 = vpop.f32.mrb[39].mxu0  ;;  %2685 = vmatprep.subr.bf16.mxu1 %v2882_v0 }
 0x488   : > { %2676 = vmatmul.mubr.msk.bf16.vlgmr.msra.gmra.mrb[40].mxu1 %vm315_vm2, %v3033_v11 }
 0x489   : > { %2686 = vmatpush3.bf16.msra.mxu1 %v1816_v57  ;;  %2687 = vmatprep.mubr.msk.bf16.mxu1 %vm2883_vm0, %v2882_v0 }
 0x48a   : > { %2702 = vmatprep.subr.bf16.mxu1 %v2882_v0 }
 0x48b   : > { %v1790_v12 = vpop.f32.mrb[40].mxu0 }
 0x48c   : > { %v2683_v14 = vpop.f32.mrb[41].mxu0 }
 0x48d   : > { %v1793_v32 = vpop.f32.mrb[42].mxu0 }
 0x48e   : > { %v2684_v59 = vpop.f32.mrb[43].mxu0 }
 0x490   : > { %2688 = vmatmul.mubr.msk.bf16.vlgmr.msra.gmra.mrb[44].mxu1 %vm315_vm2, %v3014_v5 }
 0x491   : > { %2703 = vmatpush3.bf16.msra.mxu1 %v2005_v34  ;;  %2704 = vmatprep.mubr.msk.bf16.mxu1 %vm2883_vm0, %v2882_v0 }
 0x492   : > { %2714 = vmatprep.subr.mxu1 %v2882_v0 }
 0x498   : > { %2705 = vmatmul.mubr.msk.bf16.vlgmr.msra.gmra.mrb[48].mxu1 %vm315_vm2, %v3033_v11 }
 0x499   : > { %2715 = vmatpush3.msra.mxu1 %v2994_v1  ;;  %2716 = vmatprep.mubr.msk.f32.mxu1 %vm2883_vm0, %v2882_v0 }
 0x49a   : > { %2719 = vmatprep.subr.bf16.mxu1 %v2882_v0 }
 0x4f0   : > { %v1550_v60 = vpop.permute.xlu1 %1549 }
 0x4f1   : > { %1552 = vst.msk [vmem:[%s3116_s20 + $0x8] sm:$0xff] %vm555_vm5, %v1550_v60 }
 0x557   : > { %v1676_v61 = vpop.f32.mrb[36].mxu1 }
 0x558   : > { %v1796_v62 = vadd.f32 %v1790_v12, %v1676_v61  ;;  %v2672_v63 = vpop.f32.mrb[37].mxu1 }
 0x55a   : > { %v1797_v2 = vadd.f32 %v1796_v62, %v3107_v39 }
 0x55b   : > { %v1728_v3 = vpop.f32.mrb[40].mxu1 }
 0x55c   : > { %v1798_v4 = vmax.f32 %v1797_v2, 0.0  ;;  %v1734_v1 = vadd.f32 %v1728_v3, %v1676_v61  ;;  %v2677_v6 = vpop.f32.mrb[41].mxu1 }
 0x55d   : > { %v1731_v7 = vpop.f32.mrb[42].mxu1 }
 0x55e   : > { %v1735_v8 = vadd.f32 %v1734_v1, %v3107_v39  ;;  %v2678_v9 = vpop.f32.mrb[43].mxu1  ;;  %1800 = vrot.lane.b32.xlu1 %v1798_v4, %s2890_s17 }
 0x560   : > { %v1736_v10 = vmax.f32 %v1735_v8, 0.0 }
 0x562   : > { %1738 = vrot.lane.b32.xlu1 %v1736_v10, %s2892_s19  ;;  %s3325_s19 = scalar_lea.hbm %s3382_s6, %s2482_s27 }
 0x563   : > { %v1852_v16 = vpop.f32.mrb[44].mxu1 }
 0x564   : > { %v2689_v17 = vpop.f32.mrb[45].mxu1  ;;  %2694 = vmatmul.mubr.msk.f32.vlgmr.msra.gmra.mrb[30].mxu0 %vm363_vm3, %v1852_v16 }
 0x565   : > { %2697 = vmatpush3.bf16.msra.mxu0 %v1943_v15  ;;  %v1855_v19 = vpop.f32.mrb[46].mxu1  ;;  %2698 = vmatprep.mubr.msk.bf16.mxu0 %vm2883_vm0, %v2882_v0 }
 0x566   : > { %v2690_v21 = vpop.f32.mrb[47].mxu1  ;;  %2708 = vmatprep.subr.bf16.mxu0 %v2882_v0 }
 0x568   : > { %2699 = vmatmul.mubr.msk.bf16.vlgmr.msra.gmra.mrb[44].mxu0 %vm315_vm2, %v3033_v11 }
 0x569   : > { %2709 = vmatpush3.bf16.msra.mxu0 %v2067_v20  ;;  %2710 = vmatprep.mubr.msk.bf16.mxu0 %vm2883_vm0, %v2882_v0 }
 0x56a   : > { %2725 = vmatprep.subr.bf16.mxu0 %v2882_v0 }
 0x56b   : > { %v2041_v36 = vpop.f32.mrb[48].mxu1 }
 0x56c   : > { %v2706_v22 = vpop.f32.mrb[49].mxu1 }
 0x56d   : > { %v2044_v23 = vpop.f32.mrb[50].mxu1 }
 0x56e   : > { %v2707_v24 = vpop.f32.mrb[51].mxu1 }
 0x570   : > { %2711 = vmatmul.mubr.msk.bf16.vlgmr.msra.gmra.mrb[48].mxu0 %vm315_vm2, %v3014_v5 }
 0x571   : > { %2726 = vmatpush3.bf16.msra.mxu0 %v2256_v13  ;;  %2727 = vmatprep.mubr.msk.bf16.mxu0 %vm2883_vm0, %v2882_v0 }
 0x578   : > { %2728 = vmatmul.mubr.msk.bf16.vlgmr.msra.gmra.mrb[52].mxu0 %vm315_vm2, %v3033_v11 }
 0x5d0   : > { %v1801_v25 = vpop.permute.xlu1 %1800 }
 0x5d4   : > { %v1739_v26 = vpop.permute.xlu1 %1738 }
 0x5d5   : > { %1741 = vst.msk [vmem:[%s3116_s20 + $0x8] sm:$0xff] %vm745_vm6, %v1739_v26 }
 0x5d6   : > { %1803 = vst.msk [vmem:[%s3116_s20 + $0x8] sm:$0xff] %vm808_vm7, %v1801_v25 }
 0x637   : > { %v1927_v18 = vpop.f32.mrb[30].mxu0 }
 0x638   : > { %v2047_v27 = vadd.f32 %v2041_v36, %v1927_v18  ;;  %v2695_v5 = vpop.f32.mrb[31].mxu0 }
 0x63a   : > { %v2048_v28 = vadd.f32 %v2047_v27, %v3107_v39 }
 0x63b   : > { %v1979_v29 = vpop.f32.mrb[44].mxu0 }
 0x63c   : > { %v2049_v33 = vmax.f32 %v2048_v28, 0.0  ;;  %v1985_v35 = vadd.f32 %v1979_v29, %v1927_v18  ;;  %v2700_v30 = vpop.f32.mrb[45].mxu0 }
 0x63d   : > { %v1982_v31 = vpop.f32.mrb[46].mxu0 }
 0x63e   : > { %v1986_v38 = vadd.f32 %v1985_v35, %v3107_v39  ;;  %2051 = vrot.lane.b32.xlu1 %v2049_v33, %s2889_s14  ;;  %v2701_v40 = vpop.f32.mrb[47].mxu0 }
 0x640   : > { %v1987_v41 = vmax.f32 %v1986_v38, 0.0 }
 0x642   : > { %1989 = vrot.lane.b32.xlu1 %v1987_v41, %s2887_s13  ;;  %s2323_s13 = sshll.u32 %s3116_s20, 4  ;;  %s3327_s13 = int_to_ptr.vmem [resolvable:$true] %s2323_s13 }
 0x643   : > { %v2103_v43 = vpop.f32.mrb[48].mxu0  ;;  %p2809_p1 = scmp.lt.s32.totalorder %s3327_s13, %s2807_s28 }
 0x644   : > { %v2712_v44 = vpop.f32.mrb[49].mxu0  ;;  %2717 = vmatmul.mubr.msk.f32.vlgmr.msra.gmra.mrb[38].mxu1 %vm363_vm3, %v2103_v43 }
 0x645   : > { %2720 = vmatpush3.bf16.msra.mxu1 %v2194_v42  ;;  %v2106_v45 = vpop.f32.mrb[50].mxu0  ;;  %2721 = vmatprep.mubr.msk.bf16.mxu1 %vm2883_vm0, %v2882_v0 }
 0x646   : > { %v2713_v46 = vpop.f32.mrb[51].mxu0 }
 0x648   : > { %2722 = vmatmul.mubr.msk.bf16.vlgmr.msra.gmra.mrb[52].mxu1 %vm315_vm2, %v3033_v11 }
 0x64b   : > { %v2292_v47 = vpop.f32.mrb[52].mxu0 }
 0x64c   : > { %v2729_v48 = vpop.f32.mrb[53].mxu0 }
 0x64d   : > { %v2295_v37 = vpop.f32.mrb[54].mxu0 }
 0x64e   : > { %v2730_v49 = vpop.f32.mrb[55].mxu0 }
 0x6b0   : > { %v2052_v50 = vpop.permute.xlu1 %2051 }
 0x6b4   : > { %v1990_v51 = vpop.permute.xlu1 %1989 }
 0x6b5   : > { %1992 = vst.msk [vmem:[%s3116_s20 + $0x8] sm:$0xff] %vm998_vm8, %v1990_v51 }
 0x6b6   : > { %2054 = vst.msk [vmem:[%s3116_s20 + $0x8] sm:$0xff] %vm1061_vm9, %v2052_v50 }
 0x717   : > { %v2178_v52 = vpop.f32.mrb[38].mxu1 }
 0x718   : > { %v2298_v53 = vadd.f32 %v2292_v47, %v2178_v52  ;;  %v2718_v0 = vpop.f32.mrb[39].mxu1 }
 0x71a   : > { %v2299_v34 = vadd.f32 %v2298_v53, %v3107_v39 }
 0x71b   : > { %v2230_v54 = vpop.f32.mrb[52].mxu1 }
 0x71c   : > { %v2236_v55 = vadd.f32 %v2230_v54, %v2178_v52  ;;  %v2723_v56 = vpop.f32.mrb[53].mxu1  ;;  %v2300_v14 = vmax.f32 %v2299_v34, 0.0 }
 0x71d   : > { %v2233_v11 = vpop.f32.mrb[54].mxu1 }
 0x71e   : > { %v2237_v57 = vadd.f32 %v2236_v55, %v3107_v39  ;;  %v2724_v58 = vpop.f32.mrb[55].mxu1 }
 0x720   : > { %v2238_v12 = vmax.f32 %v2237_v57, 0.0 }
 0x722   : > { %2240 = vrot.lane.b32.xlu1 %v2238_v12, %s2886_s12  ;;  %s2802_s12 = scalar_lea.vmem %s3327_s13, 256 }
 0x723   : > { %p2803_p12 = scmp.ne.s32.totalorder %s3327_s13, %s2802_s12  ;;  %p2810_p2 = scmp.lt.s32.totalorder %s2808_s30, %s2802_s12 }
 0x725   : > { %p2804_p13 = pnand %p2803_p12, %p2972_p4  ;;  %p2811_p3 = por %p2810_p2, %p2809_p1 }
 0x726   : > { %2302 = vrot.lane.b32.xlu1 %v2300_v14, %s2884_s8  ;;  %s2307_s8 = scalar_lea.sflag [#allocation3], %s288_s16 }
 0x727   : > { %p2805_p0 = pneg %p2804_p13 }
 0x729   : > { %p2812_p5 = pnand %p2811_p3, %p2805_p0 }
 0x794   : > { %v2241_v32 = vpop.permute.xlu1 %2240 }
 0x795   : > { %2243 = vst.msk [vmem:[%s3116_s20 + $0x8] sm:$0xff] %vm1251_vm10, %v2241_v32 }
 0x798   : > { %v2303_v39 = vpop.permute.xlu1 %2302 }
 0x799   : > { %2305 = vst.msk [vmem:[%s3116_s20 + $0x8] sm:$0xff] %vm1314_vm11, %v2303_v39 }
 0x79a   : > { %2815 = shalt.err (!%p2812_p5)
}
 0x79b   : > { %s2816_s11 = scalar_lea.hbm %s3325_s19, 256  ;;  %s2820_s18 = scalar_lea.hbm %s3382_s6, 512 }
 0x79c   : > { %p2817_p6 = scmp.ne.s32.totalorder %s3325_s19, %s2816_s11  ;;  %p2821_p10 = scmp.lt.u32.totalorder %s3325_s19, %s3382_s6 }
 0x79d   : > { %p2822_p11 = scmp.lt.u32.totalorder %s2820_s18, %s2816_s11  ;;  %p2824_p13 = scmp.lt.u32.totalorder %s2816_s11, %s3325_s19 }
 0x79e   : > { %p2818_p7 = pnand %p2817_p6, %p2972_p4 }
 0x79f   : > { %p2823_p12 = por %p2822_p11, %p2821_p10 }
 0x7a0   : > { %p2819_p9 = pneg %p2818_p7 }
 0x7a1   : > { %p2825_p0 = por %p2824_p13, %p2823_p12 }
 0x7a3   : > { %p2826_p1 = pnand %p2825_p0, %p2819_p9 }
 0x7a5   : > { %2829 = shalt.err (!%p2826_p1)
}
 0x7a6   : > { %2731 = dma.vmem_to_hbm [thread:$0]  (%p2972_p4), %s3327_s13, 256, %s3325_s19, %s2307_s8  }
 0x7a7 PF: > { %p2737_p2 = scmp.ge.s32.totalorder %s2880_s26, 2  ;;  %s2335_s14 = sand.u32 1, %s2860_s21  }
 0x7a8   : > { %s2336_s17 = scalar_lea.sflag [#allocation3], %s2335_s14 }
 0x7a9   : > { %p2734_p3 = pnand %p2737_p2, %p2979_p8 }
 0x7ab   : > { %2855 = dma.done.wait (!%p2734_p3), %s2336_s17, 256  }
 0x7ac   : > { %2857 = vsyncadd (!%p2734_p3), %s2336_s17, 4294967040  ;;  %s19_s26 = sadd.s32 1, %s2880_s26   ;;  %s3385_s21 = smov %s2864_s22 }
 0x7ad   : > { %p16_p5 = scmp.ge.s32.totalorder %s19_s26, 4   ;;  %s3386_s22 = smov %s2868_s23 }
 0x7ae   : > { %s3387_s23 = smov %s2985_s10  ;;  %s3388_s24 = smov %s2876_s25 }
 0x7af   : > { %s3389_s25 = smov %s3391_s29  ;;  %18 = sbr.rel (!%p16_p5) target bundleno = 4 (0x4), region = 82 }
 0x7b6   :  { %2341 = vsyncpa [#allocation3], 1 }
 0x7b7   :  { %2343 = vsyncpa [#allocation3 + $0x1], 1 }

// kernel: tpu_custom_call.1
= control target key start
LH: loop header
LB: loop body
LE: loop exit
PB: predicated region body
PF: predicated region fallthrough
CT: control target
= control target key end

     0   :  { %11 = vsyncpa [#allocation3], 0  ;;  %s3376_s0 = inlined_call_operand.vmem [shape: bf16[2,4,64], index: 0, kind: input, shape index: {}]   ;;  %s3377_s1 = inlined_call_operand.vmem [shape: bf16[2,4,256], index: 1, kind: input, shape index: {}]   ;;  %s3378_s2 = inlined_call_operand.vmem [shape: bf16[8,4], index: 2, kind: input, shape index: {}]   ;;  %s3379_s3 = inlined_call_operand.vmem [shape: bf16[8,4], index: 3, kind: input, shape index: {}]   ;;  %s3380_s4 = inlined_call_operand.vmem [shape: f32[8,16], index: 4, kind: input, shape index: {}]   ;;  %s3381_s5 = inlined_call_operand.vmem [shape: f32[8,1], index: 5, kind: input, shape index: {}]   ;;  %s3382_s6 = inlined_call_operand.hbm [shape: f32[2,8,256], index: 6, kind: output, shape index: {}]  }
   0x1   :  { %13 = vsyncpa [#allocation3 + $0x1], 0  ;;  %s2932_s21 = smov 0   ;;  %s2934_s22 = smov 0  }
   0x2   :  { %s2936_s23 = smov 0   ;;  %s2938_s24 = smov 0  }
   0x3   :  { %s2940_s25 = smov 0   ;;  %s2942_s26 = smov 0  }
   0x4 LB: > { %s2414_s27 = sadd.s32 4294967295, %s2880_s26   ;;  %s2415_s28 = sadd.s32 4294967294, %s2880_s26   ;;  %s2880_s26 = sphi %s2942_s26, %s19_s26   ;;  %s2876_s25 = sphi %s2940_s25, %s3389_s25   ;;  %s2872_s24 = sphi %s2938_s24, %s3388_s24   ;;  %s2868_s23 = sphi %s2936_s23, %s3387_s23   ;;  %s2864_s22 = sphi %s2934_s22, %s3386_s22   ;;  %s2860_s21 = sphi %s2932_s21, %s3385_s21  }
   0x5   : > { %s31_s29 = sadd.s32 1, %s2876_s25  ;;  %s180_s30 = sadd.s32 1, %s2868_s23 }
   0x6   : > { %p33_p0 = scmp.ge.s32.totalorder %s31_s29, 2  ;;  %p190_p1 = scmp.ne.s32.totalorder %s2868_s23, %s2864_s22 }
   0x7   : > { %p191_p2 = scmp.eq.s32.totalorder %s2414_s27, 1  ;;  %p196_p3 = scmp.ne.s32.totalorder %s2864_s22, %s2860_s21 }
   0x8   : > { %s3391_s29 = smov (%p33_p0, %s31_s29), 0  ;;  %p197_p5 = scmp.eq.s32.totalorder %s2415_s28, 1 }
   0x9   : > { %p2972_p4 = por %p191_p2, %p190_p1  ;;  %s175_s8 = ssub.s32 %s2876_s25, %s3391_s29 }
   0xa   : > { %p2418_p6 = scmp.ge.s32.totalorder %s2880_s26, 1  ;;  %p178_p7 = scmp.eq.s32.totalorder %s175_s8, 0 }
   0xb   : > { %p2979_p8 = por %p197_p5, %p196_p3  ;;  %p250_p9 = scmp.lt.s32.totalorder %s2880_s26, 3 }
   0xc   : > { %s2985_s10 = scalar_select %p178_p7, %s2868_s23, %s180_s30  }
   0xd   : > { %p251_p10 = pnand %p2418_p6, %p250_p9 }
   0xe   : > { %p291_p11 = scmp.lt.s32.totalorder (!%p251_p10), %s2872_s24, 1  ;;  %v2882_v0 = vmov (!%p251_p10), 0.0   ;;  %vm2883_vm0 = vmmov (!%p251_p10), 0   ;;  %v2994_v1 = vld [vmem:[%s3380_s4] sm:$0xff] (!%p251_p10)  ;;  %vm319_vm1 = vcmask (!%p251_p10), 1041408   ;;  %s2884_s8 = smov (!%p251_p10), 112  }
   0xf   : > { %254 = sbr.rel (%p251_p10) target bundleno = 1959 (0x7a7), region = 44  ;;  %2547 = vmatprep.subr.bf16.mxu0 (!%p251_p10), %v2882_v0  ;;  %2549 = vmatprep.mubr.msk.bf16.mxu0 (!%p251_p10), %vm2883_vm0, %v2882_v0  ;;  %v3014_v5 = vld [vmem:[%s3378_s2] sm:$0xf] (!%p251_p10)  ;;  %s2885_s11 = smov (!%p251_p10), 120   ;;  %vm315_vm2 = vcmask (!%p251_p10), 31744   ;;  %v2888_v9 = vmov (!%p251_p10), 0  }
  0x10   : > { %2553 = vmatprep.subr.mxu1 (!%p251_p10), %v2882_v0  ;;  %2555 = vmatprep.mubr.msk.f32.mxu1 (!%p251_p10), %vm2883_vm0, %v2882_v0  ;;  %s2886_s12 = smov (!%p251_p10), 96   ;;  %v3033_v11 = vld [vmem:[%s3379_s3] sm:$0xf] (!%p251_p10)  ;;  %s2890_s17 = smov (!%p251_p10), 48   ;;  %vm363_vm3 = vcmask (!%p251_p10), 64512   ;;  %vm492_vm4 = vcmask (!%p251_p10), 130048  }
  0x11   : > { %2554 = vmatpush3.msra.mxu1 (!%p251_p10), %v2994_v1  ;;  %2800 = vset.pattern.permute.xlu1 (!%p251_p10), %v2888_v9  ;;  %s2892_s19 = smov (!%p251_p10), 32   ;;  %s2893_s20 = smov (!%p251_p10), 88   ;;  %v313_v13 = vld [vmem:[%s3381_s5] sm:$0xff] (!%p251_p10)  ;;  %vm555_vm5 = vcmask (!%p251_p10), 261248   ;;  %vm745_vm6 = vcmask (!%p251_p10), 392448   ;;  %vm808_vm7 = vcmask (!%p251_p10), 523648  }
  0x12   : > { %2558 = vmatprep.subr.bf16.mxu1 (!%p251_p10), %v2882_v0  ;;  %2801 = vset.pattern.permute.xlu0 (!%p251_p10), %v2888_v9  ;;  %s2894_s28 = smov (!%p251_p10), 16   ;;  %s2895_s30 = smov (!%p251_p10), 72   ;;  %vm998_vm8 = vcmask (!%p251_p10), 654848   ;;  %vm1061_vm9 = vcmask (!%p251_p10), 786048   ;;  %vm1251_vm10 = vcmask (!%p251_p10), 917248   ;;  %vm1314_vm11 = vcmask (!%p251_p10), 1048448  }
  0x13   : > { %s288_s16 = sand.u32 (!%p251_p10), 1, %s2864_s22  }
  0x16   : > { %s292_s13 = scalar_select %p291_p11, %s2872_s24, 1 }
  0x18   : > { %s2420_s14 = sshll.u32 %s292_s13, 1  ;;  %s2481_s15 = sshll.u32 %s292_s13, 2 }
  0x19   : > { %s297_s18 = scalar_lea.vmem %s3376_s0, %s2420_s14  ;;  %s3008_s27 = scalar_lea.vmem %s3377_s1, %s2481_s15 }
  0x1a   : > { %v314_v2 = vld [vmem:[%s297_s18] sm:$0x3]  ;;  %s2887_s13 = smov 64   ;;  %s2889_s14 = smov 80  }
  0x1b   : > { %v2435_v3 = vld.sshfl [vmem:[%s297_s18] sm:$0x3 pattern:$0x76325410]  ;;  %v321_v4 = vsel %vm319_vm1, %v314_v2, 0  ;;  %s2891_s18 = smov 104  }
  0x1c   : > { %819 = vrot.lane.b32.xlu1 %v2435_v3, %s2884_s8  ;;  %566 = vrot.lane.b32.xlu0 %v2435_v3, %s2885_s11  ;;  %v2426_v6 = vld.sshfl [vmem:[%s3008_s27] sm:$0x3 pattern:$0x76325410] }
  0x1d   : > { %2548 = vmatpush3.bf16.msra.mxu0 %v321_v4  ;;  %v2458_v12 = vld.sshfl [vmem:[%s3008_s27 + $0x2] sm:$0x3 pattern:$0x76325410]  ;;  %v437_v14 = vld [vmem:[%s3008_s27] sm:$0x3] }
  0x1e   : > { %2564 = vmatprep.subr.bf16.mxu0 %v2882_v0  ;;  %v442_v15 = vsel %vm319_vm1, %v437_v14, 0 }
  0x20   : > { %2550 = vmatmul.mubr.msk.bf16.vlgmr.msra.gmra.mrb[0].mxu0 %vm315_vm2, %v3014_v5  ;;  %503 = vrot.lane.b32.xlu1 %v2426_v6, %s2884_s8 }
  0x21   : > { %693 = vrot.lane.b32.xlu0 %v2426_v6, %s2886_s12  ;;  %2566 = vmatprep.mubr.msk.bf16.mxu0 %vm2883_vm0, %v2882_v0 }
  0x24   : > { %946 = vrot.lane.b32.xlu1 %v2426_v6, %s2887_s13 }
  0x25   : > { %756 = vrot.lane.b32.xlu0 %v2426_v6, %s2889_s14 }
  0x28   : > { %1009 = vrot.lane.b32.xlu1 %v2426_v6, %s2890_s17 }
  0x29   : > { %1072 = vrot.lane.b32.xlu0 %v2435_v3, %s2891_s18  ;;  %s2419_s18 = sshll.u32 %s288_s16, 4 }
  0x2c   : > { %1325 = vrot.lane.b32.xlu1 %v2435_v3, %s2886_s12 }
  0x2d   : > { %1199 = vrot.lane.b32.xlu0 %v2426_v6, %s2892_s19 }
  0x30   : > { %1562 = vrot.lane.b32.xlu1 %v2435_v3, %s2893_s20  ;;  %s3116_s20 = scalar_lea.vmem [#allocation2], %s2419_s18 }
  0x31   : > { %1262 = vrot.lane.b32.xlu0 %v2426_v6, %s2894_s28 }
  0x34   : > { %1689 = vrot.lane.b32.xlu1 %v2458_v12, %s2886_s12 }
  0x35   : > { %1500 = vrot.lane.b32.xlu0 %v2458_v12, %s2884_s8 }
  0x38   : > { %1751 = vrot.lane.b32.xlu1 %v2458_v12, %s2889_s14 }
  0x39   : > { %1813 = vrot.lane.b32.xlu0 %v2435_v3, %s2889_s14 }
  0x3c   : > { %2064 = vrot.lane.b32.xlu1 %v2435_v3, %s2895_s30 }
  0x3d   : > { %1940 = vrot.lane.b32.xlu0 %v2458_v12, %s2887_s13 }
  0x40   : > { %2191 = vrot.lane.b32.xlu1 %v2458_v12, %s2892_s19 }
  0x41   : > { %2002 = vrot.lane.b32.xlu0 %v2458_v12, %s2890_s17 }
  0x44   : > { %487 = vperm.xlu1 %2800, %v313_v13  }
  0x45   : > { %2253 = vrot.lane.b32.xlu0 %v2458_v12, %s2894_s28 }
  0x8e   : > { %v3025_v7 = vpop.permute.xlu1 %819  ;;  %v567_v17 = vpop.permute.xlu0 %566 }
  0x8f   : > { %v569_v20 = vsel %vm319_vm1, %v567_v17, 0  ;;  %v822_v24 = vsel %vm319_vm1, %v3025_v7, 0 }
  0x92   : > { %v504_v8 = vpop.permute.xlu1 %503 }
  0x93   : > { %v506_v10 = vsel %vm319_vm1, %v504_v8, 0  ;;  %v694_v22 = vpop.permute.xlu0 %693 }
  0x94   : > { %2565 = vmatpush3.bf16.msra.mxu0 %v506_v10  ;;  %v696_v23 = vsel %vm319_vm1, %v694_v22, 0 }
  0x95   : > { %2576 = vmatprep.subr.mxu0 %v2882_v0 }
  0x96   : > { %v947_v25 = vpop.permute.xlu1 %946 }
  0x97   : > { %2567 = vmatmul.mubr.msk.bf16.vlgmr.msra.gmra.mrb[4].mxu0 %vm315_vm2, %v3033_v11  ;;  %v757_v50 = vpop.permute.xlu0 %756  ;;  %v949_v61 = vsel %vm319_vm1, %v947_v25, 0 }
  0x98   : > { %2577 = vmatpush3.msra.mxu0 %v2994_v1  ;;  %2578 = vmatprep.mubr.msk.f32.mxu0 %vm2883_vm0, %v2882_v0  ;;  %v759_v52 = vsel %vm319_vm1, %v757_v50, 0 }
  0x99   : > { %2587 = vmatprep.subr.bf16.mxu0 %v2882_v0 }
  0x9a   : > { %v1010_v26 = vpop.permute.xlu1 %1009 }
  0x9b   : > { %v1012_v27 = vsel %vm319_vm1, %v1010_v26, 0  ;;  %v1073_v63 = vpop.permute.xlu0 %1072 }
  0x9c   : > { %v1075_v4 = vsel %vm319_vm1, %v1073_v63, 0 }
  0x9e   : > { %v3095_v32 = vpop.permute.xlu1 %1325 }
  0x9f   : > { %v1200_v7 = vpop.permute.xlu0 %1199 }
  0xa2   : > { %v3097_v33 = vpop.permute.xlu1 %1562 }
  0xa3   : > { %v1263_v8 = vpop.permute.xlu0 %1262 }
  0xa4   : > { %v1265_v9 = vsel %vm319_vm1, %v1263_v8, 0 }
  0xa6   : > { %v3099_v34 = vpop.permute.xlu1 %1689 }
  0xa7   : > { %v1501_v10 = vpop.permute.xlu0 %1500 }
  0xaa   : > { %v3101_v35 = vpop.permute.xlu1 %1751 }
  0xab   : > { %v3153_v12 = vpop.permute.xlu0 %1813 }
  0xae   : > { %v3103_v36 = vpop.permute.xlu1 %2064 }
  0xaf   : > { %v3155_v13 = vpop.permute.xlu0 %1940 }
  0xb2   : > { %v3105_v37 = vpop.permute.xlu1 %2191 }
  0xb3   : > { %v3157_v14 = vpop.permute.xlu0 %2002 }
  0xc3   : > { %v3107_v39 = vpop.permute.xlu1 %487 }
  0xf3   : > { %v357_v16 = vpop.f32.mrb[0].mxu0 }
  0xf4   : > { %v2551_v18 = vpop.f32.mrb[1].mxu0  ;;  %2556 = vmatmul.mubr.msk.f32.vlgmr.msra.gmra.mrb[0].mxu1 %vm363_vm3, %v357_v16 }
  0xf5   : > { %2559 = vmatpush3.bf16.msra.mxu1 %v442_v15  ;;  %v360_v19 = vpop.f32.mrb[2].mxu0  ;;  %2560 = vmatprep.mubr.msk.bf16.mxu1 %vm2883_vm0, %v2882_v0  ;;  %v3159_v18 = vpop.permute.xlu0 %2253 }
  0xf6   : > { %v2552_v21 = vpop.f32.mrb[3].mxu0  ;;  %2570 = vmatprep.subr.bf16.mxu1 %v2882_v0 }
  0xf8   : > { %2561 = vmatmul.mubr.msk.bf16.vlgmr.msra.gmra.mrb[4].mxu1 %vm315_vm2, %v3033_v11 }
  0xf9   : > { %2571 = vmatpush3.bf16.msra.mxu1 %v569_v20  ;;  %2572 = vmatprep.mubr.msk.bf16.mxu1 %vm2883_vm0, %v2882_v0 }
  0xfa   : > { %2581 = vmatprep.subr.bf16.mxu1 %v2882_v0 }
 0x100   : > { %2573 = vmatmul.mubr.msk.bf16.vlgmr.msra.gmra.mrb[8].mxu1 %vm315_vm2, %v3014_v5 }
 0x101   : > { %2582 = vmatpush3.bf16.msra.mxu1 %v696_v23  ;;  %2583 = vmatprep.mubr.msk.bf16.mxu1 %vm2883_vm0, %v2882_v0 }
 0x102   : > { %2593 = vmatprep.subr.bf16.mxu1 %v2882_v0 }
 0x108   : > { %2584 = vmatmul.mubr.msk.bf16.vlgmr.msra.gmra.mrb[12].mxu1 %vm315_vm2, %v3033_v11 }
 0x109   : > { %2594 = vmatpush3.bf16.msra.mxu1 %v822_v24  ;;  %2595 = vmatprep.mubr.msk.bf16.mxu1 %vm2883_vm0, %v2882_v0 }
 0x10a   : > { %2610 = vmatprep.subr.bf16.mxu1 %v2882_v0 }
 0x110   : > { %2596 = vmatmul.mubr.msk.bf16.vlgmr.msra.gmra.mrb[16].mxu1 %vm315_vm2, %v3014_v5 }
 0x111   : > { %2611 = vmatpush3.bf16.msra.mxu1 %v1012_v27  ;;  %2612 = vmatprep.mubr.msk.bf16.mxu1 %vm2883_vm0, %v2882_v0 }
 0x112   : > { %2622 = vmatprep.subr.mxu1 %v2882_v0 }
 0x118   : > { %2613 = vmatmul.mubr.msk.bf16.vlgmr.msra.gmra.mrb[20].mxu1 %vm315_vm2, %v3033_v11 }
 0x119   : > { %2623 = vmatpush3.msra.mxu1 %v2994_v1  ;;  %2624 = vmatprep.mubr.msk.f32.mxu1 %vm2883_vm0, %v2882_v0 }
 0x11a   : > { %2627 = vmatprep.subr.bf16.mxu1 %v2882_v0 }
 0x16a   : > { %v542_v28 = vpop.f32.mrb[4].mxu0 }
 0x16b   : > { %v2568_v29 = vpop.f32.mrb[5].mxu0 }
 0x16c   : > { %v545_v30 = vpop.f32.mrb[6].mxu0 }
 0x16d   : > { %v2569_v31 = vpop.f32.mrb[7].mxu0 }
 0x1c7   : > { %v433_v38 = vpop.f32.mrb[0].mxu1 }
 0x1c8   : > { %v548_v40 = vadd.f32 %v542_v28, %v433_v38  ;;  %v2557_v41 = vpop.f32.mrb[1].mxu1 }
 0x1ca   : > { %v549_v42 = vadd.f32 %v548_v40, %v3107_v39 }
 0x1cb   : > { %v478_v43 = vpop.f32.mrb[4].mxu1 }
 0x1cc   : > { %v484_v44 = vadd.f32 %v478_v43, %v433_v38  ;;  %v2562_v45 = vpop.f32.mrb[5].mxu1  ;;  %v550_v46 = vmax.f32 %v549_v42, 0.0 }
 0x1cd   : > { %v481_v47 = vpop.f32.mrb[6].mxu1 }
 0x1ce   : > { %v490_v48 = vadd.f32 %v3107_v39, %v484_v44  ;;  %v2563_v49 = vpop.f32.mrb[7].mxu1  ;;  %552 = vrot.lane.b32.xlu0 %v550_v46, %s2894_s28 }
 0x1d0   : > { %v491_v51 = vmax.f32 %v490_v48, 0.0 }
 0x1d2   : > { %493 = vst.msk [vmem:[%s3116_s20] sm:$0xff] %vm492_vm4, %v491_v51 }
 0x1d3   : > { %v605_v53 = vpop.f32.mrb[8].mxu1 }
 0x1d4   : > { %v2574_v54 = vpop.f32.mrb[9].mxu1  ;;  %2579 = vmatmul.mubr.msk.f32.vlgmr.msra.gmra.mrb[8].mxu0 %vm363_vm3, %v605_v53 }
 0x1d5   : > { %v608_v55 = vpop.f32.mrb[10].mxu1  ;;  %2588 = vmatpush3.bf16.msra.mxu0 %v759_v52  ;;  %2589 = vmatprep.mubr.msk.bf16.mxu0 %vm2883_vm0, %v2882_v0  ;;  %v1202_v52 = vsel %vm319_vm1, %v1200_v7, 0 }
 0x1d6   : > { %v2575_v56 = vpop.f32.mrb[11].mxu1  ;;  %2599 = vmatprep.subr.mxu0 %v2882_v0 }
 0x1d7   : > { %v1328_v56 = vsel %vm319_vm1, %v3095_v32, 0 }
 0x1d8   : > { %2590 = vmatmul.mubr.msk.bf16.vlgmr.msra.gmra.mrb[12].mxu0 %vm315_vm2, %v3033_v11 }
 0x1d9   : > { %2600 = vmatpush3.msra.mxu0 %v2994_v1  ;;  %2601 = vmatprep.mubr.msk.f32.mxu0 %vm2883_vm0, %v2882_v0 }
 0x1da   : > { %2604 = vmatprep.subr.bf16.mxu0 %v2882_v0 }
 0x1db   : > { %v732_v57 = vpop.f32.mrb[12].mxu1 }
 0x1dc   : > { %v2585_v58 = vpop.f32.mrb[13].mxu1 }
 0x1dd   : > { %v735_v59 = vpop.f32.mrb[14].mxu1  ;;  %v1503_v58 = vsel %vm319_vm1, %v1501_v10, 0 }
 0x1de   : > { %v2586_v60 = vpop.f32.mrb[15].mxu1 }
 0x1e3   : > { %v858_v62 = vpop.f32.mrb[16].mxu1 }
 0x1e4   : > { %v2597_v2 = vpop.f32.mrb[17].mxu1  ;;  %2602 = vmatmul.mubr.msk.f32.vlgmr.msra.gmra.mrb[10].mxu0 %vm363_vm3, %v858_v62 }
 0x1e5   : > { %2605 = vmatpush3.bf16.msra.mxu0 %v949_v61  ;;  %v861_v3 = vpop.f32.mrb[18].mxu1  ;;  %2606 = vmatprep.mubr.msk.bf16.mxu0 %vm2883_vm0, %v2882_v0 }
 0x1e6   : > { %v2598_v6 = vpop.f32.mrb[19].mxu1  ;;  %2616 = vmatprep.subr.bf16.mxu0 %v2882_v0 }
 0x1e8   : > { %2607 = vmatmul.mubr.msk.bf16.vlgmr.msra.gmra.mrb[16].mxu0 %vm315_vm2, %v3033_v11 }
 0x1e9   : > { %2617 = vmatpush3.bf16.msra.mxu0 %v1075_v4  ;;  %2618 = vmatprep.mubr.msk.bf16.mxu0 %vm2883_vm0, %v2882_v0 }
 0x1ea   : > { %2633 = vmatprep.subr.bf16.mxu0 %v2882_v0 }
 0x1eb   : > { %v1048_v15 = vpop.f32.mrb[20].mxu1 }
 0x1ec   : > { %v2614_v16 = vpop.f32.mrb[21].mxu1 }
 0x1ed   : > { %v1051_v17 = vpop.f32.mrb[22].mxu1 }
 0x1ee   : > { %v2615_v19 = vpop.f32.mrb[23].mxu1 }
 0x1ef   : > { %v1443_v19 = vld [vmem:[%s3008_s27 + $0x2] sm:$0x3]  ;;  %s2482_s27 = sshll.u32 %s2872_s24, 8  ;;  %s2896_s24 = smov [#allocation2]  }
 0x1f0   : > { %2619 = vmatmul.mubr.msk.bf16.vlgmr.msra.gmra.mrb[20].mxu0 %vm315_vm2, %v3014_v5 }
 0x1f1   : > { %2634 = vmatpush3.bf16.msra.mxu0 %v1265_v9  ;;  %2635 = vmatprep.mubr.msk.bf16.mxu0 %vm2883_vm0, %v2882_v0 }
 0x1f2   : > { %2645 = vmatprep.subr.mxu0 %v2882_v0 }
 0x1f8   : > { %2636 = vmatmul.mubr.msk.bf16.vlgmr.msra.gmra.mrb[24].mxu0 %vm315_vm2, %v3033_v11 }
 0x1f9   : > { %2646 = vmatpush3.msra.mxu0 %v2994_v1  ;;  %2647 = vmatprep.mubr.msk.f32.mxu0 %vm2883_vm0, %v2882_v0 }
 0x1fa   : > { %2650 = vmatprep.subr.bf16.mxu0 %v2882_v0 }
 0x240   : > { %v553_v20 = vpop.permute.xlu0 %552 }
 0x241   : > { %556 = vst.msk [vmem:[%s3116_s20] sm:$0xff] %vm555_vm5, %v553_v20 }
 0x2a7   : > { %v680_v21 = vpop.f32.mrb[8].mxu0 }
 0x2a8   : > { %v738_v22 = vadd.f32 %v732_v57, %v680_v21  ;;  %v2580_v23 = vpop.f32.mrb[9].mxu0 }
 0x2aa   : > { %v739_v24 = vadd.f32 %v738_v22, %v3107_v39  ;;  %v1445_v22 = vsel %vm319_vm1, %v1443_v19, 0 }
 0x2ab   : > { %v795_v25 = vpop.f32.mrb[12].mxu0 }
 0x2ac   : > { %v801_v26 = vadd.f32 %v795_v25, %v680_v21  ;;  %v2591_v27 = vpop.f32.mrb[13].mxu0  ;;  %v740_v28 = vmax.f32 %v739_v24, 0.0 }
 0x2ad   : > { %v798_v29 = vpop.f32.mrb[14].mxu0  ;;  %v1565_v27 = vsel %vm319_vm1, %v3097_v33, 0 }
 0x2ae   : > { %v802_v30 = vadd.f32 %v801_v26, %v3107_v39  ;;  %742 = vrot.lane.b32.xlu0 %v740_v28, %s2892_s19  ;;  %v2592_v31 = vpop.f32.mrb[15].mxu0  ;;  %v1754_v29 = vsel %vm319_vm1, %v3101_v35, 0 }
 0x2b0   : > { %v803_v38 = vmax.f32 %v802_v30, 0.0 }
 0x2b2   : > { %805 = vrot.lane.b32.xlu0 %v803_v38, %s2890_s17 }
 0x2b7   : > { %v933_v40 = vpop.f32.mrb[10].mxu0 }
 0x2b8   : > { %v1054_v41 = vadd.f32 %v1048_v15, %v933_v40  ;;  %v2603_v42 = vpop.f32.mrb[11].mxu0 }
 0x2ba   : > { %v1055_v43 = vadd.f32 %v1054_v41, %v3107_v39 }
 0x2bb   : > { %v985_v44 = vpop.f32.mrb[16].mxu0 }
 0x2bc   : > { %v1056_v45 = vmax.f32 %v1055_v43, 0.0  ;;  %v991_v46 = vadd.f32 %v985_v44, %v933_v40  ;;  %v2608_v47 = vpop.f32.mrb[17].mxu0 }
 0x2bd   : > { %v988_v48 = vpop.f32.mrb[18].mxu0 }
 0x2be   : > { %v992_v49 = vadd.f32 %v991_v46, %v3107_v39  ;;  %1058 = vrot.lane.b32.xlu0 %v1056_v45, %s2889_s14  ;;  %v2609_v50 = vpop.f32.mrb[19].mxu0 }
 0x2c0   : > { %v993_v51 = vmax.f32 %v992_v49, 0.0 }
 0x2c2   : > { %995 = vrot.lane.b32.xlu0 %v993_v51, %s2887_s13 }
 0x2c3   : > { %v1111_v53 = vpop.f32.mrb[20].mxu0 }
 0x2c4   : > { %v2620_v54 = vpop.f32.mrb[21].mxu0  ;;  %2625 = vmatmul.mubr.msk.f32.vlgmr.msra.gmra.mrb[2].mxu1 %vm363_vm3, %v1111_v53  ;;  %v1692_v53 = vsel %vm319_vm1, %v3099_v34, 0  ;;  %v2005_v34 = vsel %vm319_vm1, %v3157_v14, 0 }
 0x2c5   : > { %2628 = vmatpush3.bf16.msra.mxu1 %v1202_v52  ;;  %v1114_v55 = vpop.f32.mrb[22].mxu0  ;;  %2629 = vmatprep.mubr.msk.bf16.mxu1 %vm2883_vm0, %v2882_v0 }
 0x2c6   : > { %v2621_v57 = vpop.f32.mrb[23].mxu0  ;;  %2639 = vmatprep.subr.bf16.mxu1 %v2882_v0 }
 0x2c7   : > { %v1816_v57 = vsel %vm319_vm1, %v3153_v12, 0 }
 0x2c8   : > { %2630 = vmatmul.mubr.msk.bf16.vlgmr.msra.gmra.mrb[24].mxu1 %vm315_vm2, %v3033_v11 }
 0x2c9   : > { %2640 = vmatpush3.bf16.msra.mxu1 %v1328_v56  ;;  %2641 = vmatprep.mubr.msk.bf16.mxu1 %vm2883_vm0, %v2882_v0 }
 0x2ca   : > { %2656 = vmatprep.subr.bf16.mxu1 %v2882_v0 }
 0x2cb   : > { %v1301_v32 = vpop.f32.mrb[24].mxu0 }
 0x2cc   : > { %v2637_v59 = vpop.f32.mrb[25].mxu0 }
 0x2cd   : > { %v1304_v60 = vpop.f32.mrb[26].mxu0 }
 0x2ce   : > { %v2638_v61 = vpop.f32.mrb[27].mxu0 }
 0x2d0   : > { %2642 = vmatmul.mubr.msk.bf16.vlgmr.msra.gmra.mrb[28].mxu1 %vm315_vm2, %v3014_v5 }
 0x2d1   : > { %2657 = vmatpush3.bf16.msra.mxu1 %v1503_v58  ;;  %2658 = vmatprep.mubr.msk.bf16.mxu1 %vm2883_vm0, %v2882_v0 }
 0x2d2   : > { %2668 = vmatprep.subr.mxu1 %v2882_v0 }
 0x2d8   : > { %2659 = vmatmul.mubr.msk.bf16.vlgmr.msra.gmra.mrb[32].mxu1 %vm315_vm2, %v3033_v11 }
 0x2d9   : > { %2669 = vmatpush3.msra.mxu1 %v2994_v1  ;;  %2670 = vmatprep.mubr.msk.f32.mxu1 %vm2883_vm0, %v2882_v0 }
 0x2da   : > { %2673 = vmatprep.subr.bf16.mxu1 %v2882_v0 }
 0x320   : > { %v743_v62 = vpop.permute.xlu0 %742 }
 0x321   : > { %746 = vst.msk [vmem:[%s3116_s20] sm:$0xff] %vm745_vm6, %v743_v62 }
 0x324   : > { %v806_v63 = vpop.permute.xlu0 %805 }
 0x325   : > { %809 = vst.msk [vmem:[%s3116_s20] sm:$0xff] %vm808_vm7, %v806_v63 }
 0x330   : > { %v1059_v2 = vpop.permute.xlu0 %1058 }
 0x334   : > { %v996_v3 = vpop.permute.xlu0 %995 }
 0x335   : > { %999 = vst.msk [vmem:[%s3116_s20] sm:$0xff] %vm998_vm8, %v996_v3 }
 0x336   : > { %1062 = vst.msk [vmem:[%s3116_s20] sm:$0xff] %vm1061_vm9, %v1059_v2 }
 0x397   : > { %v1186_v4 = vpop.f32.mrb[2].mxu1 }
 0x398   : > { %v1307_v6 = vadd.f32 %v1301_v32, %v1186_v4  ;;  %v2626_v7 = vpop.f32.mrb[3].mxu1 }
 0x39a   : > { %v1308_v20 = vadd.f32 %v1307_v6, %v3107_v39 }
 0x39b   : > { %v1238_v8 = vpop.f32.mrb[24].mxu1 }
 0x39c   : > { %v1244_v9 = vadd.f32 %v1238_v8, %v1186_v4  ;;  %v2631_v10 = vpop.f32.mrb[25].mxu1  ;;  %v1309_v24 = vmax.f32 %v1308_v20, 0.0  ;;  %v2067_v20 = vsel %vm319_vm1, %v3103_v36, 0 }
 0x39d   : > { %v1241_v15 = vpop.f32.mrb[26].mxu1 }
 0x39e   : > { %v1245_v16 = vadd.f32 %v1244_v9, %v3107_v39  ;;  %v2632_v17 = vpop.f32.mrb[27].mxu1  ;;  %v1943_v15 = vsel %vm319_vm1, %v3155_v13, 0  ;;  %v2256_v13 = vsel %vm319_vm1, %v3159_v18, 0 }
 0x3a0   : > { %v1246_v21 = vmax.f32 %v1245_v16, 0.0 }
 0x3a2   : > { %1248 = vrot.lane.b32.xlu0 %v1246_v21, %s2886_s12 }
 0x3a3   : > { %v1364_v23 = vpop.f32.mrb[28].mxu1 }
 0x3a4   : > { %v2643_v25 = vpop.f32.mrb[29].mxu1  ;;  %2648 = vmatmul.mubr.msk.f32.vlgmr.msra.gmra.mrb[28].mxu0 %vm363_vm3, %v1364_v23 }
 0x3a5   : > { %2651 = vmatpush3.bf16.msra.mxu0 %v1445_v22  ;;  %v1367_v26 = vpop.f32.mrb[30].mxu1  ;;  %2652 = vmatprep.mubr.msk.bf16.mxu0 %vm2883_vm0, %v2882_v0 }
 0x3a6   : > { %v2644_v28 = vpop.f32.mrb[31].mxu1  ;;  %1311 = vrot.lane.b32.xlu0 %v1309_v24, %s2884_s8  ;;  %2662 = vmatprep.subr.bf16.mxu0 %v2882_v0 }
 0x3a8   : > { %2653 = vmatmul.mubr.msk.bf16.vlgmr.msra.gmra.mrb[32].mxu0 %vm315_vm2, %v3033_v11 }
 0x3a9   : > { %2663 = vmatpush3.bf16.msra.mxu0 %v1565_v27  ;;  %2664 = vmatprep.mubr.msk.bf16.mxu0 %vm2883_vm0, %v2882_v0 }
 0x3aa   : > { %2679 = vmatprep.subr.bf16.mxu0 %v2882_v0 }
 0x3ab   : > { %v1539_v33 = vpop.f32.mrb[32].mxu1 }
 0x3ac   : > { %v2660_v35 = vpop.f32.mrb[33].mxu1 }
 0x3ad   : > { %v1542_v30 = vpop.f32.mrb[34].mxu1 }
 0x3ae   : > { %v2661_v31 = vpop.f32.mrb[35].mxu1 }
 0x3b0   : > { %2665 = vmatmul.mubr.msk.bf16.vlgmr.msra.gmra.mrb[36].mxu0 %vm315_vm2, %v3014_v5 }
 0x3b1   : > { %2680 = vmatpush3.bf16.msra.mxu0 %v1754_v29  ;;  %2681 = vmatprep.mubr.msk.bf16.mxu0 %vm2883_vm0, %v2882_v0 }
 0x3b2   : > { %2691 = vmatprep.subr.mxu0 %v2882_v0 }
 0x3b8   : > { %2682 = vmatmul.mubr.msk.bf16.vlgmr.msra.gmra.mrb[40].mxu0 %vm315_vm2, %v3033_v11 }
 0x3b9   : > { %2692 = vmatpush3.msra.mxu0 %v2994_v1  ;;  %2693 = vmatprep.mubr.msk.f32.mxu0 %vm2883_vm0, %v2882_v0 }
 0x3ba   : > { %2696 = vmatprep.subr.bf16.mxu0 %v2882_v0 }
 0x414   : > { %v1249_v38 = vpop.permute.xlu0 %1248 }
 0x415   : > { %1252 = vst.msk [vmem:[%s3116_s20] sm:$0xff] %vm1251_vm10, %v1249_v38 }
 0x418   : > { %v1312_v40 = vpop.permute.xlu0 %1311 }
 0x419   : > { %1315 = vst.msk [vmem:[%s3116_s20] sm:$0xff] %vm1314_vm11, %v1312_v40 }
 0x477   : > { %v1439_v41 = vpop.f32.mrb[28].mxu0 }
 0x478   : > { %v1545_v42 = vadd.f32 %v1539_v33, %v1439_v41  ;;  %v2649_v43 = vpop.f32.mrb[29].mxu0 }
 0x47a   : > { %v1546_v44 = vadd.f32 %v1545_v42, %v3107_v39  ;;  %v2194_v42 = vsel %vm319_vm1, %v3105_v37, 0 }
 0x47b   : > { %v1481_v45 = vpop.f32.mrb[32].mxu0 }
 0x47c   : > { %v1547_v46 = vmax.f32 %v1546_v44, 0.0  ;;  %v1487_v47 = vadd.f32 %v1481_v45, %v1439_v41  ;;  %v2654_v48 = vpop.f32.mrb[33].mxu0 }
 0x47d   : > { %v1484_v49 = vpop.f32.mrb[34].mxu0 }
 0x47e   : > { %v1488_v50 = vadd.f32 %v1487_v47, %v3107_v39  ;;  %1549 = vrot.lane.b32.xlu1 %v1547_v46, %s2894_s28  ;;  %v2655_v51 = vpop.f32.mrb[35].mxu0  ;;  %s2806_s28 = sshll.u32 %s2896_s24, 4  ;;  %s2807_s28 = int_to_ptr.vmem [resolvable:$false] %s2806_s28 }
 0x47f   : > { %s2808_s30 = scalar_lea.vmem %s2807_s28, 512 }
 0x480   : > { %v1489_v52 = vmax.f32 %v1488_v50, 0.0 }
 0x482   : > { %1490 = vst.msk [vmem:[%s3116_s20 + $0x8] sm:$0xff] %vm492_vm4, %v1489_v52 }
 0x483   : > { %v1601_v54 = vpop.f32.mrb[36].mxu0 }
 0x484   : > { %v2666_v55 = vpop.f32.mrb[37].mxu0  ;;  %2671 = vmatmul.mubr.msk.f32.vlgmr.msra.gmra.mrb[36].mxu1 %vm363_vm3, %v1601_v54 }
 0x485   : > { %2674 = vmatpush3.bf16.msra.mxu1 %v1692_v53  ;;  %v1604_v56 = vpop.f32.mrb[38].mxu0  ;;  %2675 = vmatprep.mubr.msk.bf16.mxu1 %vm2883_vm0, %v2882_v0 }
 0x486   : > { %v2667_v58 = vpop.f32.mrb[39].mxu0  ;;  %2685 = vmatprep.subr.bf16.mxu1 %v2882_v0 }
 0x488   : > { %2676 = vmatmul.mubr.msk.bf16.vlgmr.msra.gmra.mrb[40].mxu1 %vm315_vm2, %v3033_v11 }
 0x489   : > { %2686 = vmatpush3.bf16.msra.mxu1 %v1816_v57  ;;  %2687 = vmatprep.mubr.msk.bf16.mxu1 %vm2883_vm0, %v2882_v0 }
 0x48a   : > { %2702 = vmatprep.subr.bf16.mxu1 %v2882_v0 }
 0x48b   : > { %v1790_v12 = vpop.f32.mrb[40].mxu0 }
 0x48c   : > { %v2683_v14 = vpop.f32.mrb[41].mxu0 }
 0x48d   : > { %v1793_v32 = vpop.f32.mrb[42].mxu0 }
 0x48e   : > { %v2684_v59 = vpop.f32.mrb[43].mxu0 }
 0x490   : > { %2688 = vmatmul.mubr.msk.bf16.vlgmr.msra.gmra.mrb[44].mxu1 %vm315_vm2, %v3014_v5 }
 0x491   : > { %2703 = vmatpush3.bf16.msra.mxu1 %v2005_v34  ;;  %2704 = vmatprep.mubr.msk.bf16.mxu1 %vm2883_vm0, %v2882_v0 }
 0x492   : > { %2714 = vmatprep.subr.mxu1 %v2882_v0 }
 0x498   : > { %2705 = vmatmul.mubr.msk.bf16.vlgmr.msra.gmra.mrb[48].mxu1 %vm315_vm2, %v3033_v11 }
 0x499   : > { %2715 = vmatpush3.msra.mxu1 %v2994_v1  ;;  %2716 = vmatprep.mubr.msk.f32.mxu1 %vm2883_vm0, %v2882_v0 }
 0x49a   : > { %2719 = vmatprep.subr.bf16.mxu1 %v2882_v0 }
 0x4f0   : > { %v1550_v60 = vpop.permute.xlu1 %1549 }
 0x4f1   : > { %1552 = vst.msk [vmem:[%s3116_s20 + $0x8] sm:$0xff] %vm555_vm5, %v1550_v60 }
 0x557   : > { %v1676_v61 = vpop.f32.mrb[36].mxu1 }
 0x558   : > { %v1796_v62 = vadd.f32 %v1790_v12, %v1676_v61  ;;  %v2672_v63 = vpop.f32.mrb[37].mxu1 }
 0x55a   : > { %v1797_v2 = vadd.f32 %v1796_v62, %v3107_v39 }
 0x55b   : > { %v1728_v3 = vpop.f32.mrb[40].mxu1 }
 0x55c   : > { %v1798_v4 = vmax.f32 %v1797_v2, 0.0  ;;  %v1734_v1 = vadd.f32 %v1728_v3, %v1676_v61  ;;  %v2677_v6 = vpop.f32.mrb[41].mxu1 }
 0x55d   : > { %v1731_v7 = vpop.f32.mrb[42].mxu1 }
 0x55e   : > { %v1735_v8 = vadd.f32 %v1734_v1, %v3107_v39  ;;  %v2678_v9 = vpop.f32.mrb[43].mxu1  ;;  %1800 = vrot.lane.b32.xlu1 %v1798_v4, %s2890_s17 }
 0x560   : > { %v1736_v10 = vmax.f32 %v1735_v8, 0.0 }
 0x562   : > { %1738 = vrot.lane.b32.xlu1 %v1736_v10, %s2892_s19  ;;  %s3325_s19 = scalar_lea.hbm %s3382_s6, %s2482_s27 }
 0x563   : > { %v1852_v16 = vpop.f32.mrb[44].mxu1 }
 0x564   : > { %v2689_v17 = vpop.f32.mrb[45].mxu1  ;;  %2694 = vmatmul.mubr.msk.f32.vlgmr.msra.gmra.mrb[30].mxu0 %vm363_vm3, %v1852_v16 }
 0x565   : > { %2697 = vmatpush3.bf16.msra.mxu0 %v1943_v15  ;;  %v1855_v19 = vpop.f32.mrb[46].mxu1  ;;  %2698 = vmatprep.mubr.msk.bf16.mxu0 %vm2883_vm0, %v2882_v0 }
 0x566   : > { %v2690_v21 = vpop.f32.mrb[47].mxu1  ;;  %2708 = vmatprep.subr.bf16.mxu0 %v2882_v0 }
 0x568   : > { %2699 = vmatmul.mubr.msk.bf16.vlgmr.msra.gmra.mrb[44].mxu0 %vm315_vm2, %v3033_v11 }
 0x569   : > { %2709 = vmatpush3.bf16.msra.mxu0 %v2067_v20  ;;  %2710 = vmatprep.mubr.msk.bf16.mxu0 %vm2883_vm0, %v2882_v0 }
 0x56a   : > { %2725 = vmatprep.subr.bf16.mxu0 %v2882_v0 }
 0x56b   : > { %v2041_v36 = vpop.f32.mrb[48].mxu1 }
 0x56c   : > { %v2706_v22 = vpop.f32.mrb[49].mxu1 }
 0x56d   : > { %v2044_v23 = vpop.f32.mrb[50].mxu1 }
 0x56e   : > { %v2707_v24 = vpop.f32.mrb[51].mxu1 }
 0x570   : > { %2711 = vmatmul.mubr.msk.bf16.vlgmr.msra.gmra.mrb[48].mxu0 %vm315_vm2, %v3014_v5 }
 0x571   : > { %2726 = vmatpush3.bf16.msra.mxu0 %v2256_v13  ;;  %2727 = vmatprep.mubr.msk.bf16.mxu0 %vm2883_vm0, %v2882_v0 }
 0x578   : > { %2728 = vmatmul.mubr.msk.bf16.vlgmr.msra.gmra.mrb[52].mxu0 %vm315_vm2, %v3033_v11 }
 0x5d0   : > { %v1801_v25 = vpop.permute.xlu1 %1800 }
 0x5d4   : > { %v1739_v26 = vpop.permute.xlu1 %1738 }
 0x5d5   : > { %1741 = vst.msk [vmem:[%s3116_s20 + $0x8] sm:$0xff] %vm745_vm6, %v1739_v26 }
 0x5d6   : > { %1803 = vst.msk [vmem:[%s3116_s20 + $0x8] sm:$0xff] %vm808_vm7, %v1801_v25 }
 0x637   : > { %v1927_v18 = vpop.f32.mrb[30].mxu0 }
 0x638   : > { %v2047_v27 = vadd.f32 %v2041_v36, %v1927_v18  ;;  %v2695_v5 = vpop.f32.mrb[31].mxu0 }
 0x63a   : > { %v2048_v28 = vadd.f32 %v2047_v27, %v3107_v39 }
 0x63b   : > { %v1979_v29 = vpop.f32.mrb[44].mxu0 }
 0x63c   : > { %v2049_v33 = vmax.f32 %v2048_v28, 0.0  ;;  %v1985_v35 = vadd.f32 %v1979_v29, %v1927_v18  ;;  %v2700_v30 = vpop.f32.mrb[45].mxu0 }
 0x63d   : > { %v1982_v31 = vpop.f32.mrb[46].mxu0 }
 0x63e   : > { %v1986_v38 = vadd.f32 %v1985_v35, %v3107_v39  ;;  %2051 = vrot.lane.b32.xlu1 %v2049_v33, %s2889_s14  ;;  %v2701_v40 = vpop.f32.mrb[47].mxu0 }
 0x640   : > { %v1987_v41 = vmax.f32 %v1986_v38, 0.0 }
 0x642   : > { %1989 = vrot.lane.b32.xlu1 %v1987_v41, %s2887_s13  ;;  %s2323_s13 = sshll.u32 %s3116_s20, 4  ;;  %s3327_s13 = int_to_ptr.vmem [resolvable:$true] %s2323_s13 }
 0x643   : > { %v2103_v43 = vpop.f32.mrb[48].mxu0  ;;  %p2809_p1 = scmp.lt.s32.totalorder %s3327_s13, %s2807_s28 }
 0x644   : > { %v2712_v44 = vpop.f32.mrb[49].mxu0  ;;  %2717 = vmatmul.mubr.msk.f32.vlgmr.msra.gmra.mrb[38].mxu1 %vm363_vm3, %v2103_v43 }
 0x645   : > { %2720 = vmatpush3.bf16.msra.mxu1 %v2194_v42  ;;  %v2106_v45 = vpop.f32.mrb[50].mxu0  ;;  %2721 = vmatprep.mubr.msk.bf16.mxu1 %vm2883_vm0, %v2882_v0 }
 0x646   : > { %v2713_v46 = vpop.f32.mrb[51].mxu0 }
 0x648   : > { %2722 = vmatmul.mubr.msk.bf16.vlgmr.msra.gmra.mrb[52].mxu1 %vm315_vm2, %v3033_v11 }
 0x64b   : > { %v2292_v47 = vpop.f32.mrb[52].mxu0 }
 0x64c   : > { %v2729_v48 = vpop.f32.mrb[53].mxu0 }
 0x64d   : > { %v2295_v37 = vpop.f32.mrb[54].mxu0 }
 0x64e   : > { %v2730_v49 = vpop.f32.mrb[55].mxu0 }
 0x6b0   : > { %v2052_v50 = vpop.permute.xlu1 %2051 }
 0x6b4   : > { %v1990_v51 = vpop.permute.xlu1 %1989 }
 0x6b5   : > { %1992 = vst.msk [vmem:[%s3116_s20 + $0x8] sm:$0xff] %vm998_vm8, %v1990_v51 }
 0x6b6   : > { %2054 = vst.msk [vmem:[%s3116_s20 + $0x8] sm:$0xff] %vm1061_vm9, %v2052_v50 }
 0x717   : > { %v2178_v52 = vpop.f32.mrb[38].mxu1 }
 0x718   : > { %v2298_v53 = vadd.f32 %v2292_v47, %v2178_v52  ;;  %v2718_v0 = vpop.f32.mrb[39].mxu1 }
 0x71a   : > { %v2299_v34 = vadd.f32 %v2298_v53, %v3107_v39 }
 0x71b   : > { %v2230_v54 = vpop.f32.mrb[52].mxu1 }
 0x71c   : > { %v2236_v55 = vadd.f32 %v2230_v54, %v2178_v52  ;;  %v2723_v56 = vpop.f32.mrb[53].mxu1  ;;  %v2300_v14 = vmax.f32 %v2299_v34, 0.0 }
 0x71d   : > { %v2233_v11 = vpop.f32.mrb[54].mxu1 }
 0x71e   : > { %v2237_v57 = vadd.f32 %v2236_v55, %v3107_v39  ;;  %v2724_v58 = vpop.f32.mrb[55].mxu1 }
 0x720   : > { %v2238_v12 = vmax.f32 %v2237_v57, 0.0 }
 0x722   : > { %2240 = vrot.lane.b32.xlu1 %v2238_v12, %s2886_s12  ;;  %s2802_s12 = scalar_lea.vmem %s3327_s13, 256 }
 0x723   : > { %p2803_p12 = scmp.ne.s32.totalorder %s3327_s13, %s2802_s12  ;;  %p2810_p2 = scmp.lt.s32.totalorder %s2808_s30, %s2802_s12 }
 0x725   : > { %p2804_p13 = pnand %p2803_p12, %p2972_p4  ;;  %p2811_p3 = por %p2810_p2, %p2809_p1 }
 0x726   : > { %2302 = vrot.lane.b32.xlu1 %v2300_v14, %s2884_s8  ;;  %s2307_s8 = scalar_lea.sflag [#allocation3], %s288_s16 }
 0x727   : > { %p2805_p0 = pneg %p2804_p13 }
 0x729   : > { %p2812_p5 = pnand %p2811_p3, %p2805_p0 }
 0x794   : > { %v2241_v32 = vpop.permute.xlu1 %2240 }
 0x795   : > { %2243 = vst.msk [vmem:[%s3116_s20 + $0x8] sm:$0xff] %vm1251_vm10, %v2241_v32 }
 0x798   : > { %v2303_v39 = vpop.permute.xlu1 %2302 }
 0x799   : > { %2305 = vst.msk [vmem:[%s3116_s20 + $0x8] sm:$0xff] %vm1314_vm11, %v2303_v39 }
 0x79a   : > { %2815 = shalt.err (!%p2812_p5)
}
 0x79b   : > { %s2816_s11 = scalar_lea.hbm %s3325_s19, 256  ;;  %s2820_s18 = scalar_lea.hbm %s3382_s6, 512 }
 0x79c   : > { %p2817_p6 = scmp.ne.s32.totalorder %s3325_s19, %s2816_s11  ;;  %p2821_p10 = scmp.lt.u32.totalorder %s3325_s19, %s3382_s6 }
 0x79d   : > { %p2822_p11 = scmp.lt.u32.totalorder %s2820_s18, %s2816_s11  ;;  %p2824_p13 = scmp.lt.u32.totalorder %s2816_s11, %s3325_s19 }
 0x79e   : > { %p2818_p7 = pnand %p2817_p6, %p2972_p4 }
 0x79f   : > { %p2823_p12 = por %p2822_p11, %p2821_p10 }
 0x7a0   : > { %p2819_p9 = pneg %p2818_p7 }
 0x7a1   : > { %p2825_p0 = por %p2824_p13, %p2823_p12 }
 0x7a3   : > { %p2826_p1 = pnand %p2825_p0, %p2819_p9 }
 0x7a5   : > { %2829 = shalt.err (!%p2826_p1)
}
 0x7a6   : > { %2731 = dma.vmem_to_hbm [thread:$0]  (%p2972_p4), %s3327_s13, 256, %s3325_s19, %s2307_s8  }
 0x7a7 PF: > { %p2737_p2 = scmp.ge.s32.totalorder %s2880_s26, 2  ;;  %s2335_s14 = sand.u32 1, %s2860_s21  }
 0x7a8   : > { %s2336_s17 = scalar_lea.sflag [#allocation3], %s2335_s14 }
 0x7a9   : > { %p2734_p3 = pnand %p2737_p2, %p2979_p8 }
 0x7ab   : > { %2855 = dma.done.wait (!%p2734_p3), %s2336_s17, 256  }
 0x7ac   : > { %2857 = vsyncadd (!%p2734_p3), %s2336_s17, 4294967040  ;;  %s19_s26 = sadd.s32 1, %s2880_s26   ;;  %s3385_s21 = smov %s2864_s22 }
 0x7ad   : > { %p16_p5 = scmp.ge.s32.totalorder %s19_s26, 4   ;;  %s3386_s22 = smov %s2868_s23 }
 0x7ae   : > { %s3387_s23 = smov %s2985_s10  ;;  %s3388_s24 = smov %s2876_s25 }
 0x7af   : > { %s3389_s25 = smov %s3391_s29  ;;  %18 = sbr.rel (!%p16_p5) target bundleno = 4 (0x4), region = 82 }
 0x7b6   :  { %2341 = vsyncpa [#allocation3], 1 }
 0x7b7   :  { %2343 = vsyncpa [#allocation3 + $0x1], 1 }

</bundles_post_ra>
